<compile_context>
chip_gen: v6e
topology: v6e:2x2x1
jax: 0.10.0
libtpu: 0.0.40
codegen_flags: <defaults>
</compile_context>

<pallas_src>
import numpy as np
import jax
import jax.numpy as jnp
from jax.experimental import pallas as pl
from jax.experimental.pallas import tpu as pltpu

# Small DCGAN-shaped hyperparameters (nz / ngf / nc).
NZ, NGF, NC = 16, 8, 3
BN_EPS = 1e-5

# (Cin, Cout) per ConvTranspose2d layer.
LAYERS = [(NZ, NGF * 8), (NGF * 8, NGF * 4), (NGF * 4, NGF * 2),
          (NGF * 2, NGF), (NGF, NC)]
# Input spatial width of the stride-2 layers 1..4.
WIDTHS = [4, 8, 16, 32]


# ------------------------------ Pallas kernel ------------------------------- #

def _generator_kernel(z_ref, w0p_ref, wm1_ref, wm2_ref, wm3_ref, wm4_ref,
                      p1_ref, p2_ref, p3_ref, p4_ref,
                      mavg_ref, gamma_ref, beta_ref,
                      out_ref, x1_ref, x2_ref, x3_ref, x4_ref):
    """Fully fused forward pass.  Activation layout between layers:
       2-D (rows, Cin*W) with rows = batch x spatial-rows (parity-blocked
       storage order), columns = (channel-major, spatial-col-minor), all
       256 lanes wide.  Everything stays in VMEM."""
    nb = z_ref.shape[0]
    f32 = jnp.float32

    def bn_relu(parts, bn_idx, wb):
        # Training-mode BatchNorm over batch+spatial, fused affine + ReLU.
        rows = sum(p.shape[0] for p in parts)
        cnt = float(rows * wb)
        s1 = parts[0].sum(axis=0, keepdims=True)
        s2 = (parts[0] * parts[0]).sum(axis=0, keepdims=True)
        for p in parts[1:]:
            s1 = s1 + p.sum(axis=0, keepdims=True)
            s2 = s2 + (p * p).sum(axis=0, keepdims=True)
        mavg = mavg_ref[bn_idx]                                   # (256, 256)
        mean = jnp.dot(s1, mavg, preferred_element_type=f32) / cnt
        ex2 = jnp.dot(s2, mavg, preferred_element_type=f32) / cnt
        inv_std = jax.lax.rsqrt(ex2 - mean * mean + BN_EPS)
        scale = gamma_ref[bn_idx] * inv_std
        shift = beta_ref[bn_idx] - mean * scale
        return [jnp.maximum(p * scale + shift, 0.0) for p in parts]

    # ---- layer 0: ConvT(nz -> 64, k4, s1, p0) on a 1x1 input, + BN + ReLU ----
    zb = z_ref[...].astype(jnp.bfloat16)                          # (N, nz)
    for h in range(4):                                            # one spatial row / matmul
        x1_ref[h * nb:(h + 1) * nb, :] = jnp.dot(
            zb, w0p_ref[h], preferred_element_type=f32)           # (N, 64*4)
    x = bn_relu([x1_ref[...]], 0, 4)[0]                           # (4N, 256)

    # ---- stride-2 layers 1..3: ConvT(k4, s2, p1) + BN + ReLU ----
    stage = [(wm1_ref, p1_ref, x2_ref, 1, 8),
             (wm2_ref, p2_ref, x3_ref, 2, 16),
             (wm3_ref, p3_ref, x4_ref, 3, 32)]
    for wm_ref, p_ref, nxt_ref, bn_idx, wb_out in stage:
        r = x.shape[0]
        xb = x.astype(jnp.bfloat16)
        # +/-1 full-resolution row taps as tiny permutation matmuls.
        x_m1 = jnp.dot(p_ref[0], xb, preferred_element_type=f32).astype(jnp.bfloat16)
        x_p1 = jnp.dot(p_ref[1], xb, preferred_element_type=f32).astype(jnp.bfloat16)
        # Column taps + channel mix + column interleave folded into wm_ref[pr*2+a].
        y0 = (jnp.dot(xb,   wm_ref[0], preferred_element_type=f32)
              + jnp.dot(x_m1, wm_ref[1], preferred_element_type=f32))
        y1 = (jnp.dot(x_p1, wm_ref[2], preferred_element_type=f32)
              + jnp.dot(xb,   wm_ref[3], preferred_element_type=f32))
        y0, y1 = bn_relu([y0, y1], bn_idx, wb_out)
        nxt_ref[0:r, :] = y0                                      # row-parity 0 block
        nxt_ref[r:2 * r, :] = y1                                  # row-parity 1 block
        x = nxt_ref[...]

    # ---- layer 4: ConvT(8 -> 3, k4, s2, p1) + Tanh ----
    r = x.shape[0]
    xb = x.astype(jnp.bfloat16)
    x_m1 = jnp.dot(p4_ref[0], xb, preferred_element_type=f32).astype(jnp.bfloat16)
    x_p1 = jnp.dot(p4_ref[1], xb, preferred_element_type=f32).astype(jnp.bfloat16)
    y0 = (jnp.dot(xb,   wm4_ref[0], preferred_element_type=f32)
          + jnp.dot(x_m1, wm4_ref[1], preferred_element_type=f32))
    y1 = (jnp.dot(x_p1, wm4_ref[2], preferred_element_type=f32)
          + jnp.dot(xb,   wm4_ref[3], preferred_element_type=f32))
    out_ref[0:r, :] = jnp.tanh(y0)
    out_ref[r:2 * r, :] = jnp.tanh(y1)


# --------------------------- one-time weight packing ------------------------ #

def pack_params(params, n_batch):
    """Pre-pack every static tensor the kernel needs (done once at init)."""
    conv_w = [np.asarray(w, np.float32) for w in params["conv_w"]]
    gammas = [np.asarray(g, np.float32) for g in params["bn_gamma"]]
    betas = [np.asarray(b, np.float32) for b in params["bn_beta"]]

    # Layer 0: w0p[h][ci, co*4 + w] = w0[ci, co, h, w].
    w0p = np.transpose(conv_w[0], (2, 0, 1, 3)).reshape(4, NZ, LAYERS[0][1] * 4)

    # Stride-2 layers: banded (Cin*W, Cout*2W) matrices per (row parity pr, row tap a).
    #   out[co, 2q+pr, 2c+pc] = sum_{a,b,ci} x[ci, q+pr-a, c+pc-b] * w[ci,co,(1-pr)+2a,(1-pc)+2b]
    def pack_wmat(w, win):
        cin, cout = w.shape[0], w.shape[1]
        mats = []
        for pr in (0, 1):
            for a in (0, 1):
                kh = (1 - pr) + 2 * a
                m = np.zeros((cin, win, cout, 2 * win), np.float32)
                for pc in (0, 1):
                    for b in (0, 1):
                        kw = (1 - pc) + 2 * b
                        for c_out in range(win):
                            c_in = c_out + pc - b
                            if 0 <= c_in < win:
                                m[:, c_in, :, 2 * c_out + pc] += w[:, :, kh, kw]
                mats.append(m.reshape(cin * win, cout * 2 * win))
        return np.stack(mats, axis=0)                              # (4, Cin*W, Cout*2W)

    wmats = [pack_wmat(conv_w[l], WIDTHS[l - 1]) for l in range(1, 5)]

    # Row storage orders (parity-blocked, newest parity outermost) + permutation mats.
    order = [(s % n_batch, s // n_batch) for s in range(4 * n_batch)]   # (image n, row r)
    orders = [order]
    for _ in range(4):
        order = [(n, 2 * rr + u) for u in (0, 1) for (n, rr) in order]
        orders.append(order)

    def perm(order_l, d):
        rdim = len(order_l)
        idx = {nr: s for s, nr in enumerate(order_l)}
        p = np.zeros((rdim, rdim), np.float32)
        for s, (n, rr) in enumerate(order_l):
            key = (n, rr + d)
            if key in idx:
                p[s, idx[key]] = 1.0
        return p

    pmats = [np.stack([perm(orders[l], -1), perm(orders[l], +1)], axis=0)
             for l in range(4)]                                   # (2, R, R) per layer

    # BatchNorm helpers for layers 0..3 (all lane widths are Cout*W = 256).
    mavg, glane, blane = [], [], []
    for l in range(4):
        wb = 4 * (2 ** l)
        cout = LAYERS[l][1]
        lanes = cout * wb
        blk = np.zeros((lanes, lanes), np.float32)
        for c in range(cout):
            blk[c * wb:(c + 1) * wb, c * wb:(c + 1) * wb] = 1.0
        mavg.append(blk)
        glane.append(np.repeat(gammas[l], wb).reshape(1, lanes))
        blane.append(np.repeat(betas[l], wb).reshape(1, lanes))

    # Final row un-permutation: inv[n*64 + r] = kernel output storage row.
    inv = np.zeros(64 * n_batch, np.int32)
    for s, (n, rr) in enumerate(orders[4]):
        inv[n * 64 + rr] = s

    bf = jnp.bfloat16
    return {
        "w0p": jnp.asarray(w0p, bf),
        "wm": [jnp.asarray(w, bf) for w in wmats],
        "pm": [jnp.asarray(p, bf) for p in pmats],
        "mavg": jnp.asarray(np.stack(mavg, 0), jnp.float32),
        "gamma": jnp.asarray(np.stack(glane, 0), jnp.float32),
        "beta": jnp.asarray(np.stack(blane, 0), jnp.float32),
        "row_inv": jnp.asarray(inv),
    }


# -------------------------------- Generator -------------------------------- #

def init_params(key):
    params = {"conv_w": [], "bn_gamma": [], "bn_beta": []}
    for i, (cin, cout) in enumerate(LAYERS):
        key, kw, kg = jax.random.split(key, 3)
        params["conv_w"].append(
            0.02 * jax.random.normal(kw, (cin, cout, 4, 4), jnp.float32))
        if i < len(LAYERS) - 1:
            params["bn_gamma"].append(
                1.0 + 0.02 * jax.random.normal(kg, (cout,), jnp.float32))
            params["bn_beta"].append(jnp.zeros((cout,), jnp.float32))
    return params


@jax.jit
def dcgan_generator(z_nchw, packed):
    n = z_nchw.shape[0]
    z = z_nchw.reshape(n, NZ).astype(jnp.float32)

    out2d = pl.pallas_call(
        _generator_kernel,
        out_shape=jax.ShapeDtypeStruct((64 * n, NC * 64), jnp.float32),
        in_specs=[pl.BlockSpec(memory_space=pltpu.MemorySpace.VMEM)] * 13,
        out_specs=pl.BlockSpec(memory_space=pltpu.MemorySpace.VMEM),
        scratch_shapes=[
            pltpu.VMEM((4 * n, 256), jnp.float32),    # layer-0 output  (rows,  64*4)
            pltpu.VMEM((8 * n, 256), jnp.float32),    # layer-1 output  (rows,  32*8)
            pltpu.VMEM((16 * n, 256), jnp.float32),   # layer-2 output  (rows, 16*16)
            pltpu.VMEM((32 * n, 256), jnp.float32),   # layer-3 output  (rows,  8*32)
        ],
        compiler_params=pltpu.CompilerParams(vmem_limit_bytes=32 * 1024 * 1024),
    )(z, packed["w0p"],
      packed["wm"][0], packed["wm"][1], packed["wm"][2], packed["wm"][3],
      packed["pm"][0], packed["pm"][1], packed["pm"][2], packed["pm"][3],
      packed["mavg"], packed["gamma"], packed["beta"])

    # Un-permute the parity-blocked rows and split the (channel, col) lanes.
    img = out2d[packed["row_inv"]]                       # rows -> (n, row) order
    img = img.reshape(n, 64, NC, 64).transpose(0, 2, 1, 3)
    return img                                           # (N, 3, 64, 64)


# ------------------------- Pure-JAX f32 reference --------------------------- #

def _reference_forward(z_nchw, params):
    def conv_t(x, w, stride, padding):
        pad = 4 - 1 - padding
        w_flip = w[:, :, ::-1, ::-1]                      # (Cin, Cout, k, k)
        return jax.lax.conv_general_dilated(
            x, jnp.transpose(w_flip, (1, 0, 2, 3)),       # OIHW
            window_strides=(1, 1), padding=[(pad, pad), (pad, pad)],
            lhs_dilation=(stride, stride),
            dimension_numbers=("NCHW", "OIHW", "NCHW"))

    def bn_relu(x, gamma, beta):
        mean = jnp.mean(x, axis=(0, 2, 3), keepdims=True)
        var = jnp.mean(jnp.square(x - mean), axis=(0, 2, 3), keepdims=True)
        y = (x - mean) * jax.lax.rsqrt(var + BN_EPS)
        y = y * gamma.reshape(1, -1, 1, 1) + beta.reshape(1, -1, 1, 1)
        return jnp.maximum(y, 0.0)

    x = z_nchw.astype(jnp.float32)
    strides = [1, 2, 2, 2, 2]
    pads = [0, 1, 1, 1, 1]
    for i in range(5):
        x = conv_t(x, params["conv_w"][i], strides[i], pads[i])
        if i < 4:
            x = bn_relu(x, params["bn_gamma"][i], params["bn_beta"][i])
        else:
            x = jnp.tanh(x)
    return x


if __name__ == "__main__":
    key = jax.random.PRNGKey(0)
    key, kz = jax.random.split(key)
    params = init_params(key)
    z = jax.random.normal(kz, (2, NZ, 1, 1), jnp.float32)   # (N, nz, 1, 1)

    packed = pack_params(params, n_batch=2)                  # one-time weight packing
    out = jax.block_until_ready(dcgan_generator(z, packed))

    assert out.shape == (2, NC, 64, 64), out.shape
    assert bool(jnp.all(jnp.isfinite(out)))
    assert bool(jnp.all(jnp.abs(out) <= 1.0 + 1e-5))

    ref = _reference_forward(z, params)
    err = float(jnp.max(jnp.abs(out - ref)))
    assert err < 0.1, f"max abs error vs f32 reference: {err}"

    print("KERNEL_OK")
</pallas_src>

<mosaic_0001>
module attributes {stable_mosaic.version = 11 : i64} {
  func.func @_generator_kernel(%arg0: memref<2x16xf32, #tpu.memory_space<vmem>>, %arg1: memref<4x16x256xbf16, #tpu.memory_space<vmem>>, %arg2: memref<4x256x256xbf16, #tpu.memory_space<vmem>>, %arg3: memref<4x256x256xbf16, #tpu.memory_space<vmem>>, %arg4: memref<4x256x256xbf16, #tpu.memory_space<vmem>>, %arg5: memref<4x256x192xbf16, #tpu.memory_space<vmem>>, %arg6: memref<2x8x8xbf16, #tpu.memory_space<vmem>>, %arg7: memref<2x16x16xbf16, #tpu.memory_space<vmem>>, %arg8: memref<2x32x32xbf16, #tpu.memory_space<vmem>>, %arg9: memref<2x64x64xbf16, #tpu.memory_space<vmem>>, %arg10: memref<4x256x256xf32, #tpu.memory_space<vmem>>, %arg11: memref<4x1x256xf32, #tpu.memory_space<vmem>>, %arg12: memref<4x1x256xf32, #tpu.memory_space<vmem>>, %arg13: memref<128x192xf32, #tpu.memory_space<vmem>>, %arg14: memref<8x256xf32, #tpu.memory_space<vmem>>, %arg15: memref<16x256xf32, #tpu.memory_space<vmem>>, %arg16: memref<32x256xf32, #tpu.memory_space<vmem>>, %arg17: memref<64x256xf32, #tpu.memory_space<vmem>>) attributes {dimension_semantics = [], scalar_prefetch = 0 : i64, scratch_operands = 4 : i64, tpu.core_type = #tpu.core_type<tc>} {
    %c0 = arith.constant 0 : index
    %c0_0 = arith.constant 0 : index
    %0 = vector.load %arg0[%c0, %c0_0] : memref<2x16xf32, #tpu.memory_space<vmem>>, vector<2x16xf32>
    %1 = arith.truncf %0 : vector<2x16xf32> to vector<2x16xbf16>
    %c0_1 = arith.constant 0 : index
    %c0_2 = arith.constant 0 : index
    %c0_3 = arith.constant 0 : index
    %2 = vector.load %arg1[%c0_1, %c0_2, %c0_3] : memref<4x16x256xbf16, #tpu.memory_space<vmem>>, vector<1x16x256xbf16>
    %3 = vector.shape_cast %2 : vector<1x16x256xbf16> to vector<16x256xbf16>
    %cst = arith.constant dense<0.000000e+00> : vector<2x256xf32>
    %4 = tpu.matmul %1, %3, %cst {dimension_numbers = #tpu.dot_dimension_numbers<[1], [0], [0], [1], [0, 0, 1, 1], [], []>} : vector<2x16xbf16>, vector<16x256xbf16>, vector<2x256xf32> -> vector<2x256xf32>
    %c0_4 = arith.constant 0 : index
    %c0_5 = arith.constant 0 : index
    %5 = vector.load %arg14[%c0_4, %c0_5] : memref<8x256xf32, #tpu.memory_space<vmem>>, vector<2x256xf32>
    tpu.vector_store %arg14[%c0_4, %c0_5], %4 {strides = array<i32>} : memref<8x256xf32, #tpu.memory_space<vmem>>, vector<2x256xf32>,
    %c1 = arith.constant 1 : index
    %c0_6 = arith.constant 0 : index
    %c0_7 = arith.constant 0 : index
    %6 = vector.load %arg1[%c1, %c0_6, %c0_7] : memref<4x16x256xbf16, #tpu.memory_space<vmem>>, vector<1x16x256xbf16>
    %7 = vector.shape_cast %6 : vector<1x16x256xbf16> to vector<16x256xbf16>
    %cst_8 = arith.constant dense<0.000000e+00> : vector<2x256xf32>
    %8 = tpu.matmul %1, %7, %cst_8 {dimension_numbers = #tpu.dot_dimension_numbers<[1], [0], [0], [1], [0, 0, 1, 1], [], []>} : vector<2x16xbf16>, vector<16x256xbf16>, vector<2x256xf32> -> vector<2x256xf32>
    %c2 = arith.constant 2 : index
    %c0_9 = arith.constant 0 : index
    %9 = vector.load %arg14[%c2, %c0_9] : memref<8x256xf32, #tpu.memory_space<vmem>>, vector<2x256xf32>
    tpu.vector_store %arg14[%c2, %c0_9], %8 {strides = array<i32>} : memref<8x256xf32, #tpu.memory_space<vmem>>, vector<2x256xf32>,
    %c2_10 = arith.constant 2 : index
    %c0_11 = arith.constant 0 : index
    %c0_12 = arith.constant 0 : index
    %10 = vector.load %arg1[%c2_10, %c0_11, %c0_12] : memref<4x16x256xbf16, #tpu.memory_space<vmem>>, vector<1x16x256xbf16>
    %11 = vector.shape_cast %10 : vector<1x16x256xbf16> to vector<16x256xbf16>
    %cst_13 = arith.constant dense<0.000000e+00> : vector<2x256xf32>
    %12 = tpu.matmul %1, %11, %cst_13 {dimension_numbers = #tpu.dot_dimension_numbers<[1], [0], [0], [1], [0, 0, 1, 1], [], []>} : vector<2x16xbf16>, vector<16x256xbf16>, vector<2x256xf32> -> vector<2x256xf32>
    %c4 = arith.constant 4 : index
    %c0_14 = arith.constant 0 : index
    %13 = vector.load %arg14[%c4, %c0_14] : memref<8x256xf32, #tpu.memory_space<vmem>>, vector<2x256xf32>
    tpu.vector_store %arg14[%c4, %c0_14], %12 {strides = array<i32>} : memref<8x256xf32, #tpu.memory_space<vmem>>, vector<2x256xf32>,
    %c3 = arith.constant 3 : index
    %c0_15 = arith.constant 0 : index
    %c0_16 = arith.constant 0 : index
    %14 = vector.load %arg1[%c3, %c0_15, %c0_16] : memref<4x16x256xbf16, #tpu.memory_space<vmem>>, vector<1x16x256xbf16>
    %15 = vector.shape_cast %14 : vector<1x16x256xbf16> to vector<16x256xbf16>
    %cst_17 = arith.constant dense<0.000000e+00> : vector<2x256xf32>
    %16 = tpu.matmul %1, %15, %cst_17 {dimension_numbers = #tpu.dot_dimension_numbers<[1], [0], [0], [1], [0, 0, 1, 1], [], []>} : vector<2x16xbf16>, vector<16x256xbf16>, vector<2x256xf32> -> vector<2x256xf32>
    %c6 = arith.constant 6 : index
    %c0_18 = arith.constant 0 : index
    %17 = vector.load %arg14[%c6, %c0_18] : memref<8x256xf32, #tpu.memory_space<vmem>>, vector<2x256xf32>
    tpu.vector_store %arg14[%c6, %c0_18], %16 {strides = array<i32>} : memref<8x256xf32, #tpu.memory_space<vmem>>, vector<2x256xf32>,
    %c0_19 = arith.constant 0 : index
    %c0_20 = arith.constant 0 : index
    %18 = vector.load %arg14[%c0_19, %c0_20] : memref<8x256xf32, #tpu.memory_space<vmem>>, vector<8x256xf32>
    %cst_21 = arith.constant dense<0.000000e+00> : vector<256xf32>
    %19 = vector.multi_reduction <add>, %18, %cst_21 [0] : vector<8x256xf32> to vector<256xf32>
    %20 = vector.shape_cast %19 : vector<256xf32> to vector<1x256xf32>
    %21 = arith.mulf %18, %18 : vector<8x256xf32>
    %cst_22 = arith.constant dense<0.000000e+00> : vector<256xf32>
    %22 = vector.multi_reduction <add>, %21, %cst_22 [0] : vector<8x256xf32> to vector<256xf32>
    %23 = vector.shape_cast %22 : vector<256xf32> to vector<1x256xf32>
    %c0_23 = arith.constant 0 : index
    %c0_24 = arith.constant 0 : index
    %c0_25 = arith.constant 0 : index
    %24 = vector.load %arg10[%c0_23, %c0_24, %c0_25] : memref<4x256x256xf32, #tpu.memory_space<vmem>>, vector<1x256x256xf32>
    %25 = vector.shape_cast %24 : vector<1x256x256xf32> to vector<256x256xf32>
    %cst_26 = arith.constant dense<0.000000e+00> : vector<1x256xf32>
    %26 = tpu.matmul %20, %25, %cst_26 {dimension_numbers = #tpu.dot_dimension_numbers<[1], [0], [0], [1], [0, 0, 1, 1], [], []>} : vector<1x256xf32>, vector<256x256xf32>, vector<1x256xf32> -> vector<1x256xf32>
    %cst_27 = arith.constant 3.200000e+01 : f32
    %27 = vector.broadcast %cst_27 : f32 to vector<1x256xf32>
    %28 = arith.divf %26, %27 : vector<1x256xf32>
    %cst_28 = arith.constant dense<0.000000e+00> : vector<1x256xf32>
    %29 = tpu.matmul %23, %25, %cst_28 {dimension_numbers = #tpu.dot_dimension_numbers<[1], [0], [0], [1], [0, 0, 1, 1], [], []>} : vector<1x256xf32>, vector<256x256xf32>, vector<1x256xf32> -> vector<1x256xf32>
    %cst_29 = arith.constant 3.200000e+01 : f32
    %30 = vector.broadcast %cst_29 : f32 to vector<1x256xf32>
    %31 = arith.divf %29, %30 : vector<1x256xf32>
    %32 = arith.mulf %28, %28 : vector<1x256xf32>
    %33 = arith.subf %31, %32 : vector<1x256xf32>
    %cst_30 = arith.constant 9.99999974E-6 : f32
    %34 = vector.broadcast %cst_30 : f32 to vector<1x256xf32>
    %35 = arith.addf %33, %34 : vector<1x256xf32>
    %36 = math.rsqrt %35 : vector<1x256xf32>
    %c0_31 = arith.constant 0 : index
    %c0_32 = arith.constant 0 : index
    %c0_33 = arith.constant 0 : index
    %37 = vector.load %arg11[%c0_31, %c0_32, %c0_33] : memref<4x1x256xf32, #tpu.memory_space<vmem>>, vector<1x1x256xf32>
    %38 = vector.shape_cast %37 : vector<1x1x256xf32> to vector<1x256xf32>
    %39 = arith.mulf %38, %36 : vector<1x256xf32>
    %c0_34 = arith.constant 0 : index
    %c0_35 = arith.constant 0 : index
    %c0_36 = arith.constant 0 : index
    %40 = vector.load %arg12[%c0_34, %c0_35, %c0_36] : memref<4x1x256xf32, #tpu.memory_space<vmem>>, vector<1x1x256xf32>
    %41 = vector.shape_cast %40 : vector<1x1x256xf32> to vector<1x256xf32>
    %42 = arith.mulf %28, %39 : vector<1x256xf32>
    %43 = arith.subf %41, %42 : vector<1x256xf32>
    %44 = vector.broadcast %39 : vector<1x256xf32> to vector<8x256xf32>
    %45 = arith.mulf %18, %44 : vector<8x256xf32>
    %46 = vector.broadcast %43 : vector<1x256xf32> to vector<8x256xf32>
    %47 = arith.addf %45, %46 : vector<8x256xf32>
    %cst_37 = arith.constant 0.000000e+00 : f32
    %48 = vector.broadcast %cst_37 : f32 to vector<8x256xf32>
    %49 = arith.maximumf %47, %48 : vector<8x256xf32>
    %50 = arith.truncf %49 : vector<8x256xf32> to vector<8x256xbf16>
    %c0_38 = arith.constant 0 : index
    %c0_39 = arith.constant 0 : index
    %c0_40 = arith.constant 0 : index
    %51 = vector.load %arg6[%c0_38, %c0_39, %c0_40] : memref<2x8x8xbf16, #tpu.memory_space<vmem>>, vector<1x8x8xbf16>
    %52 = vector.shape_cast %51 : vector<1x8x8xbf16> to vector<8x8xbf16>
    %cst_41 = arith.constant dense<0.000000e+00> : vector<8x256xf32>
    %53 = tpu.matmul %52, %50, %cst_41 {dimension_numbers = #tpu.dot_dimension_numbers<[1], [0], [0], [1], [0, 0, 1, 1], [], []>} : vector<8x8xbf16>, vector<8x256xbf16>, vector<8x256xf32> -> vector<8x256xf32>
    %54 = arith.truncf %53 : vector<8x256xf32> to vector<8x256xbf16>
    %c1_42 = arith.constant 1 : index
    %c0_43 = arith.constant 0 : index
    %c0_44 = arith.constant 0 : index
    %55 = vector.load %arg6[%c1_42, %c0_43, %c0_44] : memref<2x8x8xbf16, #tpu.memory_space<vmem>>, vector<1x8x8xbf16>
    %56 = vector.shape_cast %55 : vector<1x8x8xbf16> to vector<8x8xbf16>
    %cst_45 = arith.constant dense<0.000000e+00> : vector<8x256xf32>
    %57 = tpu.matmul %56, %50, %cst_45 {dimension_numbers = #tpu.dot_dimension_numbers<[1], [0], [0], [1], [0, 0, 1, 1], [], []>} : vector<8x8xbf16>, vector<8x256xbf16>, vector<8x256xf32> -> vector<8x256xf32>
    %58 = arith.truncf %57 : vector<8x256xf32> to vector<8x256xbf16>
    %c0_46 = arith.constant 0 : index
    %c0_47 = arith.constant 0 : index
    %c0_48 = arith.constant 0 : index
    %59 = vector.load %arg2[%c0_46, %c0_47, %c0_48] : memref<4x256x256xbf16, #tpu.memory_space<vmem>>, vector<1x256x256xbf16>
    %60 = vector.shape_cast %59 : vector<1x256x256xbf16> to vector<256x256xbf16>
    %cst_49 = arith.constant dense<0.000000e+00> : vector<8x256xf32>
    %61 = tpu.matmul %50, %60, %cst_49 {dimension_numbers = #tpu.dot_dimension_numbers<[1], [0], [0], [1], [0, 0, 1, 1], [], []>} : vector<8x256xbf16>, vector<256x256xbf16>, vector<8x256xf32> -> vector<8x256xf32>
    %c1_50 = arith.constant 1 : index
    %c0_51 = arith.constant 0 : index
    %c0_52 = arith.constant 0 : index
    %62 = vector.load %arg2[%c1_50, %c0_51, %c0_52] : memref<4x256x256xbf16, #tpu.memory_space<vmem>>, vector<1x256x256xbf16>
    %63 = vector.shape_cast %62 : vector<1x256x256xbf16> to vector<256x256xbf16>
    %cst_53 = arith.constant dense<0.000000e+00> : vector<8x256xf32>
    %64 = tpu.matmul %54, %63, %cst_53 {dimension_numbers = #tpu.dot_dimension_numbers<[1], [0], [0], [1], [0, 0, 1, 1], [], []>} : vector<8x256xbf16>, vector<256x256xbf16>, vector<8x256xf32> -> vector<8x256xf32>
    %65 = arith.addf %61, %64 : vector<8x256xf32>
    %c2_54 = arith.constant 2 : index
    %c0_55 = arith.constant 0 : index
    %c0_56 = arith.constant 0 : index
    %66 = vector.load %arg2[%c2_54, %c0_55, %c0_56] : memref<4x256x256xbf16, #tpu.memory_space<vmem>>, vector<1x256x256xbf16>
    %67 = vector.shape_cast %66 : vector<1x256x256xbf16> to vector<256x256xbf16>
    %cst_57 = arith.constant dense<0.000000e+00> : vector<8x256xf32>
    %68 = tpu.matmul %58, %67, %cst_57 {dimension_numbers = #tpu.dot_dimension_numbers<[1], [0], [0], [1], [0, 0, 1, 1], [], []>} : vector<8x256xbf16>, vector<256x256xbf16>, vector<8x256xf32> -> vector<8x256xf32>
    %c3_58 = arith.constant 3 : index
    %c0_59 = arith.constant 0 : index
    %c0_60 = arith.constant 0 : index
    %69 = vector.load %arg2[%c3_58, %c0_59, %c0_60] : memref<4x256x256xbf16, #tpu.memory_space<vmem>>, vector<1x256x256xbf16>
    %70 = vector.shape_cast %69 : vector<1x256x256xbf16> to vector<256x256xbf16>
    %cst_61 = arith.constant dense<0.000000e+00> : vector<8x256xf32>
    %71 = tpu.matmul %50, %70, %cst_61 {dimension_numbers = #tpu.dot_dimension_numbers<[1], [0], [0], [1], [0, 0, 1, 1], [], []>} : vector<8x256xbf16>, vector<256x256xbf16>, vector<8x256xf32> -> vector<8x256xf32>
    %72 = arith.addf %68, %71 : vector<8x256xf32>
    %cst_62 = arith.constant dense<0.000000e+00> : vector<256xf32>
    %73 = vector.multi_reduction <add>, %65, %cst_62 [0] : vector<8x256xf32> to vector<256xf32>
    %74 = vector.shape_cast %73 : vector<256xf32> to vector<1x256xf32>
    %75 = arith.mulf %65, %65 : vector<8x256xf32>
    %cst_63 = arith.constant dense<0.000000e+00> : vector<256xf32>
    %76 = vector.multi_reduction <add>, %75, %cst_63 [0] : vector<8x256xf32> to vector<256xf32>
    %77 = vector.shape_cast %76 : vector<256xf32> to vector<1x256xf32>
    %cst_64 = arith.constant dense<0.000000e+00> : vector<256xf32>
    %78 = vector.multi_reduction <add>, %72, %cst_64 [0] : vector<8x256xf32> to vector<256xf32>
    %79 = vector.shape_cast %78 : vector<256xf32> to vector<1x256xf32>
    %80 = arith.addf %74, %79 : vector<1x256xf32>
    %81 = arith.mulf %72, %72 : vector<8x256xf32>
    %cst_65 = arith.constant dense<0.000000e+00> : vector<256xf32>
    %82 = vector.multi_reduction <add>, %81, %cst_65 [0] : vector<8x256xf32> to vector<256xf32>
    %83 = vector.shape_cast %82 : vector<256xf32> to vector<1x256xf32>
    %84 = arith.addf %77, %83 : vector<1x256xf32>
    %c1_66 = arith.constant 1 : index
    %c0_67 = arith.constant 0 : index
    %c0_68 = arith.constant 0 : index
    %85 = vector.load %arg10[%c1_66, %c0_67, %c0_68] : memref<4x256x256xf32, #tpu.memory_space<vmem>>, vector<1x256x256xf32>
    %86 = vector.shape_cast %85 : vector<1x256x256xf32> to vector<256x256xf32>
    %cst_69 = arith.constant dense<0.000000e+00> : vector<1x256xf32>
    %87 = tpu.matmul %80, %86, %cst_69 {dimension_numbers = #tpu.dot_dimension_numbers<[1], [0], [0], [1], [0, 0, 1, 1], [], []>} : vector<1x256xf32>, vector<256x256xf32>, vector<1x256xf32> -> vector<1x256xf32>
    %cst_70 = arith.constant 1.280000e+02 : f32
    %88 = vector.broadcast %cst_70 : f32 to vector<1x256xf32>
    %89 = arith.divf %87, %88 : vector<1x256xf32>
    %cst_71 = arith.constant dense<0.000000e+00> : vector<1x256xf32>
    %90 = tpu.matmul %84, %86, %cst_71 {dimension_numbers = #tpu.dot_dimension_numbers<[1], [0], [0], [1], [0, 0, 1, 1], [], []>} : vector<1x256xf32>, vector<256x256xf32>, vector<1x256xf32> -> vector<1x256xf32>
    %cst_72 = arith.constant 1.280000e+02 : f32
    %91 = vector.broadcast %cst_72 : f32 to vector<1x256xf32>
    %92 = arith.divf %90, %91 : vector<1x256xf32>
    %93 = arith.mulf %89, %89 : vector<1x256xf32>
    %94 = arith.subf %92, %93 : vector<1x256xf32>
    %cst_73 = arith.constant 9.99999974E-6 : f32
    %95 = vector.broadcast %cst_73 : f32 to vector<1x256xf32>
    %96 = arith.addf %94, %95 : vector<1x256xf32>
    %97 = math.rsqrt %96 : vector<1x256xf32>
    %c1_74 = arith.constant 1 : index
    %c0_75 = arith.constant 0 : index
    %c0_76 = arith.constant 0 : index
    %98 = vector.load %arg11[%c1_74, %c0_75, %c0_76] : memref<4x1x256xf32, #tpu.memory_space<vmem>>, vector<1x1x256xf32>
    %99 = vector.shape_cast %98 : vector<1x1x256xf32> to vector<1x256xf32>
    %100 = arith.mulf %99, %97 : vector<1x256xf32>
    %c1_77 = arith.constant 1 : index
    %c0_78 = arith.constant 0 : index
    %c0_79 = arith.constant 0 : index
    %101 = vector.load %arg12[%c1_77, %c0_78, %c0_79] : memref<4x1x256xf32, #tpu.memory_space<vmem>>, vector<1x1x256xf32>
    %102 = vector.shape_cast %101 : vector<1x1x256xf32> to vector<1x256xf32>
    %103 = arith.mulf %89, %100 : vector<1x256xf32>
    %104 = arith.subf %102, %103 : vector<1x256xf32>
    %105 = vector.broadcast %100 : vector<1x256xf32> to vector<8x256xf32>
    %106 = arith.mulf %65, %105 : vector<8x256xf32>
    %107 = vector.broadcast %104 : vector<1x256xf32> to vector<8x256xf32>
    %108 = arith.addf %106, %107 : vector<8x256xf32>
    %cst_80 = arith.constant 0.000000e+00 : f32
    %109 = vector.broadcast %cst_80 : f32 to vector<8x256xf32>
    %110 = arith.maximumf %108, %109 : vector<8x256xf32>
    %111 = vector.broadcast %100 : vector<1x256xf32> to vector<8x256xf32>
    %112 = arith.mulf %72, %111 : vector<8x256xf32>
    %113 = vector.broadcast %104 : vector<1x256xf32> to vector<8x256xf32>
    %114 = arith.addf %112, %113 : vector<8x256xf32>
    %cst_81 = arith.constant 0.000000e+00 : f32
    %115 = vector.broadcast %cst_81 : f32 to vector<8x256xf32>
    %116 = arith.maximumf %114, %115 : vector<8x256xf32>
    %c0_82 = arith.constant 0 : index
    %c0_83 = arith.constant 0 : index
    %117 = vector.load %arg15[%c0_82, %c0_83] : memref<16x256xf32, #tpu.memory_space<vmem>>, vector<8x256xf32>
    tpu.vector_store %arg15[%c0_82, %c0_83], %110 {strides = array<i32>} : memref<16x256xf32, #tpu.memory_space<vmem>>, vector<8x256xf32>,
    %c8 = arith.constant 8 : index
    %c0_84 = arith.constant 0 : index
    %118 = vector.load %arg15[%c8, %c0_84] : memref<16x256xf32, #tpu.memory_space<vmem>>, vector<8x256xf32>
    tpu.vector_store %arg15[%c8, %c0_84], %116 {strides = array<i32>} : memref<16x256xf32, #tpu.memory_space<vmem>>, vector<8x256xf32>,
    %c0_85 = arith.constant 0 : index
    %c0_86 = arith.constant 0 : index
    %119 = vector.load %arg15[%c0_85, %c0_86] : memref<16x256xf32, #tpu.memory_space<vmem>>, vector<16x256xf32>
    %120 = arith.truncf %119 : vector<16x256xf32> to vector<16x256xbf16>
    %c0_87 = arith.constant 0 : index
    %c0_88 = arith.constant 0 : index
    %c0_89 = arith.constant 0 : index
    %121 = vector.load %arg7[%c0_87, %c0_88, %c0_89] : memref<2x16x16xbf16, #tpu.memory_space<vmem>>, vector<1x16x16xbf16>
    %122 = vector.shape_cast %121 : vector<1x16x16xbf16> to vector<16x16xbf16>
    %cst_90 = arith.constant dense<0.000000e+00> : vector<16x256xf32>
    %123 = tpu.matmul %122, %120, %cst_90 {dimension_numbers = #tpu.dot_dimension_numbers<[1], [0], [0], [1], [0, 0, 1, 1], [], []>} : vector<16x16xbf16>, vector<16x256xbf16>, vector<16x256xf32> -> vector<16x256xf32>
    %124 = arith.truncf %123 : vector<16x256xf32> to vector<16x256xbf16>
    %c1_91 = arith.constant 1 : index
    %c0_92 = arith.constant 0 : index
    %c0_93 = arith.constant 0 : index
    %125 = vector.load %arg7[%c1_91, %c0_92, %c0_93] : memref<2x16x16xbf16, #tpu.memory_space<vmem>>, vector<1x16x16xbf16>
    %126 = vector.shape_cast %125 : vector<1x16x16xbf16> to vector<16x16xbf16>
    %cst_94 = arith.constant dense<0.000000e+00> : vector<16x256xf32>
    %127 = tpu.matmul %126, %120, %cst_94 {dimension_numbers = #tpu.dot_dimension_numbers<[1], [0], [0], [1], [0, 0, 1, 1], [], []>} : vector<16x16xbf16>, vector<16x256xbf16>, vector<16x256xf32> -> vector<16x256xf32>
    %128 = arith.truncf %127 : vector<16x256xf32> to vector<16x256xbf16>
    %c0_95 = arith.constant 0 : index
    %c0_96 = arith.constant 0 : index
    %c0_97 = arith.constant 0 : index
    %129 = vector.load %arg3[%c0_95, %c0_96, %c0_97] : memref<4x256x256xbf16, #tpu.memory_space<vmem>>, vector<1x256x256xbf16>
    %130 = vector.shape_cast %129 : vector<1x256x256xbf16> to vector<256x256xbf16>
    %cst_98 = arith.constant dense<0.000000e+00> : vector<16x256xf32>
    %131 = tpu.matmul %120, %130, %cst_98 {dimension_numbers = #tpu.dot_dimension_numbers<[1], [0], [0], [1], [0, 0, 1, 1], [], []>} : vector<16x256xbf16>, vector<256x256xbf16>, vector<16x256xf32> -> vector<16x256xf32>
    %c1_99 = arith.constant 1 : index
    %c0_100 = arith.constant 0 : index
    %c0_101 = arith.constant 0 : index
    %132 = vector.load %arg3[%c1_99, %c0_100, %c0_101] : memref<4x256x256xbf16, #tpu.memory_space<vmem>>, vector<1x256x256xbf16>
    %133 = vector.shape_cast %132 : vector<1x256x256xbf16> to vector<256x256xbf16>
    %cst_102 = arith.constant dense<0.000000e+00> : vector<16x256xf32>
    %134 = tpu.matmul %124, %133, %cst_102 {dimension_numbers = #tpu.dot_dimension_numbers<[1], [0], [0], [1], [0, 0, 1, 1], [], []>} : vector<16x256xbf16>, vector<256x256xbf16>, vector<16x256xf32> -> vector<16x256xf32>
    %135 = arith.addf %131, %134 : vector<16x256xf32>
    %c2_103 = arith.constant 2 : index
    %c0_104 = arith.constant 0 : index
    %c0_105 = arith.constant 0 : index
    %136 = vector.load %arg3[%c2_103, %c0_104, %c0_105] : memref<4x256x256xbf16, #tpu.memory_space<vmem>>, vector<1x256x256xbf16>
    %137 = vector.shape_cast %136 : vector<1x256x256xbf16> to vector<256x256xbf16>
    %cst_106 = arith.constant dense<0.000000e+00> : vector<16x256xf32>
    %138 = tpu.matmul %128, %137, %cst_106 {dimension_numbers = #tpu.dot_dimension_numbers<[1], [0], [0], [1], [0, 0, 1, 1], [], []>} : vector<16x256xbf16>, vector<256x256xbf16>, vector<16x256xf32> -> vector<16x256xf32>
    %c3_107 = arith.constant 3 : index
    %c0_108 = arith.constant 0 : index
    %c0_109 = arith.constant 0 : index
    %139 = vector.load %arg3[%c3_107, %c0_108, %c0_109] : memref<4x256x256xbf16, #tpu.memory_space<vmem>>, vector<1x256x256xbf16>
    %140 = vector.shape_cast %139 : vector<1x256x256xbf16> to vector<256x256xbf16>
    %cst_110 = arith.constant dense<0.000000e+00> : vector<16x256xf32>
    %141 = tpu.matmul %120, %140, %cst_110 {dimension_numbers = #tpu.dot_dimension_numbers<[1], [0], [0], [1], [0, 0, 1, 1], [], []>} : vector<16x256xbf16>, vector<256x256xbf16>, vector<16x256xf32> -> vector<16x256xf32>
    %142 = arith.addf %138, %141 : vector<16x256xf32>
    %cst_111 = arith.constant dense<0.000000e+00> : vector<256xf32>
    %143 = vector.multi_reduction <add>, %135, %cst_111 [0] : vector<16x256xf32> to vector<256xf32>
    %144 = vector.shape_cast %143 : vector<256xf32> to vector<1x256xf32>
    %145 = arith.mulf %135, %135 : vector<16x256xf32>
    %cst_112 = arith.constant dense<0.000000e+00> : vector<256xf32>
    %146 = vector.multi_reduction <add>, %145, %cst_112 [0] : vector<16x256xf32> to vector<256xf32>
    %147 = vector.shape_cast %146 : vector<256xf32> to vector<1x256xf32>
    %cst_113 = arith.constant dense<0.000000e+00> : vector<256xf32>
    %148 = vector.multi_reduction <add>, %142, %cst_113 [0] : vector<16x256xf32> to vector<256xf32>
    %149 = vector.shape_cast %148 : vector<256xf32> to vector<1x256xf32>
    %150 = arith.addf %144, %149 : vector<1x256xf32>
    %151 = arith.mulf %142, %142 : vector<16x256xf32>
    %cst_114 = arith.constant dense<0.000000e+00> : vector<256xf32>
    %152 = vector.multi_reduction <add>, %151, %cst_114 [0] : vector<16x256xf32> to vector<256xf32>
    %153 = vector.shape_cast %152 : vector<256xf32> to vector<1x256xf32>
    %154 = arith.addf %147, %153 : vector<1x256xf32>
    %c2_115 = arith.constant 2 : index
    %c0_116 = arith.constant 0 : index
    %c0_117 = arith.constant 0 : index
    %155 = vector.load %arg10[%c2_115, %c0_116, %c0_117] : memref<4x256x256xf32, #tpu.memory_space<vmem>>, vector<1x256x256xf32>
    %156 = vector.shape_cast %155 : vector<1x256x256xf32> to vector<256x256xf32>
    %cst_118 = arith.constant dense<0.000000e+00> : vector<1x256xf32>
    %157 = tpu.matmul %150, %156, %cst_118 {dimension_numbers = #tpu.dot_dimension_numbers<[1], [0], [0], [1], [0, 0, 1, 1], [], []>} : vector<1x256xf32>, vector<256x256xf32>, vector<1x256xf32> -> vector<1x256xf32>
    %cst_119 = arith.constant 5.120000e+02 : f32
    %158 = vector.broadcast %cst_119 : f32 to vector<1x256xf32>
    %159 = arith.divf %157, %158 : vector<1x256xf32>
    %cst_120 = arith.constant dense<0.000000e+00> : vector<1x256xf32>
    %160 = tpu.matmul %154, %156, %cst_120 {dimension_numbers = #tpu.dot_dimension_numbers<[1], [0], [0], [1], [0, 0, 1, 1], [], []>} : vector<1x256xf32>, vector<256x256xf32>, vector<1x256xf32> -> vector<1x256xf32>
    %cst_121 = arith.constant 5.120000e+02 : f32
    %161 = vector.broadcast %cst_121 : f32 to vector<1x256xf32>
    %162 = arith.divf %160, %161 : vector<1x256xf32>
    %163 = arith.mulf %159, %159 : vector<1x256xf32>
    %164 = arith.subf %162, %163 : vector<1x256xf32>
    %cst_122 = arith.constant 9.99999974E-6 : f32
    %165 = vector.broadcast %cst_122 : f32 to vector<1x256xf32>
    %166 = arith.addf %164, %165 : vector<1x256xf32>
    %167 = math.rsqrt %166 : vector<1x256xf32>
    %c2_123 = arith.constant 2 : index
    %c0_124 = arith.constant 0 : index
    %c0_125 = arith.constant 0 : index
    %168 = vector.load %arg11[%c2_123, %c0_124, %c0_125] : memref<4x1x256xf32, #tpu.memory_space<vmem>>, vector<1x1x256xf32>
    %169 = vector.shape_cast %168 : vector<1x1x256xf32> to vector<1x256xf32>
    %170 = arith.mulf %169, %167 : vector<1x256xf32>
    %c2_126 = arith.constant 2 : index
    %c0_127 = arith.constant 0 : index
    %c0_128 = arith.constant 0 : index
    %171 = vector.load %arg12[%c2_126, %c0_127, %c0_128] : memref<4x1x256xf32, #tpu.memory_space<vmem>>, vector<1x1x256xf32>
    %172 = vector.shape_cast %171 : vector<1x1x256xf32> to vector<1x256xf32>
    %173 = arith.mulf %159, %170 : vector<1x256xf32>
    %174 = arith.subf %172, %173 : vector<1x256xf32>
    %175 = vector.broadcast %170 : vector<1x256xf32> to vector<16x256xf32>
    %176 = arith.mulf %135, %175 : vector<16x256xf32>
    %177 = vector.broadcast %174 : vector<1x256xf32> to vector<16x256xf32>
    %178 = arith.addf %176, %177 : vector<16x256xf32>
    %cst_129 = arith.constant 0.000000e+00 : f32
    %179 = vector.broadcast %cst_129 : f32 to vector<16x256xf32>
    %180 = arith.maximumf %178, %179 : vector<16x256xf32>
    %181 = vector.broadcast %170 : vector<1x256xf32> to vector<16x256xf32>
    %182 = arith.mulf %142, %181 : vector<16x256xf32>
    %183 = vector.broadcast %174 : vector<1x256xf32> to vector<16x256xf32>
    %184 = arith.addf %182, %183 : vector<16x256xf32>
    %cst_130 = arith.constant 0.000000e+00 : f32
    %185 = vector.broadcast %cst_130 : f32 to vector<16x256xf32>
    %186 = arith.maximumf %184, %185 : vector<16x256xf32>
    %c0_131 = arith.constant 0 : index
    %c0_132 = arith.constant 0 : index
    %187 = vector.load %arg16[%c0_131, %c0_132] : memref<32x256xf32, #tpu.memory_space<vmem>>, vector<16x256xf32>
    tpu.vector_store %arg16[%c0_131, %c0_132], %180 {strides = array<i32>} : memref<32x256xf32, #tpu.memory_space<vmem>>, vector<16x256xf32>,
    %c16 = arith.constant 16 : index
    %c0_133 = arith.constant 0 : index
    %188 = vector.load %arg16[%c16, %c0_133] : memref<32x256xf32, #tpu.memory_space<vmem>>, vector<16x256xf32>
    tpu.vector_store %arg16[%c16, %c0_133], %186 {strides = array<i32>} : memref<32x256xf32, #tpu.memory_space<vmem>>, vector<16x256xf32>,
    %c0_134 = arith.constant 0 : index
    %c0_135 = arith.constant 0 : index
    %189 = vector.load %arg16[%c0_134, %c0_135] : memref<32x256xf32, #tpu.memory_space<vmem>>, vector<32x256xf32>
    %190 = arith.truncf %189 : vector<32x256xf32> to vector<32x256xbf16>
    %c0_136 = arith.constant 0 : index
    %c0_137 = arith.constant 0 : index
    %c0_138 = arith.constant 0 : index
    %191 = vector.load %arg8[%c0_136, %c0_137, %c0_138] : memref<2x32x32xbf16, #tpu.memory_space<vmem>>, vector<1x32x32xbf16>
    %192 = vector.shape_cast %191 : vector<1x32x32xbf16> to vector<32x32xbf16>
    %cst_139 = arith.constant dense<0.000000e+00> : vector<32x256xf32>
    %193 = tpu.matmul %192, %190, %cst_139 {dimension_numbers = #tpu.dot_dimension_numbers<[1], [0], [0], [1], [0, 0, 1, 1], [], []>} : vector<32x32xbf16>, vector<32x256xbf16>, vector<32x256xf32> -> vector<32x256xf32>
    %194 = arith.truncf %193 : vector<32x256xf32> to vector<32x256xbf16>
    %c1_140 = arith.constant 1 : index
    %c0_141 = arith.constant 0 : index
    %c0_142 = arith.constant 0 : index
    %195 = vector.load %arg8[%c1_140, %c0_141, %c0_142] : memref<2x32x32xbf16, #tpu.memory_space<vmem>>, vector<1x32x32xbf16>
    %196 = vector.shape_cast %195 : vector<1x32x32xbf16> to vector<32x32xbf16>
    %cst_143 = arith.constant dense<0.000000e+00> : vector<32x256xf32>
    %197 = tpu.matmul %196, %190, %cst_143 {dimension_numbers = #tpu.dot_dimension_numbers<[1], [0], [0], [1], [0, 0, 1, 1], [], []>} : vector<32x32xbf16>, vector<32x256xbf16>, vector<32x256xf32> -> vector<32x256xf32>
    %198 = arith.truncf %197 : vector<32x256xf32> to vector<32x256xbf16>
    %c0_144 = arith.constant 0 : index
    %c0_145 = arith.constant 0 : index
    %c0_146 = arith.constant 0 : index
    %199 = vector.load %arg4[%c0_144, %c0_145, %c0_146] : memref<4x256x256xbf16, #tpu.memory_space<vmem>>, vector<1x256x256xbf16>
    %200 = vector.shape_cast %199 : vector<1x256x256xbf16> to vector<256x256xbf16>
    %cst_147 = arith.constant dense<0.000000e+00> : vector<32x256xf32>
    %201 = tpu.matmul %190, %200, %cst_147 {dimension_numbers = #tpu.dot_dimension_numbers<[1], [0], [0], [1], [0, 0, 1, 1], [], []>} : vector<32x256xbf16>, vector<256x256xbf16>, vector<32x256xf32> -> vector<32x256xf32>
    %c1_148 = arith.constant 1 : index
    %c0_149 = arith.constant 0 : index
    %c0_150 = arith.constant 0 : index
    %202 = vector.load %arg4[%c1_148, %c0_149, %c0_150] : memref<4x256x256xbf16, #tpu.memory_space<vmem>>, vector<1x256x256xbf16>
    %203 = vector.shape_cast %202 : vector<1x256x256xbf16> to vector<256x256xbf16>
    %cst_151 = arith.constant dense<0.000000e+00> : vector<32x256xf32>
    %204 = tpu.matmul %194, %203, %cst_151 {dimension_numbers = #tpu.dot_dimension_numbers<[1], [0], [0], [1], [0, 0, 1, 1], [], []>} : vector<32x256xbf16>, vector<256x256xbf16>, vector<32x256xf32> -> vector<32x256xf32>
    %205 = arith.addf %201, %204 : vector<32x256xf32>
    %c2_152 = arith.constant 2 : index
    %c0_153 = arith.constant 0 : index
    %c0_154 = arith.constant 0 : index
    %206 = vector.load %arg4[%c2_152, %c0_153, %c0_154] : memref<4x256x256xbf16, #tpu.memory_space<vmem>>, vector<1x256x256xbf16>
    %207 = vector.shape_cast %206 : vector<1x256x256xbf16> to vector<256x256xbf16>
    %cst_155 = arith.constant dense<0.000000e+00> : vector<32x256xf32>
    %208 = tpu.matmul %198, %207, %cst_155 {dimension_numbers = #tpu.dot_dimension_numbers<[1], [0], [0], [1], [0, 0, 1, 1], [], []>} : vector<32x256xbf16>, vector<256x256xbf16>, vector<32x256xf32> -> vector<32x256xf32>
    %c3_156 = arith.constant 3 : index
    %c0_157 = arith.constant 0 : index
    %c0_158 = arith.constant 0 : index
    %209 = vector.load %arg4[%c3_156, %c0_157, %c0_158] : memref<4x256x256xbf16, #tpu.memory_space<vmem>>, vector<1x256x256xbf16>
    %210 = vector.shape_cast %209 : vector<1x256x256xbf16> to vector<256x256xbf16>
    %cst_159 = arith.constant dense<0.000000e+00> : vector<32x256xf32>
    %211 = tpu.matmul %190, %210, %cst_159 {dimension_numbers = #tpu.dot_dimension_numbers<[1], [0], [0], [1], [0, 0, 1, 1], [], []>} : vector<32x256xbf16>, vector<256x256xbf16>, vector<32x256xf32> -> vector<32x256xf32>
    %212 = arith.addf %208, %211 : vector<32x256xf32>
    %cst_160 = arith.constant dense<0.000000e+00> : vector<256xf32>
    %213 = vector.multi_reduction <add>, %205, %cst_160 [0] : vector<32x256xf32> to vector<256xf32>
    %214 = vector.shape_cast %213 : vector<256xf32> to vector<1x256xf32>
    %215 = arith.mulf %205, %205 : vector<32x256xf32>
    %cst_161 = arith.constant dense<0.000000e+00> : vector<256xf32>
    %216 = vector.multi_reduction <add>, %215, %cst_161 [0] : vector<32x256xf32> to vector<256xf32>
    %217 = vector.shape_cast %216 : vector<256xf32> to vector<1x256xf32>
    %cst_162 = arith.constant dense<0.000000e+00> : vector<256xf32>
    %218 = vector.multi_reduction <add>, %212, %cst_162 [0] : vector<32x256xf32> to vector<256xf32>
    %219 = vector.shape_cast %218 : vector<256xf32> to vector<1x256xf32>
    %220 = arith.addf %214, %219 : vector<1x256xf32>
    %221 = arith.mulf %212, %212 : vector<32x256xf32>
    %cst_163 = arith.constant dense<0.000000e+00> : vector<256xf32>
    %222 = vector.multi_reduction <add>, %221, %cst_163 [0] : vector<32x256xf32> to vector<256xf32>
    %223 = vector.shape_cast %222 : vector<256xf32> to vector<1x256xf32>
    %224 = arith.addf %217, %223 : vector<1x256xf32>
    %c3_164 = arith.constant 3 : index
    %c0_165 = arith.constant 0 : index
    %c0_166 = arith.constant 0 : index
    %225 = vector.load %arg10[%c3_164, %c0_165, %c0_166] : memref<4x256x256xf32, #tpu.memory_space<vmem>>, vector<1x256x256xf32>
    %226 = vector.shape_cast %225 : vector<1x256x256xf32> to vector<256x256xf32>
    %cst_167 = arith.constant dense<0.000000e+00> : vector<1x256xf32>
    %227 = tpu.matmul %220, %226, %cst_167 {dimension_numbers = #tpu.dot_dimension_numbers<[1], [0], [0], [1], [0, 0, 1, 1], [], []>} : vector<1x256xf32>, vector<256x256xf32>, vector<1x256xf32> -> vector<1x256xf32>
    %cst_168 = arith.constant 2.048000e+03 : f32
    %228 = vector.broadcast %cst_168 : f32 to vector<1x256xf32>
    %229 = arith.divf %227, %228 : vector<1x256xf32>
    %cst_169 = arith.constant dense<0.000000e+00> : vector<1x256xf32>
    %230 = tpu.matmul %224, %226, %cst_169 {dimension_numbers = #tpu.dot_dimension_numbers<[1], [0], [0], [1], [0, 0, 1, 1], [], []>} : vector<1x256xf32>, vector<256x256xf32>, vector<1x256xf32> -> vector<1x256xf32>
    %cst_170 = arith.constant 2.048000e+03 : f32
    %231 = vector.broadcast %cst_170 : f32 to vector<1x256xf32>
    %232 = arith.divf %230, %231 : vector<1x256xf32>
    %233 = arith.mulf %229, %229 : vector<1x256xf32>
    %234 = arith.subf %232, %233 : vector<1x256xf32>
    %cst_171 = arith.constant 9.99999974E-6 : f32
    %235 = vector.broadcast %cst_171 : f32 to vector<1x256xf32>
    %236 = arith.addf %234, %235 : vector<1x256xf32>
    %237 = math.rsqrt %236 : vector<1x256xf32>
    %c3_172 = arith.constant 3 : index
    %c0_173 = arith.constant 0 : index
    %c0_174 = arith.constant 0 : index
    %238 = vector.load %arg11[%c3_172, %c0_173, %c0_174] : memref<4x1x256xf32, #tpu.memory_space<vmem>>, vector<1x1x256xf32>
    %239 = vector.shape_cast %238 : vector<1x1x256xf32> to vector<1x256xf32>
    %240 = arith.mulf %239, %237 : vector<1x256xf32>
    %c3_175 = arith.constant 3 : index
    %c0_176 = arith.constant 0 : index
    %c0_177 = arith.constant 0 : index
    %241 = vector.load %arg12[%c3_175, %c0_176, %c0_177] : memref<4x1x256xf32, #tpu.memory_space<vmem>>, vector<1x1x256xf32>
    %242 = vector.shape_cast %241 : vector<1x1x256xf32> to vector<1x256xf32>
    %243 = arith.mulf %229, %240 : vector<1x256xf32>
    %244 = arith.subf %242, %243 : vector<1x256xf32>
    %245 = vector.broadcast %240 : vector<1x256xf32> to vector<32x256xf32>
    %246 = arith.mulf %205, %245 : vector<32x256xf32>
    %247 = vector.broadcast %244 : vector<1x256xf32> to vector<32x256xf32>
    %248 = arith.addf %246, %247 : vector<32x256xf32>
    %cst_178 = arith.constant 0.000000e+00 : f32
    %249 = vector.broadcast %cst_178 : f32 to vector<32x256xf32>
    %250 = arith.maximumf %248, %249 : vector<32x256xf32>
    %251 = vector.broadcast %240 : vector<1x256xf32> to vector<32x256xf32>
    %252 = arith.mulf %212, %251 : vector<32x256xf32>
    %253 = vector.broadcast %244 : vector<1x256xf32> to vector<32x256xf32>
    %254 = arith.addf %252, %253 : vector<32x256xf32>
    %cst_179 = arith.constant 0.000000e+00 : f32
    %255 = vector.broadcast %cst_179 : f32 to vector<32x256xf32>
    %256 = arith.maximumf %254, %255 : vector<32x256xf32>
    %c0_180 = arith.constant 0 : index
    %c0_181 = arith.constant 0 : index
    %257 = vector.load %arg17[%c0_180, %c0_181] : memref<64x256xf32, #tpu.memory_space<vmem>>, vector<32x256xf32>
    tpu.vector_store %arg17[%c0_180, %c0_181], %250 {strides = array<i32>} : memref<64x256xf32, #tpu.memory_space<vmem>>, vector<32x256xf32>,
    %c32 = arith.constant 32 : index
    %c0_182 = arith.constant 0 : index
    %258 = vector.load %arg17[%c32, %c0_182] : memref<64x256xf32, #tpu.memory_space<vmem>>, vector<32x256xf32>
    tpu.vector_store %arg17[%c32, %c0_182], %256 {strides = array<i32>} : memref<64x256xf32, #tpu.memory_space<vmem>>, vector<32x256xf32>,
    %c0_183 = arith.constant 0 : index
    %c0_184 = arith.constant 0 : index
    %259 = vector.load %arg17[%c0_183, %c0_184] : memref<64x256xf32, #tpu.memory_space<vmem>>, vector<64x256xf32>
    %260 = arith.truncf %259 : vector<64x256xf32> to vector<64x256xbf16>
    %c0_185 = arith.constant 0 : index
    %c0_186 = arith.constant 0 : index
    %c0_187 = arith.constant 0 : index
    %261 = vector.load %arg9[%c0_185, %c0_186, %c0_187] : memref<2x64x64xbf16, #tpu.memory_space<vmem>>, vector<1x64x64xbf16>
    %262 = vector.shape_cast %261 : vector<1x64x64xbf16> to vector<64x64xbf16>
    %cst_188 = arith.constant dense<0.000000e+00> : vector<64x256xf32>
    %263 = tpu.matmul %262, %260, %cst_188 {dimension_numbers = #tpu.dot_dimension_numbers<[1], [0], [0], [1], [0, 0, 1, 1], [], []>} : vector<64x64xbf16>, vector<64x256xbf16>, vector<64x256xf32> -> vector<64x256xf32>
    %264 = arith.truncf %263 : vector<64x256xf32> to vector<64x256xbf16>
    %c1_189 = arith.constant 1 : index
    %c0_190 = arith.constant 0 : index
    %c0_191 = arith.constant 0 : index
    %265 = vector.load %arg9[%c1_189, %c0_190, %c0_191] : memref<2x64x64xbf16, #tpu.memory_space<vmem>>, vector<1x64x64xbf16>
    %266 = vector.shape_cast %265 : vector<1x64x64xbf16> to vector<64x64xbf16>
    %cst_192 = arith.constant dense<0.000000e+00> : vector<64x256xf32>
    %267 = tpu.matmul %266, %260, %cst_192 {dimension_numbers = #tpu.dot_dimension_numbers<[1], [0], [0], [1], [0, 0, 1, 1], [], []>} : vector<64x64xbf16>, vector<64x256xbf16>, vector<64x256xf32> -> vector<64x256xf32>
    %268 = arith.truncf %267 : vector<64x256xf32> to vector<64x256xbf16>
    %c0_193 = arith.constant 0 : index
    %c0_194 = arith.constant 0 : index
    %c0_195 = arith.constant 0 : index
    %269 = vector.load %arg5[%c0_193, %c0_194, %c0_195] : memref<4x256x192xbf16, #tpu.memory_space<vmem>>, vector<1x256x192xbf16>
    %270 = vector.shape_cast %269 : vector<1x256x192xbf16> to vector<256x192xbf16>
    %cst_196 = arith.constant dense<0.000000e+00> : vector<64x192xf32>
    %271 = tpu.matmul %260, %270, %cst_196 {dimension_numbers = #tpu.dot_dimension_numbers<[1], [0], [0], [1], [0, 0, 1, 1], [], []>} : vector<64x256xbf16>, vector<256x192xbf16>, vector<64x192xf32> -> vector<64x192xf32>
    %c1_197 = arith.constant 1 : index
    %c0_198 = arith.constant 0 : index
    %c0_199 = arith.constant 0 : index
    %272 = vector.load %arg5[%c1_197, %c0_198, %c0_199] : memref<4x256x192xbf16, #tpu.memory_space<vmem>>, vector<1x256x192xbf16>
    %273 = vector.shape_cast %272 : vector<1x256x192xbf16> to vector<256x192xbf16>
    %cst_200 = arith.constant dense<0.000000e+00> : vector<64x192xf32>
    %274 = tpu.matmul %264, %273, %cst_200 {dimension_numbers = #tpu.dot_dimension_numbers<[1], [0], [0], [1], [0, 0, 1, 1], [], []>} : vector<64x256xbf16>, vector<256x192xbf16>, vector<64x192xf32> -> vector<64x192xf32>
    %275 = arith.addf %271, %274 : vector<64x192xf32>
    %c2_201 = arith.constant 2 : index
    %c0_202 = arith.constant 0 : index
    %c0_203 = arith.constant 0 : index
    %276 = vector.load %arg5[%c2_201, %c0_202, %c0_203] : memref<4x256x192xbf16, #tpu.memory_space<vmem>>, vector<1x256x192xbf16>
    %277 = vector.shape_cast %276 : vector<1x256x192xbf16> to vector<256x192xbf16>
    %cst_204 = arith.constant dense<0.000000e+00> : vector<64x192xf32>
    %278 = tpu.matmul %268, %277, %cst_204 {dimension_numbers = #tpu.dot_dimension_numbers<[1], [0], [0], [1], [0, 0, 1, 1], [], []>} : vector<64x256xbf16>, vector<256x192xbf16>, vector<64x192xf32> -> vector<64x192xf32>
    %c3_205 = arith.constant 3 : index
    %c0_206 = arith.constant 0 : index
    %c0_207 = arith.constant 0 : index
    %279 = vector.load %arg5[%c3_205, %c0_206, %c0_207] : memref<4x256x192xbf16, #tpu.memory_space<vmem>>, vector<1x256x192xbf16>
    %280 = vector.shape_cast %279 : vector<1x256x192xbf16> to vector<256x192xbf16>
    %cst_208 = arith.constant dense<0.000000e+00> : vector<64x192xf32>
    %281 = tpu.matmul %260, %280, %cst_208 {dimension_numbers = #tpu.dot_dimension_numbers<[1], [0], [0], [1], [0, 0, 1, 1], [], []>} : vector<64x256xbf16>, vector<256x192xbf16>, vector<64x192xf32> -> vector<64x192xf32>
    %282 = arith.addf %278, %281 : vector<64x192xf32>
    %283 = math.tanh %275 : vector<64x192xf32>
    %c0_209 = arith.constant 0 : index
    %c0_210 = arith.constant 0 : index
    %284 = vector.load %arg13[%c0_209, %c0_210] : memref<128x192xf32, #tpu.memory_space<vmem>>, vector<64x192xf32>
    tpu.vector_store %arg13[%c0_209, %c0_210], %283 {strides = array<i32>} : memref<128x192xf32, #tpu.memory_space<vmem>>, vector<64x192xf32>,
    %285 = math.tanh %282 : vector<64x192xf32>
    %c64 = arith.constant 64 : index
    %c0_211 = arith.constant 0 : index
    %286 = vector.load %arg13[%c64, %c0_211] : memref<128x192xf32, #tpu.memory_space<vmem>>, vector<64x192xf32>
    tpu.vector_store %arg13[%c64, %c0_211], %285 {strides = array<i32>} : memref<128x192xf32, #tpu.memory_space<vmem>>, vector<64x192xf32>,
    return
  }
}

</mosaic_0001>

<bundles_post_ra>
// kernel: dcgan_generator.1
= control target key start
LH: loop header
LB: loop body
LE: loop exit
PB: predicated region body
PF: predicated region fallthrough
CT: control target
= control target key end

     0   :  { %18 = vsyncpa [#allocation7], 0  ;;  %s9640_s0 = inlined_call_operand.vmem [shape: f32[2,16], index: 0, kind: input, shape index: {}]   ;;  %s9641_s1 = inlined_call_operand.vmem [shape: bf16[4,16,256], index: 1, kind: input, shape index: {}]   ;;  %s9642_s2 = inlined_call_operand.vmem [shape: bf16[4,256,256], index: 2, kind: input, shape index: {}]   ;;  %s9643_s3 = inlined_call_operand.hbm [shape: bf16[4,256,256], index: 3, kind: input, shape index: {}]   ;;  %s9644_s4 = inlined_call_operand.hbm [shape: bf16[4,256,256], index: 4, kind: input, shape index: {}]   ;;  %s9645_s5 = inlined_call_operand.vmem [shape: bf16[4,256,192], index: 5, kind: input, shape index: {}]   ;;  %s9646_s6 = inlined_call_operand.vmem [shape: bf16[2,8,8], index: 6, kind: input, shape index: {}]   ;;  %s9647_s7 = inlined_call_operand.vmem [shape: bf16[2,16,16], index: 7, kind: input, shape index: {}]   ;;  %s9648_s8 = inlined_call_operand.vmem [shape: bf16[2,32,32], index: 8, kind: input, shape index: {}]   ;;  %s9649_s9 = inlined_call_operand.vmem [shape: bf16[2,64,64], index: 9, kind: input, shape index: {}]   ;;  %s9650_s10 = inlined_call_operand.hbm [shape: f32[4,256,256], index: 10, kind: input, shape index: {}]   ;;  %s9651_s11 = inlined_call_operand.vmem [shape: f32[4,1,256], index: 11, kind: input, shape index: {}]   ;;  %s9652_s12 = inlined_call_operand.vmem [shape: f32[4,1,256], index: 12, kind: input, shape index: {}]   ;;  %s9653_s13 = inlined_call_operand.vmem [shape: f32[128,192], index: 13, kind: output, shape index: {}]  }
   0x1   :  { %19 = vsyncpa [#allocation9], 0  ;;  %s8210_s25 = smov [#allocation8]   ;;  %s8211_s27 = smov [#allocation6]  }
   0x2   :  { %s43_s26 = sshll.u32 %s8210_s25, 4  ;;  %s31_s28 = sshll.u32 %s8211_s27, 4  ;;  %s44_s26 = int_to_ptr.vmem [resolvable:$true] %s43_s26  ;;  %s32_s28 = int_to_ptr.vmem [resolvable:$true] %s31_s28 }
   0x3   :  { %s8154_s29 = scalar_lea.vmem %s44_s26, 16384  ;;  %p8159_p1 = scmp.lt.s32.totalorder %s44_s26, %s44_s26 }
   0x4   :  { %p8155_p0 = scmp.ne.s32.totalorder %s44_s26, %s8154_s29  ;;  %p8160_p2 = scmp.lt.s32.totalorder %s8154_s29, %s8154_s29 }
   0x6   :  { %p8161_p3 = por %p8160_p2, %p8159_p1 }
   0x8   :  { %p8162_p4 = pnand %p8161_p3, %p8155_p0 }
   0xa   :  { %8165 = shalt.err (!%p8162_p4)
}
   0xb   :  { %s8212_s30 = smov 128   ;;  %s8213_s14 = smov 8  }
   0xc   :  { %49 = dma.hbm_to_vmem [thread:$0]  %s9644_s4, 16384, %s44_s26, [#allocation9], %s8212_s30, %s8212_s30, %s8213_s14  }
   0xd   :  { %s8174_s17 = scalar_lea.vmem %s32_s28, 16384  ;;  %p8179_p6 = scmp.lt.s32.totalorder %s32_s28, %s32_s28 }
   0xe   :  { %p8175_p5 = scmp.ne.s32.totalorder %s32_s28, %s8174_s17  ;;  %p8180_p7 = scmp.lt.s32.totalorder %s8174_s17, %s8174_s17 }
  0x10   :  { %p8181_p8 = por %p8180_p7, %p8179_p6 }
  0x12   :  { %p8182_p9 = pnand %p8181_p8, %p8175_p5 }
  0x14   :  { %8185 = shalt.err (!%p8182_p9)
}
  0x15   :  { %37 = dma.hbm_to_vmem [thread:$0]  %s9643_s3, 16384, %s32_s28, [#allocation7], %s8212_s30, %s8212_s30, %s8213_s14  }
  0x16   :  { %s8214_s20 = smov [#allocation10]  }
  0x17   :  { %s65_s21 = sshll.u32 %s8214_s20, 4  ;;  %s66_s21 = int_to_ptr.vmem [resolvable:$true] %s65_s21 }
  0x18   :  { %s8194_s22 = scalar_lea.vmem %s66_s21, 32768  ;;  %p8199_p11 = scmp.lt.s32.totalorder %s66_s21, %s66_s21 }
  0x19   :  { %p8195_p10 = scmp.ne.s32.totalorder %s66_s21, %s8194_s22  ;;  %p8200_p12 = scmp.lt.s32.totalorder %s8194_s22, %s8194_s22 }
  0x1b   :  { %p8201_p13 = por %p8200_p12, %p8199_p11 }
  0x1d   :  { %p8202_p0 = pnand %p8201_p13, %p8195_p10 }
  0x1f   :  { %8205 = shalt.err (!%p8202_p0)
}
  0x20   :  { %s8215_s4 = smov 256   ;;  %s8216_s23 = smov 16  }
  0x21   :  { %71 = dma.hbm_to_vmem [thread:$0]  %s9650_s10, 32768, %s66_s21, [#allocation9], %s8215_s4, %s8215_s4, %s8216_s23  }
  0x22   :  { %8206 = dma.done.wait [#allocation7], 16384  }
  0x23   :  { %8207 = vsyncadd [#allocation7], 4294950912 }
  0x24   :  { %8208 = dma.done.wait [#allocation9], 49152  }
  0x25   :  { %8209 = vsyncadd [#allocation9], 4294918144  ;;  %v8217_v0 = vmov 0   ;;  %v7272_v1 = vld [vmem:[%s9641_s1 + $0x4] ss:$8 sps:$4 sm:$0xff]   ;;  %vm100_vm0 = vcmask 130048  }
  0x26   :  { %136 = vmatprep.mubr.bf16.mxu0 %v8217_v0  ;;  %192 = vmatprep.mubr.bf16.mxu1 %v8217_v0  ;;  %v7274_v2 = vld [vmem:[%s9641_s1 + $0x14] ss:$8 sps:$4 sm:$0xff]   ;;  %v7276_v3 = vld [vmem:[%s9641_s1] ss:$8 sps:$4 sm:$0xff]   ;;  %v7277_v4 = vld [vmem:[%s9641_s1 + $0x10] ss:$8 sps:$4 sm:$0xff]  }
  0x27   :  { %118 = vmatprep.subr.bf16.mxu0 %v7272_v1  ;;  %v86_v5 = vld [vmem:[%s9640_s0] sm:$0x3]  ;;  %174 = vmatprep.subr.bf16.mxu1 %v7274_v2  ;;  %v7280_v8 = vld [vmem:[%s9641_s1 + $0x24] ss:$8 sps:$4 sm:$0xff]   ;;  %v7281_v9 = vld [vmem:[%s9641_s1 + $0x30] ss:$8 sps:$4 sm:$0xff]  }
  0x28   :  { %v87_v6 = vpack.c.bf16 %v86_v5, %v86_v5  ;;  %v7278_v7 = vld [vmem:[%s9641_s1 + $0x20] ss:$8 sps:$4 sm:$0xff]   ;;  %119 = vmatpush1.bf16.msra.mxu0 %v7276_v3  ;;  %175 = vmatpush1.bf16.msra.mxu1 %v7277_v4  ;;  %v7283_v10 = vld [vmem:[%s9641_s1 + $0x34] ss:$8 sps:$4 sm:$0xff]   ;;  %vm657_vm1 = vcmask 1043456   ;;  %vm653_vm2 = vcmask 64512  }
  0x29   :  { %236 = vmatprep.subr.bf16.mxu0 %v7280_v8  ;;  %v392_v11 = vld [vmem:[#allocation10 + $0xf8] sm:$0xff]  ;;  %298 = vmatprep.subr.bf16.mxu1 %v7283_v10  ;;  %v391_v12 = vld [vmem:[#allocation10 + $0xf0] sm:$0xff]  ;;  %v390_v13 = vld [vmem:[#allocation10 + $0xe8] sm:$0xff]  ;;  %vm3520_vm3 = vcmask 261120   ;;  %vm5139_vm4 = vcmask 523264  }
  0x2a   :  { %v389_v14 = vld [vmem:[#allocation10 + $0xe0] sm:$0xff]  ;;  %v388_v15 = vld [vmem:[#allocation10 + $0xd8] sm:$0xff]  ;;  %v387_v16 = vld [vmem:[#allocation10 + $0xd0] sm:$0xff] }
  0x2b   :  { %6490 = vmatmul.mubr.msk.bf16.vlgmr.msra.gmra.mxu0 %vm100_vm0, %v87_v6  ;;  %6495 = vmatmul.mubr.msk.bf16.vlgmr.msra.gmra.mxu1 %vm100_vm0, %v87_v6  ;;  %v386_v17 = vld [vmem:[#allocation10 + $0xc8] sm:$0xff]  ;;  %v385_v18 = vld [vmem:[#allocation10 + $0xc0] sm:$0xff]  ;;  %v384_v19 = vld [vmem:[#allocation10 + $0xb8] sm:$0xff] }
  0x2c   :  { %237 = vmatpush1.bf16.msra.mxu0 %v7278_v7  ;;  %299 = vmatpush1.bf16.msra.mxu1 %v7281_v9  ;;  %v383_v20 = vld [vmem:[#allocation10 + $0xb0] sm:$0xff]  ;;  %v382_v21 = vld [vmem:[#allocation10 + $0xa8] sm:$0xff]  ;;  %v381_v22 = vld [vmem:[#allocation10 + $0xa0] sm:$0xff] }
  0x2d   :  { %254 = vmatprep.mubr.bf16.mxu0 %v8217_v0  ;;  %316 = vmatprep.mubr.bf16.mxu1 %v8217_v0  ;;  %v380_v23 = vld [vmem:[#allocation10 + $0x98] sm:$0xff]  ;;  %v379_v24 = vld [vmem:[#allocation10 + $0x90] sm:$0xff]  ;;  %v378_v25 = vld [vmem:[#allocation10 + $0x88] sm:$0xff] }
  0x2e   :  { %425 = vmatprep.subr.mxu0 %v392_v11  ;;  %499 = vmatprep.subr.mxu1 %v392_v11  ;;  %v377_v26 = vld [vmem:[#allocation10 + $0x80] sm:$0xff]  ;;  %v376_v27 = vld [vmem:[#allocation10 + $0x78] sm:$0xff]  ;;  %v375_v28 = vld [vmem:[#allocation10 + $0x70] sm:$0xff] }
  0x2f   :  { %v374_v29 = vld [vmem:[#allocation10 + $0x68] sm:$0xff]  ;;  %v373_v30 = vld [vmem:[#allocation10 + $0x60] sm:$0xff]  ;;  %v372_v31 = vld [vmem:[#allocation10 + $0x58] sm:$0xff] }
  0x30   :  { %v371_v32 = vld [vmem:[#allocation10 + $0x50] sm:$0xff]  ;;  %v370_v33 = vld [vmem:[#allocation10 + $0x48] sm:$0xff]  ;;  %v369_v34 = vld [vmem:[#allocation10 + $0x40] sm:$0xff] }
  0x31   :  { %v368_v35 = vld [vmem:[#allocation10 + $0x38] sm:$0xff]  ;;  %v367_v36 = vld [vmem:[#allocation10 + $0x30] sm:$0xff]  ;;  %v366_v37 = vld [vmem:[#allocation10 + $0x28] sm:$0xff] }
  0x32   :  { %v365_v38 = vld [vmem:[#allocation10 + $0x20] sm:$0xff]  ;;  %v364_v39 = vld [vmem:[#allocation10 + $0x18] sm:$0xff]  ;;  %v363_v40 = vld [vmem:[#allocation10 + $0x10] sm:$0xff] }
  0x33   :  { %6500 = vmatmul.mubr.msk.bf16.vlgmr.msra.gmra.mxu0 %vm100_vm0, %v87_v6  ;;  %6505 = vmatmul.mubr.msk.bf16.vlgmr.msra.gmra.mxu1 %vm100_vm0, %v87_v6  ;;  %v362_v41 = vld [vmem:[#allocation10 + $0x8] sm:$0xff]  ;;  %v361_v42 = vld [vmem:[#allocation10] sm:$0xff]  ;;  %v424_v43 = vld [vmem:[#allocation10 + $0x1f8] sm:$0xff] }
  0x34   :  { %426 = vmatpush1.msra.mxu0 %v391_v12  ;;  %500 = vmatpush1.msra.mxu1 %v391_v12  ;;  %v423_v44 = vld [vmem:[#allocation10 + $0x1f0] sm:$0xff]  ;;  %v422_v45 = vld [vmem:[#allocation10 + $0x1e8] sm:$0xff]  ;;  %v421_v46 = vld [vmem:[#allocation10 + $0x1e0] sm:$0xff] }
  0x35   :  { %427 = vmatprep.subr.mxu0 %v390_v13  ;;  %501 = vmatprep.subr.mxu1 %v390_v13  ;;  %v420_v47 = vld [vmem:[#allocation10 + $0x1d8] sm:$0xff]  ;;  %v419_v48 = vld [vmem:[#allocation10 + $0x1d0] sm:$0xff]  ;;  %v418_v49 = vld [vmem:[#allocation10 + $0x1c8] sm:$0xff] }
  0x36   :  { %428 = vmatpush1.msra.mxu0 %v389_v14  ;;  %502 = vmatpush1.msra.mxu1 %v389_v14  ;;  %v417_v50 = vld [vmem:[#allocation10 + $0x1c0] sm:$0xff]  ;;  %v416_v51 = vld [vmem:[#allocation10 + $0x1b8] sm:$0xff]  ;;  %v415_v52 = vld [vmem:[#allocation10 + $0x1b0] sm:$0xff] }
  0x37   :  { %429 = vmatprep.subr.mxu0 %v388_v15  ;;  %503 = vmatprep.subr.mxu1 %v388_v15  ;;  %v414_v53 = vld [vmem:[#allocation10 + $0x1a8] sm:$0xff]  ;;  %v413_v54 = vld [vmem:[#allocation10 + $0x1a0] sm:$0xff]  ;;  %v412_v55 = vld [vmem:[#allocation10 + $0x198] sm:$0xff] }
  0x38   :  { %430 = vmatpush1.msra.mxu0 %v387_v16  ;;  %504 = vmatpush1.msra.mxu1 %v387_v16  ;;  %v411_v56 = vld [vmem:[#allocation10 + $0x190] sm:$0xff]  ;;  %v410_v57 = vld [vmem:[#allocation10 + $0x188] sm:$0xff]  ;;  %v409_v58 = vld [vmem:[#allocation10 + $0x180] sm:$0xff] }
  0x39   :  { %431 = vmatprep.subr.mxu0 %v386_v17  ;;  %505 = vmatprep.subr.mxu1 %v386_v17  ;;  %v408_v59 = vld [vmem:[#allocation10 + $0x178] sm:$0xff]  ;;  %v407_v60 = vld [vmem:[#allocation10 + $0x170] sm:$0xff]  ;;  %v406_v61 = vld [vmem:[#allocation10 + $0x168] sm:$0xff] }
  0x3a   :  { %432 = vmatpush1.msra.mxu0 %v385_v18  ;;  %506 = vmatpush1.msra.mxu1 %v385_v18  ;;  %v405_v62 = vld [vmem:[#allocation10 + $0x160] sm:$0xff]  ;;  %v404_v63 = vld [vmem:[#allocation10 + $0x158] sm:$0xff]  ;;  %v403_v1 = vld [vmem:[#allocation10 + $0x150] sm:$0xff] }
  0x3b   :  { %433 = vmatprep.subr.mxu0 %v384_v19  ;;  %507 = vmatprep.subr.mxu1 %v384_v19  ;;  %v402_v2 = vld [vmem:[#allocation10 + $0x148] sm:$0xff]  ;;  %v401_v3 = vld [vmem:[#allocation10 + $0x140] sm:$0xff]  ;;  %v400_v4 = vld [vmem:[#allocation10 + $0x138] sm:$0xff] }
  0x3c   :  { %434 = vmatpush1.msra.mxu0 %v383_v20  ;;  %508 = vmatpush1.msra.mxu1 %v383_v20  ;;  %v399_v5 = vld [vmem:[#allocation10 + $0x130] sm:$0xff]  ;;  %v398_v6 = vld [vmem:[#allocation10 + $0x128] sm:$0xff]  ;;  %v397_v7 = vld [vmem:[#allocation10 + $0x120] sm:$0xff] }
  0x3d   :  { %435 = vmatprep.subr.mxu0 %v382_v21  ;;  %509 = vmatprep.subr.mxu1 %v382_v21  ;;  %v396_v8 = vld [vmem:[#allocation10 + $0x118] sm:$0xff]  ;;  %v395_v9 = vld [vmem:[#allocation10 + $0x110] sm:$0xff]  ;;  %v394_v10 = vld [vmem:[#allocation10 + $0x108] sm:$0xff] }
  0x3e   :  { %436 = vmatpush1.msra.mxu0 %v381_v22  ;;  %510 = vmatpush1.msra.mxu1 %v381_v22  ;;  %v393_v11 = vld [vmem:[#allocation10 + $0x100] sm:$0xff] }
  0x3f   :  { %437 = vmatprep.subr.mxu0 %v380_v23  ;;  %511 = vmatprep.subr.mxu1 %v380_v23 }
  0x40   :  { %438 = vmatpush1.msra.mxu0 %v379_v24  ;;  %512 = vmatpush1.msra.mxu1 %v379_v24 }
  0x41   :  { %439 = vmatprep.subr.mxu0 %v378_v25  ;;  %513 = vmatprep.subr.mxu1 %v378_v25 }
  0x42   :  { %440 = vmatpush1.msra.mxu0 %v377_v26  ;;  %514 = vmatpush1.msra.mxu1 %v377_v26 }
  0x43   :  { %441 = vmatprep.subr.mxu0 %v376_v27  ;;  %515 = vmatprep.subr.mxu1 %v376_v27 }
  0x44   :  { %442 = vmatpush1.msra.mxu0 %v375_v28  ;;  %516 = vmatpush1.msra.mxu1 %v375_v28 }
  0x45   :  { %443 = vmatprep.subr.mxu0 %v374_v29  ;;  %517 = vmatprep.subr.mxu1 %v374_v29 }
  0x46   :  { %444 = vmatpush1.msra.mxu0 %v373_v30  ;;  %518 = vmatpush1.msra.mxu1 %v373_v30 }
  0x47   :  { %445 = vmatprep.subr.mxu0 %v372_v31  ;;  %519 = vmatprep.subr.mxu1 %v372_v31 }
  0x48   :  { %446 = vmatpush1.msra.mxu0 %v371_v32  ;;  %520 = vmatpush1.msra.mxu1 %v371_v32 }
  0x49   :  { %447 = vmatprep.subr.mxu0 %v370_v33  ;;  %521 = vmatprep.subr.mxu1 %v370_v33 }
  0x4a   :  { %448 = vmatpush1.msra.mxu0 %v369_v34  ;;  %522 = vmatpush1.msra.mxu1 %v369_v34 }
  0x4b   :  { %449 = vmatprep.subr.mxu0 %v368_v35  ;;  %523 = vmatprep.subr.mxu1 %v368_v35 }
  0x4c   :  { %450 = vmatpush1.msra.mxu0 %v367_v36  ;;  %524 = vmatpush1.msra.mxu1 %v367_v36 }
  0x4d   :  { %451 = vmatprep.subr.mxu0 %v366_v37  ;;  %525 = vmatprep.subr.mxu1 %v366_v37 }
  0x4e   :  { %452 = vmatpush1.msra.mxu0 %v365_v38  ;;  %526 = vmatpush1.msra.mxu1 %v365_v38 }
  0x4f   :  { %453 = vmatprep.subr.mxu0 %v364_v39  ;;  %527 = vmatprep.subr.mxu1 %v364_v39 }
  0x50   :  { %454 = vmatpush1.msra.mxu0 %v363_v40  ;;  %528 = vmatpush1.msra.mxu1 %v363_v40 }
  0x51   :  { %455 = vmatprep.subr.mxu0 %v362_v41  ;;  %529 = vmatprep.subr.mxu1 %v362_v41 }
  0x52   :  { %456 = vmatpush1.msra.mxu0 %v361_v42  ;;  %530 = vmatpush1.msra.mxu1 %v361_v42 }
  0x53   :  { %457 = vmatprep.subr.mxu0 %v424_v43  ;;  %531 = vmatprep.subr.mxu1 %v424_v43 }
  0x54   :  { %458 = vmatpush2.msra.mxu0 %v423_v44  ;;  %532 = vmatpush2.msra.mxu1 %v423_v44 }
  0x55   :  { %459 = vmatprep.subr.mxu0 %v422_v45  ;;  %533 = vmatprep.subr.mxu1 %v422_v45 }
  0x56   :  { %460 = vmatpush2.msra.mxu0 %v421_v46  ;;  %534 = vmatpush2.msra.mxu1 %v421_v46 }
  0x57   :  { %461 = vmatprep.subr.mxu0 %v420_v47  ;;  %535 = vmatprep.subr.mxu1 %v420_v47 }
  0x58   :  { %462 = vmatpush2.msra.mxu0 %v419_v48  ;;  %536 = vmatpush2.msra.mxu1 %v419_v48 }
  0x59   :  { %463 = vmatprep.subr.mxu0 %v418_v49  ;;  %537 = vmatprep.subr.mxu1 %v418_v49 }
  0x5a   :  { %464 = vmatpush2.msra.mxu0 %v417_v50  ;;  %538 = vmatpush2.msra.mxu1 %v417_v50 }
  0x5b   :  { %465 = vmatprep.subr.mxu0 %v416_v51  ;;  %539 = vmatprep.subr.mxu1 %v416_v51 }
  0x5c   :  { %466 = vmatpush2.msra.mxu0 %v415_v52  ;;  %540 = vmatpush2.msra.mxu1 %v415_v52 }
  0x5d   :  { %467 = vmatprep.subr.mxu0 %v414_v53  ;;  %541 = vmatprep.subr.mxu1 %v414_v53 }
  0x5e   :  { %468 = vmatpush2.msra.mxu0 %v413_v54  ;;  %542 = vmatpush2.msra.mxu1 %v413_v54 }
  0x5f   :  { %469 = vmatprep.subr.mxu0 %v412_v55  ;;  %543 = vmatprep.subr.mxu1 %v412_v55 }
  0x60   :  { %470 = vmatpush2.msra.mxu0 %v411_v56  ;;  %544 = vmatpush2.msra.mxu1 %v411_v56 }
  0x61   :  { %471 = vmatprep.subr.mxu0 %v410_v57  ;;  %545 = vmatprep.subr.mxu1 %v410_v57 }
  0x62   :  { %472 = vmatpush2.msra.mxu0 %v409_v58  ;;  %546 = vmatpush2.msra.mxu1 %v409_v58 }
  0x63   :  { %473 = vmatprep.subr.mxu0 %v408_v59  ;;  %547 = vmatprep.subr.mxu1 %v408_v59 }
  0x64   :  { %474 = vmatpush2.msra.mxu0 %v407_v60  ;;  %548 = vmatpush2.msra.mxu1 %v407_v60 }
  0x65   :  { %475 = vmatprep.subr.mxu0 %v406_v61  ;;  %549 = vmatprep.subr.mxu1 %v406_v61 }
  0x66   :  { %476 = vmatpush2.msra.mxu0 %v405_v62  ;;  %550 = vmatpush2.msra.mxu1 %v405_v62 }
  0x67   :  { %477 = vmatprep.subr.mxu0 %v404_v63  ;;  %551 = vmatprep.subr.mxu1 %v404_v63 }
  0x68   :  { %478 = vmatpush2.msra.mxu0 %v403_v1  ;;  %552 = vmatpush2.msra.mxu1 %v403_v1 }
  0x69   :  { %479 = vmatprep.subr.mxu0 %v402_v2  ;;  %553 = vmatprep.subr.mxu1 %v402_v2 }
  0x6a   :  { %480 = vmatpush2.msra.mxu0 %v401_v3  ;;  %554 = vmatpush2.msra.mxu1 %v401_v3 }
  0x6b   :  { %481 = vmatprep.subr.mxu0 %v400_v4  ;;  %555 = vmatprep.subr.mxu1 %v400_v4 }
  0x6c   :  { %482 = vmatpush2.msra.mxu0 %v399_v5  ;;  %556 = vmatpush2.msra.mxu1 %v399_v5 }
  0x6d   :  { %483 = vmatprep.subr.mxu0 %v398_v6  ;;  %557 = vmatprep.subr.mxu1 %v398_v6 }
  0x6e   :  { %484 = vmatpush2.msra.mxu0 %v397_v7  ;;  %558 = vmatpush2.msra.mxu1 %v397_v7 }
  0x6f   :  { %485 = vmatprep.subr.mxu0 %v396_v8  ;;  %559 = vmatprep.subr.mxu1 %v396_v8 }
  0x70   :  { %486 = vmatpush2.msra.mxu0 %v395_v9  ;;  %560 = vmatpush2.msra.mxu1 %v395_v9 }
  0x71   :  { %487 = vmatprep.subr.mxu0 %v394_v10  ;;  %561 = vmatprep.subr.mxu1 %v394_v10 }
  0x72   :  { %488 = vmatpush2.msra.mxu0 %v393_v11  ;;  %562 = vmatpush2.msra.mxu1 %v393_v11 }
  0xeb   :  { %v138_v12 = vpop.f32.mrf.mxu0  ;;  %v194_v13 = vpop.f32.mrf.mxu1 }
  0xec   :  { %145 = vst [vmem:[#allocation2] sm:$0x3] %v138_v12  ;;  %v203_v14 = vrot.slane %v194_v13, 6  ;;  %v8218_v13 = vmov 1966171168  }
  0xed   :  { %v140_v15 = vpop.f32.mrf.mxu0  ;;  %v196_v16 = vpop.f32.mrf.mxu1 }
  0xee   :  { %207 = vst [vmem:[#allocation2] sm:$0xc] %v203_v14  ;;  %146 = vst [vmem:[#allocation2 + $0x8] sm:$0x3] %v140_v15  ;;  %v204_v17 = vrot.slane %v196_v16, 6  ;;  %v585_v14 = vunpack.c.l.s4 %v8218_v13  ;;  %v587_v15 = vlaneseq }
  0xef   :  { %v142_v18 = vpop.f32.mrf.mxu0  ;;  %v198_v19 = vpop.f32.mrf.mxu1  ;;  %v7302_v13 = vld [vmem:[%s9642_s2 + $0x10] ss:$8 sps:$4 sm:$0xff]  }
  0xf0   :  { %208 = vst [vmem:[#allocation2 + $0x8] sm:$0xc] %v204_v17  ;;  %v586_v16 = vunpack.c.0.s8 %v585_v14  ;;  %v588_v17 = vshrl.u32 %v587_v15, 7  ;;  %v7307_v14 = vld [vmem:[%s9642_s2 + $0x4] ss:$8 sps:$4 sm:$0xff]  }
  0xf1   :  { %v143_v20 = vpop.f32.mrf.mxu0  ;;  %v199_v21 = vpop.f32.mrf.mxu1  ;;  %v7350_v15 = vld [vmem:[%s9642_s2 + $0x110] ss:$8 sps:$4 sm:$0xff]  }
  0xf2   :  { %v8347_v19 = vsub.s32 %v586_v16, %v588_v17  ;;  %v7355_v16 = vld [vmem:[%s9642_s2 + $0x104] ss:$8 sps:$4 sm:$0xff]  }
  0xf3   :  { %v256_v22 = vpop.f32.mrf.mxu0  ;;  %v318_v23 = vpop.f32.mrf.mxu1 }
  0xf4   :  { %v265_v24 = vrot.slane %v256_v22, 4  ;;  %v327_v25 = vrot.slane %v318_v23, 2  ;;  %v580_v23 = vld [vmem:[%s9651_s11] sm:$0x3] }
  0xf5   :  { %v258_v26 = vpop.f32.mrf.mxu0  ;;  %v320_v27 = vpop.f32.mrf.mxu1 }
  0xf6   :  { %269 = vst [vmem:[#allocation2] sm:$0x30] %v265_v24  ;;  %331 = vst [vmem:[#allocation2] sm:$0xc0] %v327_v25  ;;  %v266_v28 = vrot.slane %v258_v26, 4  ;;  %v328_v29 = vrot.slane %v320_v27, 2 }
  0xf7   :  { %v260_v30 = vpop.f32.mrf.mxu0  ;;  %v322_v31 = vpop.f32.mrf.mxu1  ;;  %v8354_v25 = vsub.s32 0, %v588_v17  ;;  %v8356_v26 = vsub.s32 1, %v588_v17  ;;  %v7305_v17 = vld [vmem:[%s9642_s2] ss:$8 sps:$4 sm:$0xff]  }
  0xf8   :  { %270 = vst [vmem:[#allocation2 + $0x8] sm:$0x30] %v266_v28  ;;  %332 = vst [vmem:[#allocation2 + $0x8] sm:$0xc0] %v328_v29 }
  0xf9   :  { %v261_v32 = vpop.f32.mrf.mxu0  ;;  %v323_v33 = vpop.f32.mrf.mxu1 }
  0xfd   :  { %v8333_v34 = vld [vmem:[#allocation2] sm:$0xff] }
  0xfe   :  { %v335_v35 = vrot.slane %v8333_v34, 4  ;;  %v347_v36 = vmul.f32 %v8333_v34, %v8333_v34 }
  0xff   :  { %v8338_v37 = vld [vmem:[#allocation2 + $0x8] sm:$0xff] }
 0x100   :  { %v341_v38 = vrot.slane %v8338_v37, 4  ;;  %v336_v39 = vadd.f32 %v335_v35, %v8333_v34  ;;  %v348_v40 = vmul.f32 %v8338_v37, %v8338_v37  ;;  %v349_v41 = vrot.slane %v347_v36, 4  ;;  %v600_v35 = vld [vmem:[%s9652_s12] sm:$0x3] }
 0x102   :  { %v342_v42 = vadd.f32 %v341_v38, %v8338_v37  ;;  %v337_v43 = vrot.slane %v336_v39, 2  ;;  %v355_v44 = vrot.slane %v348_v40, 4  ;;  %v350_v45 = vadd.f32 %v349_v41, %v347_v36 }
 0x104   :  { %v343_v46 = vrot.slane %v342_v42, 2  ;;  %v338_v47 = vadd.f32 %v337_v43, %v336_v39  ;;  %v356_v48 = vadd.f32 %v355_v44, %v348_v40  ;;  %v351_v49 = vrot.slane %v350_v45, 2 }
 0x106   :  { %v344_v50 = vadd.f32 %v343_v46, %v342_v42  ;;  %v357_v51 = vrot.slane %v356_v48, 2  ;;  %v352_v52 = vadd.f32 %v351_v49, %v350_v45  ;;  %v339_v53 = vrot.slane %v338_v47, 1  ;;  %v7286_v49 = vld [vmem:[%s9642_s2 + $0x74] ss:$8 sps:$4 sm:$0xff]  }
 0x108   :  { %v345_v54 = vrot.slane %v344_v50, 1  ;;  %v358_v55 = vadd.f32 %v357_v51, %v356_v48  ;;  %v353_v56 = vrot.slane %v352_v52, 1  ;;  %v340_v59 = vadd.f32 %v339_v53, %v338_v47  ;;  %v6508_v51 = vld [vmem:[%s9646_s6 + $0x4] sm:$0xf] }
 0x109   :  { %v7289_v53 = vld [vmem:[%s9642_s2 + $0x64] ss:$8 sps:$4 sm:$0xff]  }
 0x10a   :  { %v346_v57 = vadd.f32 %v345_v54, %v344_v50  ;;  %v359_v58 = vrot.slane %v358_v55, 1  ;;  %v354_v61 = vadd.f32 %v353_v56, %v352_v52  ;;  %v652_v50 = vld [vmem:[%s9646_s6] sm:$0xf]  ;;  %v7284_v52 = vld [vmem:[%s9642_s2 + $0x70] ss:$8 sps:$4 sm:$0xff]  }
 0x10b   :  { %v7332_v54 = vld [vmem:[%s9642_s2 + $0x170] ss:$8 sps:$4 sm:$0xff]   ;;  %v7287_v56 = vld [vmem:[%s9642_s2 + $0x60] ss:$8 sps:$4 sm:$0xff]  }
 0x10c   :  { %489 = vmatprep.mubr.f32.mxu0 %v346_v57  ;;  %v360_v60 = vadd.f32 %v359_v58, %v358_v55  ;;  %v7337_v55 = vld [vmem:[%s9642_s2 + $0x164] ss:$8 sps:$4 sm:$0xff]   ;;  %v7292_v57 = vld [vmem:[%s9642_s2 + $0x54] ss:$8 sps:$4 sm:$0xff]   ;;  %v7335_v58 = vld [vmem:[%s9642_s2 + $0x160] ss:$8 sps:$4 sm:$0xff]  }
 0x10d   :  { %490 = vmatmul.mubr.f32.vlgmr.msra.gmra.mxu0 %v340_v59  ;;  %v7340_v59 = vld [vmem:[%s9642_s2 + $0x154] ss:$8 sps:$4 sm:$0xff]  }
 0x10e   :  { %563 = vmatprep.mubr.f32.mxu1 %v360_v60  ;;  %696 = vmatprep.mubr.bf16.mxu0 %v8217_v0  ;;  %v7290_v60 = vld [vmem:[%s9642_s2 + $0x50] ss:$8 sps:$4 sm:$0xff]  }
 0x10f   :  { %564 = vmatmul.mubr.f32.vlgmr.msra.gmra.mxu1 %v354_v61  ;;  %v7295_v61 = vld [vmem:[%s9642_s2 + $0x44] ss:$8 sps:$4 sm:$0xff]  }
 0x110   :  { %744 = vmatprep.mubr.bf16.mxu1 %v8217_v0 }
 0x1cd   :  { %v491_v62 = vpop.f32.mrf.mxu0 }
 0x1ce   :  { %v497_v63 = vmul.f32 0.03125, %v491_v62  ;;  %v7338_v62 = vld [vmem:[%s9642_s2 + $0x150] ss:$8 sps:$4 sm:$0xff]  }
 0x1cf   :  { %v493_v1 = vpop.f32.mrf.mxu0  ;;  %v565_v2 = vpop.f32.mrf.mxu1 }
 0x1d0   :  { %v572_v3 = vmul.f32 %v497_v63, %v497_v63  ;;  %v498_v4 = vmul.f32 0.03125, %v493_v1  ;;  %v570_v5 = vmul.f32 0.03125, %v565_v2  ;;  %v7293_v1 = vld [vmem:[%s9642_s2 + $0x40] ss:$8 sps:$4 sm:$0xff]   ;;  %v7298_v2 = vld [vmem:[%s9642_s2 + $0x34] ss:$8 sps:$4 sm:$0xff]  }
 0x1d1   :  { %v567_v6 = vpop.f32.mrf.mxu1 }
 0x1d2   :  { %v573_v7 = vmul.f32 %v498_v4, %v498_v4  ;;  %v574_v8 = vsub.f32 %v570_v5, %v572_v3  ;;  %v571_v9 = vmul.f32 0.03125, %v567_v6  ;;  %v7341_v3 = vld [vmem:[%s9642_s2 + $0x140] ss:$8 sps:$4 sm:$0xff]   ;;  %v7296_v5 = vld [vmem:[%s9642_s2 + $0x30] ss:$8 sps:$4 sm:$0xff]  }
 0x1d3   :  { %v7301_v6 = vld [vmem:[%s9642_s2 + $0x24] ss:$8 sps:$4 sm:$0xff]  }
 0x1d4   :  { %v576_v10 = vadd.f32 1e-05, %v574_v8  ;;  %v575_v11 = vsub.f32 %v571_v9, %v573_v7  ;;  %v7344_v7 = vld [vmem:[%s9642_s2 + $0x130] ss:$8 sps:$4 sm:$0xff]   ;;  %v7349_v8 = vld [vmem:[%s9642_s2 + $0x124] ss:$8 sps:$4 sm:$0xff]  }
 0x1d5   :  { %v7299_v9 = vld [vmem:[%s9642_s2 + $0x20] ss:$8 sps:$4 sm:$0xff]  }
 0x1d6   :  { %v577_v12 = vadd.f32 1e-05, %v575_v11  ;;  %8066 = vrsqrt.f32 %v576_v10  ;;  %v7304_v10 = vld [vmem:[%s9642_s2 + $0x14] ss:$8 sps:$4 sm:$0xff]   ;;  %v7347_v11 = vld [vmem:[%s9642_s2 + $0x120] ss:$8 sps:$4 sm:$0xff]  }
 0x1d8   :  { %8068 = vrsqrt.f32 %v577_v12  ;;  %v7352_v12 = vld [vmem:[%s9642_s2 + $0x114] ss:$8 sps:$4 sm:$0xff]  }
 0x1e3   :  { %v8067_v18 = vpop.eup %8066 }
 0x1e5   :  { %v8069_v20 = vpop.eup %8068 }
 0x1e6   :  { %v583_v21 = vcombine.low %v8067_v18, %v8069_v20  ;;  %v7310_v18 = vld [vmem:[%s9642_s2 + $0xf4] ss:$8 sps:$4 sm:$0xff]   ;;  %v7353_v20 = vld [vmem:[%s9642_s2 + $0x100] ss:$8 sps:$4 sm:$0xff]  }
 0x1e8   :  { %v590_v22 = vrot.slane %v583_v21, %v8347_v19  ;;  %v7358_v21 = vld [vmem:[%s9642_s2 + $0x1f4] ss:$8 sps:$4 sm:$0xff]  }
 0x1ea   :  { %v597_v24 = vrot.slane %v590_v22, %v8347_v19  ;;  %v7308_v22 = vld [vmem:[%s9642_s2 + $0xf0] ss:$8 sps:$4 sm:$0xff]  }
 0x1ec   :  { %v599_v27 = vmul.f32 %v597_v24, %v580_v23  ;;  %v7313_v23 = vld [vmem:[%s9642_s2 + $0xe4] ss:$8 sps:$4 sm:$0xff]   ;;  %v7356_v24 = vld [vmem:[%s9642_s2 + $0x1f0] ss:$8 sps:$4 sm:$0xff]  }
 0x1ee   :  { %v605_v28 = vrot.slane %v599_v27, %v8354_v25  ;;  %v609_v29 = vrot.slane %v599_v27, %v8356_v26  ;;  %v7361_v27 = vld [vmem:[%s9642_s2 + $0x1e4] ss:$8 sps:$4 sm:$0xff]  }
 0x1f0   :  { %v612_v30 = vmul.f32 %v605_v28, %v497_v63  ;;  %v613_v31 = vmul.f32 %v609_v29, %v498_v4  ;;  %v634_v39 = vmul.f32 %v609_v29, %v8338_v37  ;;  %v633_v41 = vmul.f32 %v605_v28, %v8333_v34  ;;  %v7334_v37 = vld [vmem:[%s9642_s2 + $0x174] ss:$8 sps:$4 sm:$0xff]   ;;  %v7343_v63 = vld [vmem:[%s9642_s2 + $0x144] ss:$8 sps:$4 sm:$0xff]   ;;  %v7311_v28 = vld [vmem:[%s9642_s2 + $0xe0] ss:$8 sps:$4 sm:$0xff]  }
 0x1f1   :  { %v7346_v4 = vld [vmem:[%s9642_s2 + $0x134] ss:$8 sps:$4 sm:$0xff]  }
 0x1f2   :  { %v616_v32 = vcombine.low %v612_v30, %v613_v31  ;;  %v7316_v29 = vld [vmem:[%s9642_s2 + $0xd4] ss:$8 sps:$4 sm:$0xff]   ;;  %v7359_v30 = vld [vmem:[%s9642_s2 + $0x1e0] ss:$8 sps:$4 sm:$0xff]  }
 0x1f3   :  { %v7364_v31 = vld [vmem:[%s9642_s2 + $0x1d4] ss:$8 sps:$4 sm:$0xff]  }
 0x1f4   :  { %v623_v33 = vrot.slane %v616_v32, %v8347_v19  ;;  %v7314_v32 = vld [vmem:[%s9642_s2 + $0xd0] ss:$8 sps:$4 sm:$0xff]  }
 0x1f6   :  { %v630_v36 = vrot.slane %v623_v33, %v8347_v19  ;;  %v7319_v33 = vld [vmem:[%s9642_s2 + $0xc4] ss:$8 sps:$4 sm:$0xff]  }
 0x1f8   :  { %v632_v38 = vsub.f32 %v600_v35, %v630_v36  ;;  %v7362_v35 = vld [vmem:[%s9642_s2 + $0x1d0] ss:$8 sps:$4 sm:$0xff]   ;;  %v7367_v36 = vld [vmem:[%s9642_s2 + $0x1c4] ss:$8 sps:$4 sm:$0xff]  }
 0x1fa   :  { %v643_v40 = vrot.slane %v632_v38, %v8356_v26  ;;  %v639_v42 = vrot.slane %v632_v38, %v8354_v25  ;;  %v7317_v38 = vld [vmem:[%s9642_s2 + $0xc0] ss:$8 sps:$4 sm:$0xff]  }
 0x1fc   :  { %v647_v43 = vadd.f32 %v643_v40, %v634_v39  ;;  %v646_v44 = vadd.f32 %v639_v42, %v633_v41  ;;  %v7322_v39 = vld [vmem:[%s9642_s2 + $0xb4] ss:$8 sps:$4 sm:$0xff]   ;;  %v7365_v40 = vld [vmem:[%s9642_s2 + $0x1c0] ss:$8 sps:$4 sm:$0xff]   ;;  %v7320_v42 = vld [vmem:[%s9642_s2 + $0xb0] ss:$8 sps:$4 sm:$0xff]  }
 0x1fd   :  { %v7370_v41 = vld [vmem:[%s9642_s2 + $0x1b4] ss:$8 sps:$4 sm:$0xff]  }
 0x1fe   :  { %v649_v45 = vmax.f32 %v647_v43, 0.0  ;;  %v648_v46 = vmax.f32 %v646_v44, 0.0  ;;  %v7325_v43 = vld [vmem:[%s9642_s2 + $0xa4] ss:$8 sps:$4 sm:$0xff]   ;;  %v7368_v44 = vld [vmem:[%s9642_s2 + $0x1b0] ss:$8 sps:$4 sm:$0xff]  }
 0x200   :  { %v8369_v47 = vpack.c.bf16 %v649_v45, %v649_v45  ;;  %v8371_v48 = vpack.c.bf16 %v648_v46, %v648_v46  ;;  %v7373_v45 = vld [vmem:[%s9642_s2 + $0x1a4] ss:$8 sps:$4 sm:$0xff]   ;;  %v7323_v46 = vld [vmem:[%s9642_s2 + $0xa0] ss:$8 sps:$4 sm:$0xff]  }
 0x202   :  { %6506 = vmatprep.subr.msk.bf16.mxu0 %vm657_vm1, %v8369_v47  ;;  %6509 = vmatprep.subr.msk.bf16.mxu1 %vm657_vm1, %v8369_v47  ;;  %v659_v34 = vsel %vm657_vm1, %v8371_v48, 0 }
 0x203   :  { %679 = vmatpush1.bf16.msra.mxu0 %v659_v34  ;;  %727 = vmatpush1.bf16.msra.mxu1 %v659_v34  ;;  %v7379_v34 = vld [vmem:[%s9642_s2 + $0x194] ss:$8 sps:$4 sm:$0xff]  }
 0x204   :  { %1181 = vmatprep.subr.bf16.mxu1 %v7286_v49  ;;  %980 = vmatprep.subr.bf16.mxu0 %v7334_v37  ;;  %v7328_v49 = vld [vmem:[%s9642_s2 + $0x94] ss:$8 sps:$4 sm:$0xff]   ;;  %v7371_v37 = vld [vmem:[%s9642_s2 + $0x1a0] ss:$8 sps:$4 sm:$0xff]  }
 0x206   :  { %6507 = vmatmul.mubr.msk.bf16.vlgmr.msra.gmra.mxu0 %vm653_vm2, %v652_v50  ;;  %6510 = vmatmul.mubr.msk.bf16.vlgmr.msra.gmra.mxu1 %vm653_vm2, %v6508_v51  ;;  %v7326_v50 = vld [vmem:[%s9642_s2 + $0x90] ss:$8 sps:$4 sm:$0xff]   ;;  %v7331_v51 = vld [vmem:[%s9642_s2 + $0x84] ss:$8 sps:$4 sm:$0xff]  }
 0x207   :  { %1182 = vmatpush1.bf16.msra.mxu1 %v7284_v52  ;;  %1213 = vmatprep.mubr.bf16.mxu1 %v8369_v47  ;;  %v7377_v52 = vld [vmem:[%s9642_s2 + $0x190] ss:$8 sps:$4 sm:$0xff]  }
 0x208   :  { %1183 = vmatprep.subr.bf16.mxu1 %v7289_v53  ;;  %981 = vmatpush1.bf16.msra.mxu0 %v7332_v54  ;;  %v7329_v53 = vld [vmem:[%s9642_s2 + $0x80] ss:$8 sps:$4 sm:$0xff]   ;;  %v7376_v54 = vld [vmem:[%s9642_s2 + $0x274] ss:$8 sps:$4 sm:$0xff]  }
 0x209   :  { %982 = vmatprep.subr.bf16.mxu0 %v7337_v55  ;;  %v7374_v55 = vld [vmem:[%s9642_s2 + $0x270] ss:$8 sps:$4 sm:$0xff]  }
 0x20b   :  { %1184 = vmatpush1.bf16.msra.mxu1 %v7287_v56  ;;  %v7382_v56 = vld [vmem:[%s9642_s2 + $0x264] ss:$8 sps:$4 sm:$0xff]  }
 0x20c   :  { %1185 = vmatprep.subr.bf16.mxu1 %v7292_v57  ;;  %983 = vmatpush1.bf16.msra.mxu0 %v7335_v58  ;;  %v7385_v57 = vld [vmem:[%s9642_s2 + $0x184] ss:$8 sps:$4 sm:$0xff]   ;;  %v7383_v58 = vld [vmem:[%s9642_s2 + $0x180] ss:$8 sps:$4 sm:$0xff]  }
 0x20d   :  { %984 = vmatprep.subr.bf16.mxu0 %v7340_v59  ;;  %v7380_v59 = vld [vmem:[%s9642_s2 + $0x260] ss:$8 sps:$4 sm:$0xff]  }
 0x20f   :  { %1186 = vmatpush1.bf16.msra.mxu1 %v7290_v60  ;;  %v7388_v60 = vld [vmem:[%s9642_s2 + $0x254] ss:$8 sps:$4 sm:$0xff]  }
 0x210   :  { %1187 = vmatprep.subr.bf16.mxu1 %v7295_v61  ;;  %985 = vmatpush1.bf16.msra.mxu0 %v7338_v62  ;;  %v7391_v61 = vld [vmem:[%s9642_s2 + $0x374] ss:$8 sps:$4 sm:$0xff]   ;;  %v7386_v62 = vld [vmem:[%s9642_s2 + $0x250] ss:$8 sps:$4 sm:$0xff]  }
 0x211   :  { %986 = vmatprep.subr.bf16.mxu0 %v7343_v63  ;;  %v7394_v63 = vld [vmem:[%s9642_s2 + $0x244] ss:$8 sps:$4 sm:$0xff]  }
 0x213   :  { %1188 = vmatpush1.bf16.msra.mxu1 %v7293_v1  ;;  %v7392_v1 = vld [vmem:[%s9642_s2 + $0x240] ss:$8 sps:$4 sm:$0xff]  }
 0x214   :  { %1189 = vmatprep.subr.bf16.mxu1 %v7298_v2  ;;  %987 = vmatpush1.bf16.msra.mxu0 %v7341_v3  ;;  %v7400_v2 = vld [vmem:[%s9642_s2 + $0x234] ss:$8 sps:$4 sm:$0xff]   ;;  %v7398_v3 = vld [vmem:[%s9642_s2 + $0x230] ss:$8 sps:$4 sm:$0xff]  }
 0x215   :  { %988 = vmatprep.subr.bf16.mxu0 %v7346_v4  ;;  %v7406_v4 = vld [vmem:[%s9642_s2 + $0x224] ss:$8 sps:$4 sm:$0xff]  }
 0x217   :  { %1190 = vmatpush1.bf16.msra.mxu1 %v7296_v5  ;;  %v7404_v5 = vld [vmem:[%s9642_s2 + $0x220] ss:$8 sps:$4 sm:$0xff]  }
 0x218   :  { %1191 = vmatprep.subr.bf16.mxu1 %v7301_v6  ;;  %989 = vmatpush1.bf16.msra.mxu0 %v7344_v7  ;;  %v7412_v6 = vld [vmem:[%s9642_s2 + $0x214] ss:$8 sps:$4 sm:$0xff]   ;;  %v7410_v7 = vld [vmem:[%s9642_s2 + $0x210] ss:$8 sps:$4 sm:$0xff]  }
 0x219   :  { %990 = vmatprep.subr.bf16.mxu0 %v7349_v8  ;;  %v7418_v8 = vld [vmem:[%s9642_s2 + $0x204] ss:$8 sps:$4 sm:$0xff]  }
 0x21b   :  { %1192 = vmatpush1.bf16.msra.mxu1 %v7299_v9  ;;  %v7416_v9 = vld [vmem:[%s9642_s2 + $0x200] ss:$8 sps:$4 sm:$0xff]  }
 0x21c   :  { %1193 = vmatprep.subr.bf16.mxu1 %v7304_v10  ;;  %991 = vmatpush1.bf16.msra.mxu0 %v7347_v11  ;;  %v7424_v10 = vld [vmem:[%s9642_s2 + $0x2f4] ss:$8 sps:$4 sm:$0xff]   ;;  %v7422_v11 = vld [vmem:[%s9642_s2 + $0x2f0] ss:$8 sps:$4 sm:$0xff]  }
 0x21d   :  { %992 = vmatprep.subr.bf16.mxu0 %v7352_v12  ;;  %v7430_v12 = vld [vmem:[%s9642_s2 + $0x2e4] ss:$8 sps:$4 sm:$0xff]  }
 0x21f   :  { %1194 = vmatpush1.bf16.msra.mxu1 %v7302_v13  ;;  %v7428_v13 = vld [vmem:[%s9642_s2 + $0x2e0] ss:$8 sps:$4 sm:$0xff]  }
 0x220   :  { %1195 = vmatprep.subr.bf16.mxu1 %v7307_v14  ;;  %993 = vmatpush1.bf16.msra.mxu0 %v7350_v15  ;;  %v7436_v14 = vld [vmem:[%s9642_s2 + $0x2d4] ss:$8 sps:$4 sm:$0xff]   ;;  %v7434_v15 = vld [vmem:[%s9642_s2 + $0x2d0] ss:$8 sps:$4 sm:$0xff]  }
 0x221   :  { %994 = vmatprep.subr.bf16.mxu0 %v7355_v16  ;;  %v7442_v16 = vld [vmem:[%s9642_s2 + $0x2c4] ss:$8 sps:$4 sm:$0xff]  }
 0x223   :  { %1196 = vmatpush1.bf16.msra.mxu1 %v7305_v17  ;;  %v7440_v17 = vld [vmem:[%s9642_s2 + $0x2c0] ss:$8 sps:$4 sm:$0xff]  }
 0x224   :  { %1197 = vmatprep.subr.bf16.mxu1 %v7310_v18  ;;  %995 = vmatpush1.bf16.msra.mxu0 %v7353_v20  ;;  %v7448_v18 = vld [vmem:[%s9642_s2 + $0x2b4] ss:$8 sps:$4 sm:$0xff]   ;;  %v7446_v20 = vld [vmem:[%s9642_s2 + $0x2b0] ss:$8 sps:$4 sm:$0xff]  }
 0x225   :  { %996 = vmatprep.subr.bf16.mxu0 %v7358_v21  ;;  %v7454_v21 = vld [vmem:[%s9642_s2 + $0x2a4] ss:$8 sps:$4 sm:$0xff]  }
 0x227   :  { %1198 = vmatpush2.bf16.msra.mxu1 %v7308_v22  ;;  %v7452_v22 = vld [vmem:[%s9642_s2 + $0x2a0] ss:$8 sps:$4 sm:$0xff]  }
 0x228   :  { %1199 = vmatprep.subr.bf16.mxu1 %v7313_v23  ;;  %997 = vmatpush2.bf16.msra.mxu0 %v7356_v24  ;;  %v7460_v23 = vld [vmem:[%s9642_s2 + $0x294] ss:$8 sps:$4 sm:$0xff]   ;;  %v7458_v24 = vld [vmem:[%s9642_s2 + $0x290] ss:$8 sps:$4 sm:$0xff]  }
 0x229   :  { %998 = vmatprep.subr.bf16.mxu0 %v7361_v27  ;;  %v7466_v27 = vld [vmem:[%s9642_s2 + $0x284] ss:$8 sps:$4 sm:$0xff]  }
 0x22b   :  { %1200 = vmatpush2.bf16.msra.mxu1 %v7311_v28  ;;  %v7464_v28 = vld [vmem:[%s9642_s2 + $0x280] ss:$8 sps:$4 sm:$0xff]  }
 0x22c   :  { %1201 = vmatprep.subr.bf16.mxu1 %v7316_v29  ;;  %999 = vmatpush2.bf16.msra.mxu0 %v7359_v30 }
 0x22d   :  { %1000 = vmatprep.subr.bf16.mxu0 %v7364_v31 }
 0x22f   :  { %1202 = vmatpush2.bf16.msra.mxu1 %v7314_v32 }
 0x230   :  { %1203 = vmatprep.subr.bf16.mxu1 %v7319_v33  ;;  %1001 = vmatpush2.bf16.msra.mxu0 %v7362_v35 }
 0x231   :  { %1002 = vmatprep.subr.bf16.mxu0 %v7367_v36  ;;  %v7389_v36 = vld [vmem:[%s9642_s2 + $0x370] ss:$8 sps:$4 sm:$0xff]  }
 0x233   :  { %1204 = vmatpush2.bf16.msra.mxu1 %v7317_v38 }
 0x234   :  { %1205 = vmatprep.subr.bf16.mxu1 %v7322_v39  ;;  %1003 = vmatpush2.bf16.msra.mxu0 %v7365_v40 }
 0x235   :  { %1004 = vmatprep.subr.bf16.mxu0 %v7370_v41  ;;  %v7397_v41 = vld [vmem:[%s9642_s2 + $0x364] ss:$8 sps:$4 sm:$0xff]  }
 0x237   :  { %1206 = vmatpush2.bf16.msra.mxu1 %v7320_v42 }
 0x238   :  { %1207 = vmatprep.subr.bf16.mxu1 %v7325_v43  ;;  %1005 = vmatpush2.bf16.msra.mxu0 %v7368_v44 }
 0x239   :  { %1006 = vmatprep.subr.bf16.mxu0 %v7373_v45  ;;  %v7395_v45 = vld [vmem:[%s9642_s2 + $0x360] ss:$8 sps:$4 sm:$0xff]  }
 0x23b   :  { %1208 = vmatpush2.bf16.msra.mxu1 %v7323_v46  ;;  %v7403_v46 = vld [vmem:[%s9642_s2 + $0x354] ss:$8 sps:$4 sm:$0xff]  }
 0x23c   :  { %1209 = vmatprep.subr.bf16.mxu1 %v7328_v49  ;;  %1007 = vmatpush2.bf16.msra.mxu0 %v7371_v37  ;;  %v7401_v49 = vld [vmem:[%s9642_s2 + $0x350] ss:$8 sps:$4 sm:$0xff]   ;;  %v7409_v37 = vld [vmem:[%s9642_s2 + $0x344] ss:$8 sps:$4 sm:$0xff]  }
 0x23d   :  { %1008 = vmatprep.subr.bf16.mxu0 %v7379_v34  ;;  %v7415_v34 = vld [vmem:[%s9642_s2 + $0x334] ss:$8 sps:$4 sm:$0xff]  }
 0x23f   :  { %1210 = vmatpush2.bf16.msra.mxu1 %v7326_v50  ;;  %v7413_v50 = vld [vmem:[%s9642_s2 + $0x330] ss:$8 sps:$4 sm:$0xff]  }
 0x240   :  { %1211 = vmatprep.subr.bf16.mxu1 %v7331_v51  ;;  %1009 = vmatpush2.bf16.msra.mxu0 %v7377_v52  ;;  %v7421_v51 = vld [vmem:[%s9642_s2 + $0x324] ss:$8 sps:$4 sm:$0xff]   ;;  %v7419_v52 = vld [vmem:[%s9642_s2 + $0x320] ss:$8 sps:$4 sm:$0xff]  }
 0x241   :  { %1010 = vmatprep.subr.bf16.mxu0 %v7385_v57  ;;  %v7439_v57 = vld [vmem:[%s9642_s2 + $0x3f4] ss:$8 sps:$4 sm:$0xff]  }
 0x243   :  { %1212 = vmatpush2.bf16.msra.mxu1 %v7329_v53  ;;  %v7427_v53 = vld [vmem:[%s9642_s2 + $0x314] ss:$8 sps:$4 sm:$0xff]  }
 0x244   :  { %1649 = vmatprep.subr.bf16.mxu1 %v7376_v54  ;;  %1011 = vmatpush2.bf16.msra.mxu0 %v7383_v58  ;;  %v7425_v54 = vld [vmem:[%s9642_s2 + $0x310] ss:$8 sps:$4 sm:$0xff]  }
 0x245   :  { %1448 = vmatprep.subr.bf16.mxu0 %v7391_v61  ;;  %v7437_v58 = vld [vmem:[%s9642_s2 + $0x3f0] ss:$8 sps:$4 sm:$0xff]   ;;  %v7451_v61 = vld [vmem:[%s9642_s2 + $0x3d4] ss:$8 sps:$4 sm:$0xff]  }
 0x246   :  { %1214 = vmatmul.mubr.bf16.vlgmr.msra.gmra.mxu1 %v8371_v48 }
 0x247   :  { %1650 = vmatpush1.bf16.msra.mxu1 %v7374_v55  ;;  %v7433_v55 = vld [vmem:[%s9642_s2 + $0x304] ss:$8 sps:$4 sm:$0xff]  }
 0x248   :  { %1651 = vmatprep.subr.bf16.mxu1 %v7382_v56  ;;  %v7431_v56 = vld [vmem:[%s9642_s2 + $0x300] ss:$8 sps:$4 sm:$0xff]  }
 0x24b   :  { %1652 = vmatpush1.bf16.msra.mxu1 %v7380_v59  ;;  %v7445_v59 = vld [vmem:[%s9642_s2 + $0x3e4] ss:$8 sps:$4 sm:$0xff]  }
 0x24c   :  { %1653 = vmatprep.subr.bf16.mxu1 %v7388_v60  ;;  %v7443_v60 = vld [vmem:[%s9642_s2 + $0x3e0] ss:$8 sps:$4 sm:$0xff]  }
 0x24f   :  { %1654 = vmatpush1.bf16.msra.mxu1 %v7386_v62  ;;  %v7449_v62 = vld [vmem:[%s9642_s2 + $0x3d0] ss:$8 sps:$4 sm:$0xff]  }
 0x250   :  { %1655 = vmatprep.subr.bf16.mxu1 %v7394_v63  ;;  %v7457_v63 = vld [vmem:[%s9642_s2 + $0x3c4] ss:$8 sps:$4 sm:$0xff]  }
 0x253   :  { %1656 = vmatpush1.bf16.msra.mxu1 %v7392_v1  ;;  %v7455_v1 = vld [vmem:[%s9642_s2 + $0x3c0] ss:$8 sps:$4 sm:$0xff]  }
 0x254   :  { %1657 = vmatprep.subr.bf16.mxu1 %v7400_v2  ;;  %v7463_v2 = vld [vmem:[%s9642_s2 + $0x3b4] ss:$8 sps:$4 sm:$0xff]  }
 0x257   :  { %1658 = vmatpush1.bf16.msra.mxu1 %v7398_v3  ;;  %v7461_v3 = vld [vmem:[%s9642_s2 + $0x3b0] ss:$8 sps:$4 sm:$0xff]  }
 0x258   :  { %1659 = vmatprep.subr.bf16.mxu1 %v7406_v4  ;;  %v7469_v4 = vld [vmem:[%s9642_s2 + $0x3a4] ss:$8 sps:$4 sm:$0xff]  }
 0x25b   :  { %1660 = vmatpush1.bf16.msra.mxu1 %v7404_v5  ;;  %v7467_v5 = vld [vmem:[%s9642_s2 + $0x3a0] ss:$8 sps:$4 sm:$0xff]  }
 0x25c   :  { %1661 = vmatprep.subr.bf16.mxu1 %v7412_v6  ;;  %v7472_v6 = vld [vmem:[%s9642_s2 + $0x394] ss:$8 sps:$4 sm:$0xff]  }
 0x25f   :  { %1662 = vmatpush1.bf16.msra.mxu1 %v7410_v7  ;;  %v7470_v7 = vld [vmem:[%s9642_s2 + $0x390] ss:$8 sps:$4 sm:$0xff]  }
 0x260   :  { %1663 = vmatprep.subr.bf16.mxu1 %v7418_v8  ;;  %v7475_v8 = vld [vmem:[%s9642_s2 + $0x384] ss:$8 sps:$4 sm:$0xff]  }
 0x263   :  { %1664 = vmatpush1.bf16.msra.mxu1 %v7416_v9  ;;  %v7473_v9 = vld [vmem:[%s9642_s2 + $0x380] ss:$8 sps:$4 sm:$0xff]  }
 0x264   :  { %1665 = vmatprep.subr.bf16.mxu1 %v7424_v10 }
 0x267   :  { %1666 = vmatpush2.bf16.msra.mxu1 %v7422_v11 }
 0x268   :  { %1667 = vmatprep.subr.bf16.mxu1 %v7430_v12 }
 0x26b   :  { %1668 = vmatpush2.bf16.msra.mxu1 %v7428_v13 }
 0x26c   :  { %1669 = vmatprep.subr.bf16.mxu1 %v7436_v14  ;;  %v1778_v14 = vld [vmem:[#allocation10 + $0x2f8] sm:$0xff] }
 0x26f   :  { %1670 = vmatpush2.bf16.msra.mxu1 %v7434_v15  ;;  %v1777_v15 = vld [vmem:[#allocation10 + $0x2f0] sm:$0xff] }
 0x270   :  { %1671 = vmatprep.subr.bf16.mxu1 %v7442_v16  ;;  %v1776_v16 = vld [vmem:[#allocation10 + $0x2e8] sm:$0xff] }
 0x273   :  { %1672 = vmatpush2.bf16.msra.mxu1 %v7440_v17  ;;  %v1775_v17 = vld [vmem:[#allocation10 + $0x2e0] sm:$0xff] }
 0x274   :  { %1673 = vmatprep.subr.bf16.mxu1 %v7448_v18  ;;  %v1774_v18 = vld [vmem:[#allocation10 + $0x2d8] sm:$0xff] }
 0x277   :  { %1674 = vmatpush2.bf16.msra.mxu1 %v7446_v20  ;;  %v1773_v20 = vld [vmem:[#allocation10 + $0x2d0] sm:$0xff] }
 0x278   :  { %1675 = vmatprep.subr.bf16.mxu1 %v7454_v21  ;;  %v1772_v21 = vld [vmem:[#allocation10 + $0x2c8] sm:$0xff] }
 0x27b   :  { %1676 = vmatpush2.bf16.msra.mxu1 %v7452_v22  ;;  %v1771_v22 = vld [vmem:[#allocation10 + $0x2c0] sm:$0xff] }
 0x27c   :  { %1677 = vmatprep.subr.bf16.mxu1 %v7460_v23  ;;  %v1769_v23 = vld [vmem:[#allocation10 + $0x2b0] sm:$0xff] }
 0x27f   :  { %1678 = vmatpush2.bf16.msra.mxu1 %v7458_v24  ;;  %v1768_v24 = vld [vmem:[#allocation10 + $0x2a8] sm:$0xff] }
 0x280   :  { %1679 = vmatprep.subr.bf16.mxu1 %v7466_v27  ;;  %v1767_v27 = vld [vmem:[#allocation10 + $0x2a0] sm:$0xff] }
 0x283   :  { %1680 = vmatpush2.bf16.msra.mxu1 %v7464_v28  ;;  %v1766_v28 = vld [vmem:[#allocation10 + $0x298] sm:$0xff] }
 0x284   :  { %1885 = vmatprep.subr.mxu1 %v1778_v14 }
 0x2c6   :  { %v698_v29 = vpop.f32.mrf.mxu0  ;;  %v746_v30 = vpop.f32.mrf.mxu1 }
 0x2c7   :  { %v753_v32 = vpack.c.bf16 %v746_v30, %v746_v30  ;;  %v705_v39 = vpack.c.bf16 %v698_v29, %v698_v29  ;;  %v1765_v29 = vld [vmem:[#allocation10 + $0x290] sm:$0xff]  ;;  %v1764_v30 = vld [vmem:[#allocation10 + $0x288] sm:$0xff] }
 0x2c8   :  { %v700_v31 = vpop.f32.mrf.mxu0  ;;  %v748_v33 = vpop.f32.mrf.mxu1 }
 0x2c9   :  { %v706_v35 = vpack.c.bf16 %v700_v31, %v700_v31  ;;  %v754_v38 = vpack.c.bf16 %v748_v33, %v748_v33  ;;  %v1763_v31 = vld [vmem:[#allocation10 + $0x280] sm:$0xff]  ;;  %v1761_v33 = vld [vmem:[#allocation10 + $0x270] sm:$0xff] }
 0x2ca   :  { %v702_v40 = vpop.f32.mrf.mxu0  ;;  %v750_v42 = vpop.f32.mrf.mxu1 }
 0x2cb   :  { %1012 = vmatprep.mubr.bf16.mxu0 %v706_v35  ;;  %1681 = vmatprep.mubr.bf16.mxu1 %v754_v38  ;;  %v1760_v35 = vld [vmem:[#allocation10 + $0x268] sm:$0xff]  ;;  %v1758_v38 = vld [vmem:[#allocation10 + $0x258] sm:$0xff] }
 0x2cc   :  { %v703_v43 = vpop.f32.mrf.mxu0  ;;  %1013 = vmatmul.mubr.bf16.vlgmr.msra.gmra.mxu0 %v705_v39  ;;  %1682 = vmatmul.mubr.bf16.vlgmr.msra.gmra.mxu1 %v753_v32  ;;  %v751_v44 = vpop.f32.mrf.mxu1  ;;  %v1762_v32 = vld [vmem:[#allocation10 + $0x278] sm:$0xff]  ;;  %v1757_v39 = vld [vmem:[#allocation10 + $0x250] sm:$0xff]  ;;  %v1756_v40 = vld [vmem:[#allocation10 + $0x248] sm:$0xff] }
 0x2cd   :  { %1449 = vmatpush1.bf16.msra.mxu0 %v7389_v36  ;;  %1480 = vmatprep.mubr.bf16.mxu0 %v8369_v47  ;;  %v7407_v47 = vld [vmem:[%s9642_s2 + $0x340] ss:$8 sps:$4 sm:$0xff]   ;;  %v1759_v36 = vld [vmem:[#allocation10 + $0x260] sm:$0xff]  ;;  %v1752_v44 = vld [vmem:[#allocation10 + $0x228] sm:$0xff] }
 0x2ce   :  { %1450 = vmatprep.subr.bf16.mxu0 %v7397_v41  ;;  %1886 = vmatpush1.msra.mxu1 %v1777_v15  ;;  %v1755_v41 = vld [vmem:[#allocation10 + $0x240] sm:$0xff]  ;;  %v1754_v42 = vld [vmem:[#allocation10 + $0x238] sm:$0xff]  ;;  %v1753_v43 = vld [vmem:[#allocation10 + $0x230] sm:$0xff] }
 0x2cf   :  { %1887 = vmatprep.subr.mxu1 %v1776_v16 }
 0x2d0   :  { %1888 = vmatpush1.msra.mxu1 %v1775_v17 }
 0x2d1   :  { %1451 = vmatpush1.bf16.msra.mxu0 %v7395_v45  ;;  %1889 = vmatprep.subr.mxu1 %v1774_v18  ;;  %v1751_v45 = vld [vmem:[#allocation10 + $0x220] sm:$0xff] }
 0x2d2   :  { %1452 = vmatprep.subr.bf16.mxu0 %v7403_v46  ;;  %1890 = vmatpush1.msra.mxu1 %v1773_v20  ;;  %v1750_v46 = vld [vmem:[#allocation10 + $0x218] sm:$0xff] }
 0x2d3   :  { %1891 = vmatprep.subr.mxu1 %v1772_v21 }
 0x2d4   :  { %1892 = vmatpush1.msra.mxu1 %v1771_v22 }
 0x2d5   :  { %1453 = vmatpush1.bf16.msra.mxu0 %v7401_v49  ;;  %v1749_v49 = vld [vmem:[#allocation10 + $0x210] sm:$0xff] }
 0x2d6   :  { %1454 = vmatprep.subr.bf16.mxu0 %v7409_v37  ;;  %v1748_v37 = vld [vmem:[#allocation10 + $0x208] sm:$0xff] }
 0x2d9   :  { %1455 = vmatpush1.bf16.msra.mxu0 %v7407_v47  ;;  %v1747_v47 = vld [vmem:[#allocation10 + $0x200] sm:$0xff] }
 0x2da   :  { %1456 = vmatprep.subr.bf16.mxu0 %v7415_v34  ;;  %v1810_v34 = vld [vmem:[#allocation10 + $0x3f8] sm:$0xff] }
 0x2dd   :  { %1457 = vmatpush1.bf16.msra.mxu0 %v7413_v50  ;;  %v1809_v50 = vld [vmem:[#allocation10 + $0x3f0] sm:$0xff] }
 0x2de   :  { %1458 = vmatprep.subr.bf16.mxu0 %v7421_v51  ;;  %v1808_v51 = vld [vmem:[#allocation10 + $0x3e8] sm:$0xff] }
 0x2e1   :  { %1459 = vmatpush1.bf16.msra.mxu0 %v7419_v52  ;;  %v1807_v52 = vld [vmem:[#allocation10 + $0x3e0] sm:$0xff] }
 0x2e2   :  { %1460 = vmatprep.subr.bf16.mxu0 %v7427_v53  ;;  %v1806_v53 = vld [vmem:[#allocation10 + $0x3d8] sm:$0xff] }
 0x2e5   :  { %1461 = vmatpush1.bf16.msra.mxu0 %v7425_v54  ;;  %v1805_v54 = vld [vmem:[#allocation10 + $0x3d0] sm:$0xff] }
 0x2e6   :  { %1462 = vmatprep.subr.bf16.mxu0 %v7433_v55  ;;  %v1804_v55 = vld [vmem:[#allocation10 + $0x3c8] sm:$0xff] }
 0x2e9   :  { %1463 = vmatpush1.bf16.msra.mxu0 %v7431_v56  ;;  %v1803_v56 = vld [vmem:[#allocation10 + $0x3c0] sm:$0xff] }
 0x2ea   :  { %1464 = vmatprep.subr.bf16.mxu0 %v7439_v57  ;;  %v1802_v57 = vld [vmem:[#allocation10 + $0x3b8] sm:$0xff] }
 0x2ed   :  { %1465 = vmatpush2.bf16.msra.mxu0 %v7437_v58  ;;  %v1801_v58 = vld [vmem:[#allocation10 + $0x3b0] sm:$0xff] }
 0x2ee   :  { %1466 = vmatprep.subr.bf16.mxu0 %v7445_v59  ;;  %v1800_v59 = vld [vmem:[#allocation10 + $0x3a8] sm:$0xff] }
 0x2f1   :  { %1467 = vmatpush2.bf16.msra.mxu0 %v7443_v60  ;;  %v1799_v60 = vld [vmem:[#allocation10 + $0x3a0] sm:$0xff] }
 0x2f2   :  { %1468 = vmatprep.subr.bf16.mxu0 %v7451_v61  ;;  %v1798_v61 = vld [vmem:[#allocation10 + $0x398] sm:$0xff] }
 0x2f5   :  { %1469 = vmatpush2.bf16.msra.mxu0 %v7449_v62  ;;  %v1797_v62 = vld [vmem:[#allocation10 + $0x390] sm:$0xff] }
 0x2f6   :  { %1470 = vmatprep.subr.bf16.mxu0 %v7457_v63  ;;  %v1796_v63 = vld [vmem:[#allocation10 + $0x388] sm:$0xff] }
 0x2f9   :  { %1471 = vmatpush2.bf16.msra.mxu0 %v7455_v1  ;;  %v1795_v1 = vld [vmem:[#allocation10 + $0x380] sm:$0xff] }
 0x2fa   :  { %1472 = vmatprep.subr.bf16.mxu0 %v7463_v2  ;;  %v1794_v2 = vld [vmem:[#allocation10 + $0x378] sm:$0xff] }
 0x2fd   :  { %1473 = vmatpush2.bf16.msra.mxu0 %v7461_v3  ;;  %v1793_v3 = vld [vmem:[#allocation10 + $0x370] sm:$0xff] }
 0x2fe   :  { %1474 = vmatprep.subr.bf16.mxu0 %v7469_v4  ;;  %v1792_v4 = vld [vmem:[#allocation10 + $0x368] sm:$0xff] }
 0x301   :  { %1475 = vmatpush2.bf16.msra.mxu0 %v7467_v5  ;;  %v1791_v5 = vld [vmem:[#allocation10 + $0x360] sm:$0xff] }
 0x302   :  { %1476 = vmatprep.subr.bf16.mxu0 %v7472_v6  ;;  %v1790_v6 = vld [vmem:[#allocation10 + $0x358] sm:$0xff] }
 0x305   :  { %1477 = vmatpush2.bf16.msra.mxu0 %v7470_v7  ;;  %v1789_v7 = vld [vmem:[#allocation10 + $0x350] sm:$0xff] }
 0x306   :  { %v8769_v10 = vpop.f32.mrf.mxu1  ;;  %1478 = vmatprep.subr.bf16.mxu0 %v7475_v8  ;;  %v1788_v8 = vld [vmem:[#allocation10 + $0x348] sm:$0xff] }
 0x308   :  { %v8771_v11 = vpop.f32.mrf.mxu1 }
 0x309   :  { %1479 = vmatpush2.bf16.msra.mxu0 %v7473_v9  ;;  %v1787_v9 = vld [vmem:[#allocation10 + $0x340] sm:$0xff] }
 0x30a   :  { %v1219_v12 = vpop.f32.mrf.mxu1  ;;  %1811 = vmatprep.subr.mxu0 %v1778_v14  ;;  %v1784_v14 = vld [vmem:[#allocation10 + $0x328] sm:$0xff] }
 0x30b   :  { %v1786_v12 = vld [vmem:[#allocation10 + $0x338] sm:$0xff] }
 0x30c   :  { %1481 = vmatmul.mubr.bf16.vlgmr.msra.gmra.mxu0 %v8371_v48  ;;  %v1220_v13 = vpop.f32.mrf.mxu1  ;;  %v1770_v48 = vld [vmem:[#allocation10 + $0x2b8] sm:$0xff] }
 0x30d   :  { %1812 = vmatpush1.msra.mxu0 %v1777_v15  ;;  %1893 = vmatprep.subr.mxu1 %v1770_v48  ;;  %v1785_v13 = vld [vmem:[#allocation10 + $0x330] sm:$0xff]  ;;  %v1783_v15 = vld [vmem:[#allocation10 + $0x320] sm:$0xff] }
 0x30e   :  { %1813 = vmatprep.subr.mxu0 %v1776_v16  ;;  %1894 = vmatpush1.msra.mxu1 %v1769_v23  ;;  %v1782_v16 = vld [vmem:[#allocation10 + $0x318] sm:$0xff] }
 0x30f   :  { %1814 = vmatpush1.msra.mxu0 %v1775_v17  ;;  %1895 = vmatprep.subr.mxu1 %v1768_v24  ;;  %v1781_v17 = vld [vmem:[#allocation10 + $0x310] sm:$0xff] }
 0x310   :  { %1815 = vmatprep.subr.mxu0 %v1774_v18  ;;  %1896 = vmatpush1.msra.mxu1 %v1767_v27  ;;  %v1780_v18 = vld [vmem:[#allocation10 + $0x308] sm:$0xff] }
 0x311   :  { %1816 = vmatpush1.msra.mxu0 %v1773_v20  ;;  %1897 = vmatprep.subr.mxu1 %v1766_v28  ;;  %v1779_v20 = vld [vmem:[#allocation10 + $0x300] sm:$0xff] }
 0x312   :  { %1817 = vmatprep.subr.mxu0 %v1772_v21  ;;  %1898 = vmatpush1.msra.mxu1 %v1765_v29 }
 0x313   :  { %1818 = vmatpush1.msra.mxu0 %v1771_v22  ;;  %1899 = vmatprep.subr.mxu1 %v1764_v30 }
 0x314   :  { %1819 = vmatprep.subr.mxu0 %v1770_v48  ;;  %1900 = vmatpush1.msra.mxu1 %v1763_v31 }
 0x315   :  { %1820 = vmatpush1.msra.mxu0 %v1769_v23  ;;  %1901 = vmatprep.subr.mxu1 %v1762_v32 }
 0x316   :  { %1821 = vmatprep.subr.mxu0 %v1768_v24  ;;  %1902 = vmatpush1.msra.mxu1 %v1761_v33 }
 0x317   :  { %1822 = vmatpush1.msra.mxu0 %v1767_v27  ;;  %1903 = vmatprep.subr.mxu1 %v1760_v35 }
 0x318   :  { %1823 = vmatprep.subr.mxu0 %v1766_v28  ;;  %1904 = vmatpush1.msra.mxu1 %v1759_v36 }
 0x319   :  { %1824 = vmatpush1.msra.mxu0 %v1765_v29  ;;  %1905 = vmatprep.subr.mxu1 %v1758_v38 }
 0x31a   :  { %1825 = vmatprep.subr.mxu0 %v1764_v30  ;;  %1906 = vmatpush1.msra.mxu1 %v1757_v39 }
 0x31b   :  { %1826 = vmatpush1.msra.mxu0 %v1763_v31  ;;  %1907 = vmatprep.subr.mxu1 %v1756_v40 }
 0x31c   :  { %1827 = vmatprep.subr.mxu0 %v1762_v32  ;;  %1908 = vmatpush1.msra.mxu1 %v1755_v41 }
 0x31d   :  { %1828 = vmatpush1.msra.mxu0 %v1761_v33  ;;  %1909 = vmatprep.subr.mxu1 %v1754_v42 }
 0x31e   :  { %1829 = vmatprep.subr.mxu0 %v1760_v35  ;;  %1910 = vmatpush1.msra.mxu1 %v1753_v43 }
 0x31f   :  { %1830 = vmatpush1.msra.mxu0 %v1759_v36  ;;  %1911 = vmatprep.subr.mxu1 %v1752_v44 }
 0x320   :  { %1831 = vmatprep.subr.mxu0 %v1758_v38  ;;  %1912 = vmatpush1.msra.mxu1 %v1751_v45 }
 0x321   :  { %1832 = vmatpush1.msra.mxu0 %v1757_v39  ;;  %1913 = vmatprep.subr.mxu1 %v1750_v46 }
 0x322   :  { %1833 = vmatprep.subr.mxu0 %v1756_v40  ;;  %1914 = vmatpush1.msra.mxu1 %v1749_v49 }
 0x323   :  { %1834 = vmatpush1.msra.mxu0 %v1755_v41  ;;  %1915 = vmatprep.subr.mxu1 %v1748_v37 }
 0x324   :  { %1835 = vmatprep.subr.mxu0 %v1754_v42  ;;  %1916 = vmatpush1.msra.mxu1 %v1747_v47 }
 0x325   :  { %1836 = vmatpush1.msra.mxu0 %v1753_v43  ;;  %1917 = vmatprep.subr.mxu1 %v1810_v34 }
 0x326   :  { %1837 = vmatprep.subr.mxu0 %v1752_v44  ;;  %1918 = vmatpush2.msra.mxu1 %v1809_v50 }
 0x327   :  { %1838 = vmatpush1.msra.mxu0 %v1751_v45  ;;  %1919 = vmatprep.subr.mxu1 %v1808_v51 }
 0x328   :  { %1839 = vmatprep.subr.mxu0 %v1750_v46  ;;  %1920 = vmatpush2.msra.mxu1 %v1807_v52 }
 0x329   :  { %1840 = vmatpush1.msra.mxu0 %v1749_v49  ;;  %1921 = vmatprep.subr.mxu1 %v1806_v53 }
 0x32a   :  { %1841 = vmatprep.subr.mxu0 %v1748_v37  ;;  %1922 = vmatpush2.msra.mxu1 %v1805_v54 }
 0x32b   :  { %1842 = vmatpush1.msra.mxu0 %v1747_v47  ;;  %1923 = vmatprep.subr.mxu1 %v1804_v55 }
 0x32c   :  { %1843 = vmatprep.subr.mxu0 %v1810_v34  ;;  %1924 = vmatpush2.msra.mxu1 %v1803_v56 }
 0x32d   :  { %1844 = vmatpush2.msra.mxu0 %v1809_v50  ;;  %1925 = vmatprep.subr.mxu1 %v1802_v57 }
 0x32e   :  { %1845 = vmatprep.subr.mxu0 %v1808_v51  ;;  %1926 = vmatpush2.msra.mxu1 %v1801_v58 }
 0x32f   :  { %1846 = vmatpush2.msra.mxu0 %v1807_v52  ;;  %1927 = vmatprep.subr.mxu1 %v1800_v59 }
 0x330   :  { %1847 = vmatprep.subr.mxu0 %v1806_v53  ;;  %1928 = vmatpush2.msra.mxu1 %v1799_v60 }
 0x331   :  { %1848 = vmatpush2.msra.mxu0 %v1805_v54  ;;  %1929 = vmatprep.subr.mxu1 %v1798_v61 }
 0x332   :  { %1849 = vmatprep.subr.mxu0 %v1804_v55  ;;  %1930 = vmatpush2.msra.mxu1 %v1797_v62 }
 0x333   :  { %1850 = vmatpush2.msra.mxu0 %v1803_v56  ;;  %1931 = vmatprep.subr.mxu1 %v1796_v63 }
 0x334   :  { %1851 = vmatprep.subr.mxu0 %v1802_v57  ;;  %1932 = vmatpush2.msra.mxu1 %v1795_v1 }
 0x335   :  { %1852 = vmatpush2.msra.mxu0 %v1801_v58  ;;  %1933 = vmatprep.subr.mxu1 %v1794_v2 }
 0x336   :  { %1853 = vmatprep.subr.mxu0 %v1800_v59  ;;  %1934 = vmatpush2.msra.mxu1 %v1793_v3 }
 0x337   :  { %1854 = vmatpush2.msra.mxu0 %v1799_v60  ;;  %1935 = vmatprep.subr.mxu1 %v1792_v4 }
 0x338   :  { %1855 = vmatprep.subr.mxu0 %v1798_v61  ;;  %1936 = vmatpush2.msra.mxu1 %v1791_v5 }
 0x339   :  { %1856 = vmatpush2.msra.mxu0 %v1797_v62  ;;  %1937 = vmatprep.subr.mxu1 %v1790_v6 }
 0x33a   :  { %1857 = vmatprep.subr.mxu0 %v1796_v63  ;;  %1938 = vmatpush2.msra.mxu1 %v1789_v7 }
 0x33b   :  { %1858 = vmatpush2.msra.mxu0 %v1795_v1  ;;  %1939 = vmatprep.subr.mxu1 %v1788_v8 }
 0x33c   :  { %1859 = vmatprep.subr.mxu0 %v1794_v2  ;;  %1940 = vmatpush2.msra.mxu1 %v1787_v9 }
 0x33d   :  { %1860 = vmatpush2.msra.mxu0 %v1793_v3  ;;  %1941 = vmatprep.subr.mxu1 %v1786_v12 }
 0x33e   :  { %1861 = vmatprep.subr.mxu0 %v1792_v4  ;;  %1942 = vmatpush2.msra.mxu1 %v1785_v13 }
 0x33f   :  { %1862 = vmatpush2.msra.mxu0 %v1791_v5  ;;  %1943 = vmatprep.subr.mxu1 %v1784_v14 }
 0x340   :  { %1863 = vmatprep.subr.mxu0 %v1790_v6  ;;  %1944 = vmatpush2.msra.mxu1 %v1783_v15 }
 0x341   :  { %1864 = vmatpush2.msra.mxu0 %v1789_v7  ;;  %1945 = vmatprep.subr.mxu1 %v1782_v16 }
 0x342   :  { %1865 = vmatprep.subr.mxu0 %v1788_v8  ;;  %1946 = vmatpush2.msra.mxu1 %v1781_v17 }
 0x343   :  { %1866 = vmatpush2.msra.mxu0 %v1787_v9  ;;  %1947 = vmatprep.subr.mxu1 %v1780_v18 }
 0x344   :  { %1867 = vmatprep.subr.mxu0 %v1786_v12  ;;  %1948 = vmatpush2.msra.mxu1 %v1779_v20 }
 0x345   :  { %1868 = vmatpush2.msra.mxu0 %v1785_v13 }
 0x346   :  { %1869 = vmatprep.subr.mxu0 %v1784_v14 }
 0x347   :  { %1870 = vmatpush2.msra.mxu0 %v1783_v15 }
 0x348   :  { %1871 = vmatprep.subr.mxu0 %v1782_v16 }
 0x349   :  { %1872 = vmatpush2.msra.mxu0 %v1781_v17 }
 0x34a   :  { %1873 = vmatprep.subr.mxu0 %v1780_v18 }
 0x34b   :  { %1874 = vmatpush2.msra.mxu0 %v1779_v20 }
 0x38c   :  { %v1014_v21 = vpop.f32.mrf.mxu0  ;;  %v1683_v22 = vpop.f32.mrf.mxu1 }
 0x38d   :  { %v8778_v31 = vadd.f32 %v8769_v10, %v1014_v21 }
 0x38e   :  { %v1016_v48 = vpop.f32.mrf.mxu0  ;;  %v1685_v23 = vpop.f32.mrf.mxu1 }
 0x38f   :  { %v8775_v30 = vadd.f32 %v8771_v11, %v1016_v48  ;;  %v1702_v33 = vmul.f32 %v8778_v31, %v8778_v31  ;;  %v1690_v36 = vrot.slane %v8778_v31, 4 }
 0x390   :  { %v1018_v24 = vpop.f32.mrf.mxu0  ;;  %v1687_v27 = vpop.f32.mrf.mxu1 }
 0x391   :  { %v1703_v32 = vmul.f32 %v8775_v30, %v8775_v30  ;;  %v1696_v35 = vrot.slane %v8775_v30, 4  ;;  %v1704_v39 = vrot.slane %v1702_v33, 4  ;;  %v1691_v11 = vadd.f32 %v1690_v36, %v8778_v31 }
 0x392   :  { %v1019_v28 = vpop.f32.mrf.mxu0  ;;  %v1688_v29 = vpop.f32.mrf.mxu1 }
 0x393   :  { %v1710_v38 = vrot.slane %v1703_v32, 4  ;;  %v1697_v40 = vadd.f32 %v1696_v35, %v8775_v30  ;;  %v1705_v43 = vadd.f32 %v1704_v39, %v1702_v33  ;;  %v1692_v47 = vrot.slane %v1691_v11, 2 }
 0x395   :  { %v1711_v42 = vadd.f32 %v1710_v38, %v1703_v32  ;;  %v1698_v45 = vrot.slane %v1697_v40, 2  ;;  %v1706_v55 = vrot.slane %v1705_v43, 2  ;;  %v1693_v62 = vadd.f32 %v1692_v47, %v1691_v11 }
 0x397   :  { %v1712_v50 = vrot.slane %v1711_v42, 2  ;;  %v1699_v57 = vadd.f32 %v1698_v45, %v1697_v40  ;;  %v1707_v6 = vadd.f32 %v1706_v55, %v1705_v43  ;;  %v1694_v13 = vrot.slane %v1693_v62, 1  ;;  %v6735_v55 = vld [vmem:[%s9651_s11 + $0x2] sm:$0x3] }
 0x399   :  { %v1713_v63 = vadd.f32 %v1712_v50, %v1711_v42  ;;  %v1700_v5 = vrot.slane %v1699_v57, 1  ;;  %v1708_v20 = vrot.slane %v1707_v6, 1 }
 0x39b   :  { %v1714_v15 = vrot.slane %v1713_v63, 1  ;;  %v1701_v21 = vadd.f32 %v1700_v5, %v1699_v57  ;;  %v1709_v33 = vadd.f32 %v1708_v20, %v1707_v6 }
 0x39d   :  { %v1715_v28 = vadd.f32 %v1714_v15, %v1713_v63 }
 0x3cc   :  { %v1482_v41 = vpop.f32.mrf.mxu0 }
 0x3cd   :  { %v8788_v10 = vadd.f32 %v1683_v22, %v1482_v41 }
 0x3ce   :  { %v1484_v44 = vpop.f32.mrf.mxu0 }
 0x3cf   :  { %v1716_v46 = vrot.slane %v8788_v10, 4  ;;  %v1730_v49 = vmul.f32 %v8788_v10, %v8788_v10  ;;  %v8793_v37 = vadd.f32 %v1685_v23, %v1484_v44  ;;  %v1695_v23 = vadd.f32 %v1694_v13, %v1693_v62 }
 0x3d0   :  { %v1486_v34 = vpop.f32.mrf.mxu0 }
 0x3d1   :  { %v1717_v51 = vadd.f32 %v1716_v46, %v8788_v10  ;;  %v1732_v52 = vrot.slane %v1730_v49, 4  ;;  %v1722_v53 = vrot.slane %v8793_v37, 4  ;;  %v1731_v54 = vmul.f32 %v8793_v37, %v8793_v37 }
 0x3d2   :  { %v1487_v56 = vpop.f32.mrf.mxu0 }
 0x3d3   :  { %v1718_v58 = vrot.slane %v1717_v51, 2  ;;  %v1733_v59 = vadd.f32 %v1732_v52, %v1730_v49  ;;  %v1723_v60 = vadd.f32 %v1722_v53, %v8793_v37  ;;  %v1738_v61 = vrot.slane %v1731_v54, 4 }
 0x3d5   :  { %v1719_v1 = vadd.f32 %v1718_v58, %v1717_v51  ;;  %v1734_v2 = vrot.slane %v1733_v59, 2  ;;  %v1724_v3 = vrot.slane %v1723_v60, 2  ;;  %v1739_v4 = vadd.f32 %v1738_v61, %v1731_v54 }
 0x3d7   :  { %v1725_v7 = vadd.f32 %v1724_v3, %v1723_v60  ;;  %v1720_v8 = vrot.slane %v1719_v1, 1  ;;  %v1740_v9 = vrot.slane %v1739_v4, 2  ;;  %v1735_v12 = vadd.f32 %v1734_v2, %v1733_v59 }
 0x3d9   :  { %v1726_v14 = vrot.slane %v1725_v7, 1  ;;  %v1741_v16 = vadd.f32 %v1740_v9, %v1739_v4  ;;  %v1736_v17 = vrot.slane %v1735_v12, 1  ;;  %v1721_v18 = vadd.f32 %v1720_v8, %v1719_v1  ;;  %v6736_v1 = vld [vmem:[%s9652_s12 + $0x2] sm:$0x3] }
 0x3db   :  { %v1727_v22 = vadd.f32 %v1726_v14, %v1725_v7  ;;  %v1742_v48 = vrot.slane %v1741_v16, 1  ;;  %v1737_v24 = vadd.f32 %v1736_v17, %v1735_v12  ;;  %v1728_v32 = vadd.f32 %v1721_v18, %v1695_v23  ;;  %v7483_v23 = vld [vmem:[#allocation6 + $0x64] ss:$8 sps:$4 sm:$0xff]  }
 0x3dd   :  { %v1729_v27 = vadd.f32 %v1727_v22, %v1701_v21  ;;  %v1743_v29 = vadd.f32 %v1742_v48, %v1741_v16  ;;  %v1744_v36 = vadd.f32 %v1737_v24, %v1709_v33  ;;  %v7528_v22 = vld [vmem:[#allocation6 + $0x174] ss:$8 sps:$4 sm:$0xff]   ;;  %v7478_v48 = vld [vmem:[#allocation6 + $0x70] ss:$8 sps:$4 sm:$0xff]  }
 0x3de   :  { %v7526_v24 = vld [vmem:[#allocation6 + $0x170] ss:$8 sps:$4 sm:$0xff]   ;;  %v7534_v33 = vld [vmem:[#allocation6 + $0x154] ss:$8 sps:$4 sm:$0xff]  }
 0x3df   :  { %1875 = vmatprep.mubr.f32.mxu0 %v1729_v27  ;;  %v1745_v35 = vadd.f32 %v1743_v29, %v1715_v28  ;;  %v7531_v27 = vld [vmem:[#allocation6 + $0x164] ss:$8 sps:$4 sm:$0xff]   ;;  %v7481_v28 = vld [vmem:[#allocation6 + $0x60] ss:$8 sps:$4 sm:$0xff]   ;;  %v7486_v29 = vld [vmem:[#allocation6 + $0x54] ss:$8 sps:$4 sm:$0xff]  }
 0x3e0   :  { %1876 = vmatmul.mubr.f32.vlgmr.msra.gmra.mxu0 %v1728_v32  ;;  %v7529_v32 = vld [vmem:[#allocation6 + $0x160] ss:$8 sps:$4 sm:$0xff]  }
 0x3e1   :  { %1949 = vmatprep.mubr.f32.mxu1 %v1745_v35  ;;  %2096 = vmatprep.mubr.bf16.mxu0 %v8217_v0  ;;  %v7484_v35 = vld [vmem:[#allocation6 + $0x50] ss:$8 sps:$4 sm:$0xff]  }
 0x3e2   :  { %1950 = vmatmul.mubr.f32.vlgmr.msra.gmra.mxu1 %v1744_v36  ;;  %v7489_v36 = vld [vmem:[#allocation6 + $0x44] ss:$8 sps:$4 sm:$0xff]  }
 0x3e3   :  { %2152 = vmatprep.mubr.bf16.mxu1 %v8217_v0 }
 0x4a0   :  { %v1877_v38 = vpop.f32.mrf.mxu0 }
 0x4a1   :  { %v1883_v39 = vmul.f32 0.0078125, %v1877_v38  ;;  %v7532_v38 = vld [vmem:[#allocation6 + $0x150] ss:$8 sps:$4 sm:$0xff]  }
 0x4a2   :  { %v1879_v40 = vpop.f32.mrf.mxu0  ;;  %v1951_v11 = vpop.f32.mrf.mxu1 }
 0x4a3   :  { %v1958_v41 = vmul.f32 %v1883_v39, %v1883_v39  ;;  %v1884_v42 = vmul.f32 0.0078125, %v1879_v40  ;;  %v1956_v43 = vmul.f32 0.0078125, %v1951_v11  ;;  %v7487_v40 = vld [vmem:[#allocation6 + $0x40] ss:$8 sps:$4 sm:$0xff]   ;;  %v7492_v11 = vld [vmem:[#allocation6 + $0x34] ss:$8 sps:$4 sm:$0xff]  }
 0x4a4   :  { %v1953_v44 = vpop.f32.mrf.mxu1 }
 0x4a5   :  { %v1959_v45 = vmul.f32 %v1884_v42, %v1884_v42  ;;  %v1960_v46 = vsub.f32 %v1956_v43, %v1958_v41  ;;  %v1957_v49 = vmul.f32 0.0078125, %v1953_v44  ;;  %v7535_v41 = vld [vmem:[#allocation6 + $0x140] ss:$8 sps:$4 sm:$0xff]   ;;  %v7490_v43 = vld [vmem:[#allocation6 + $0x30] ss:$8 sps:$4 sm:$0xff]  }
 0x4a6   :  { %v7495_v44 = vld [vmem:[#allocation6 + $0x24] ss:$8 sps:$4 sm:$0xff]  }
 0x4a7   :  { %v1962_v47 = vadd.f32 1e-05, %v1960_v46  ;;  %v1961_v34 = vsub.f32 %v1957_v49, %v1959_v45  ;;  %v7538_v45 = vld [vmem:[#allocation6 + $0x130] ss:$8 sps:$4 sm:$0xff]   ;;  %v7543_v46 = vld [vmem:[#allocation6 + $0x124] ss:$8 sps:$4 sm:$0xff]  }
 0x4a8   :  { %v7493_v49 = vld [vmem:[#allocation6 + $0x20] ss:$8 sps:$4 sm:$0xff]  }
 0x4a9   :  { %v1963_v50 = vadd.f32 1e-05, %v1961_v34  ;;  %8070 = vrsqrt.f32 %v1962_v47  ;;  %v7498_v47 = vld [vmem:[#allocation6 + $0x14] ss:$8 sps:$4 sm:$0xff]   ;;  %v7541_v34 = vld [vmem:[#allocation6 + $0x120] ss:$8 sps:$4 sm:$0xff]  }
 0x4ab   :  { %8072 = vrsqrt.f32 %v1963_v50  ;;  %v7546_v50 = vld [vmem:[#allocation6 + $0x114] ss:$8 sps:$4 sm:$0xff]  }
 0x4b6   :  { %v8071_v51 = vpop.eup %8070 }
 0x4b8   :  { %v8073_v52 = vpop.eup %8072 }
 0x4b9   :  { %v1970_v53 = vcombine.low %v8071_v51, %v8073_v52  ;;  %v7496_v51 = vld [vmem:[#allocation6 + $0x10] ss:$8 sps:$4 sm:$0xff]   ;;  %v7501_v52 = vld [vmem:[#allocation6 + $0x4] ss:$8 sps:$4 sm:$0xff]  }
 0x4bb   :  { %v1977_v54 = vrot.slane %v1970_v53, %v8347_v19  ;;  %v7544_v53 = vld [vmem:[#allocation6 + $0x110] ss:$8 sps:$4 sm:$0xff]  }
 0x4bd   :  { %v1984_v56 = vrot.slane %v1977_v54, %v8347_v19  ;;  %v7549_v54 = vld [vmem:[#allocation6 + $0x104] ss:$8 sps:$4 sm:$0xff]  }
 0x4bf   :  { %v1986_v57 = vmul.f32 %v6735_v55, %v1984_v56  ;;  %v7499_v55 = vld [vmem:[#allocation6] ss:$8 sps:$4 sm:$0xff]   ;;  %v7504_v56 = vld [vmem:[#allocation6 + $0xf4] ss:$8 sps:$4 sm:$0xff]  }
 0x4c1   :  { %v1993_v58 = vrot.slane %v1986_v57, %v8354_v25  ;;  %v1997_v59 = vrot.slane %v1986_v57, %v8356_v26  ;;  %v7547_v57 = vld [vmem:[#allocation6 + $0x100] ss:$8 sps:$4 sm:$0xff]  }
 0x4c3   :  { %v2000_v60 = vmul.f32 %v1993_v58, %v1883_v39  ;;  %v2001_v61 = vmul.f32 %v1997_v59, %v1884_v42  ;;  %v2022_v4 = vmul.f32 %v1997_v59, %v8775_v30  ;;  %v2039_v5 = vmul.f32 %v1997_v59, %v8793_v37  ;;  %v7480_v37 = vld [vmem:[#allocation6 + $0x74] ss:$8 sps:$4 sm:$0xff]   ;;  %v7537_v39 = vld [vmem:[#allocation6 + $0x144] ss:$8 sps:$4 sm:$0xff]   ;;  %v7502_v59 = vld [vmem:[#allocation6 + $0xf0] ss:$8 sps:$4 sm:$0xff]  }
 0x4c4   :  { %v2021_v7 = vmul.f32 %v1993_v58, %v8778_v31  ;;  %v2038_v9 = vmul.f32 %v1993_v58, %v8788_v10  ;;  %v7476_v31 = vld [vmem:[%s9647_s7] sm:$0xff]   ;;  %v7477_v10 = vld [vmem:[%s9647_s7 + $0x8] sm:$0xff]  }
 0x4c5   :  { %v2004_v62 = vcombine.low %v2000_v60, %v2001_v61  ;;  %v7540_v42 = vld [vmem:[#allocation6 + $0x134] ss:$8 sps:$4 sm:$0xff]   ;;  %v7507_v60 = vld [vmem:[#allocation6 + $0xe4] ss:$8 sps:$4 sm:$0xff]   ;;  %v7550_v61 = vld [vmem:[#allocation6 + $0x1f0] ss:$8 sps:$4 sm:$0xff]  }
 0x4c6   :  { %v7552_v58 = vld [vmem:[#allocation6 + $0x1f4] ss:$8 sps:$4 sm:$0xff]  }
 0x4c7   :  { %v2011_v63 = vrot.slane %v2004_v62, %v8347_v19  ;;  %v7555_v62 = vld [vmem:[#allocation6 + $0x1e4] ss:$8 sps:$4 sm:$0xff]  }
 0x4c9   :  { %v2018_v2 = vrot.slane %v2011_v63, %v8347_v19  ;;  %v7505_v63 = vld [vmem:[#allocation6 + $0xe0] ss:$8 sps:$4 sm:$0xff]  }
 0x4cb   :  { %v2020_v3 = vsub.f32 %v6736_v1, %v2018_v2  ;;  %v7510_v1 = vld [vmem:[#allocation6 + $0xd4] ss:$8 sps:$4 sm:$0xff]   ;;  %v7553_v2 = vld [vmem:[#allocation6 + $0x1e0] ss:$8 sps:$4 sm:$0xff]  }
 0x4cd   :  { %v2031_v6 = vrot.slane %v2020_v3, %v8356_v26  ;;  %v2027_v8 = vrot.slane %v2020_v3, %v8354_v25  ;;  %v7558_v3 = vld [vmem:[#allocation6 + $0x1d4] ss:$8 sps:$4 sm:$0xff]  }
 0x4cf   :  { %v2035_v12 = vadd.f32 %v2031_v6, %v2022_v4  ;;  %v2041_v13 = vadd.f32 %v2039_v5, %v2031_v6  ;;  %v2034_v14 = vadd.f32 %v2027_v8, %v2021_v7  ;;  %v2040_v15 = vadd.f32 %v2038_v9, %v2027_v8  ;;  %v7508_v4 = vld [vmem:[#allocation6 + $0xd0] ss:$8 sps:$4 sm:$0xff]   ;;  %v7513_v5 = vld [vmem:[#allocation6 + $0xc4] ss:$8 sps:$4 sm:$0xff]   ;;  %v7511_v8 = vld [vmem:[#allocation6 + $0xc0] ss:$8 sps:$4 sm:$0xff]  }
 0x4d0   :  { %v7556_v6 = vld [vmem:[#allocation6 + $0x1d0] ss:$8 sps:$4 sm:$0xff]   ;;  %v7561_v7 = vld [vmem:[#allocation6 + $0x1c4] ss:$8 sps:$4 sm:$0xff]   ;;  %v7516_v9 = vld [vmem:[#allocation6 + $0xb4] ss:$8 sps:$4 sm:$0xff]  }
 0x4d1   :  { %v2037_v16 = vmax.f32 %v2035_v12, 0.0  ;;  %v2043_v17 = vmax.f32 %v2041_v13, 0.0  ;;  %v2036_v18 = vmax.f32 %v2034_v14, 0.0  ;;  %v2042_v20 = vmax.f32 %v2040_v15, 0.0  ;;  %v7559_v12 = vld [vmem:[#allocation6 + $0x1c0] ss:$8 sps:$4 sm:$0xff]  }
 0x4d2   :  { %v7564_v13 = vld [vmem:[#allocation6 + $0x1b4] ss:$8 sps:$4 sm:$0xff]   ;;  %v7514_v14 = vld [vmem:[#allocation6 + $0xb0] ss:$8 sps:$4 sm:$0xff]   ;;  %v7519_v15 = vld [vmem:[#allocation6 + $0xa4] ss:$8 sps:$4 sm:$0xff]  }
 0x4d3   :  { %v8820_v21 = vpack.c.bf16 %v2043_v17, %v2037_v16  ;;  %v8822_v30 = vpack.c.bf16 %v2042_v20, %v2036_v18  ;;  %v7562_v16 = vld [vmem:[#allocation6 + $0x1b0] ss:$8 sps:$4 sm:$0xff]   ;;  %v7567_v17 = vld [vmem:[#allocation6 + $0x1a4] ss:$8 sps:$4 sm:$0xff]   ;;  %v7517_v18 = vld [vmem:[#allocation6 + $0xa0] ss:$8 sps:$4 sm:$0xff]  }
 0x4d4   :  { %v7522_v20 = vld [vmem:[#allocation6 + $0x94] ss:$8 sps:$4 sm:$0xff]  }
 0x4d5   :  { %2078 = vmatprep.subr.bf16.mxu0 %v8820_v21  ;;  %2134 = vmatprep.subr.bf16.mxu1 %v8820_v21 }
 0x4d6   :  { %2079 = vmatpush1.bf16.msra.mxu0 %v8822_v30  ;;  %2135 = vmatpush1.bf16.msra.mxu1 %v8822_v30 }
 0x4d7   :  { %2593 = vmatprep.subr.bf16.mxu1 %v7480_v37  ;;  %2390 = vmatprep.subr.bf16.mxu0 %v7528_v22  ;;  %v7565_v37 = vld [vmem:[#allocation6 + $0x1a0] ss:$8 sps:$4 sm:$0xff]   ;;  %v7520_v22 = vld [vmem:[#allocation6 + $0x90] ss:$8 sps:$4 sm:$0xff]  }
 0x4d9   :  { %6738 = vmatmul.mubr.msk.bf16.vlgmr.msra.gmra.mxu0 %vm100_vm0, %v7476_v31  ;;  %6742 = vmatmul.mubr.msk.bf16.vlgmr.msra.gmra.mxu1 %vm100_vm0, %v7477_v10  ;;  %v7525_v31 = vld [vmem:[#allocation6 + $0x84] ss:$8 sps:$4 sm:$0xff]   ;;  %v7523_v10 = vld [vmem:[#allocation6 + $0x80] ss:$8 sps:$4 sm:$0xff]  }
 0x4da   :  { %2594 = vmatpush1.bf16.msra.mxu1 %v7478_v48  ;;  %2625 = vmatprep.mubr.bf16.mxu1 %v8820_v21  ;;  %v7570_v48 = vld [vmem:[#allocation6 + $0x274] ss:$8 sps:$4 sm:$0xff]  }
 0x4db   :  { %2595 = vmatprep.subr.bf16.mxu1 %v7483_v23  ;;  %2391 = vmatpush1.bf16.msra.mxu0 %v7526_v24  ;;  %v7568_v23 = vld [vmem:[#allocation6 + $0x270] ss:$8 sps:$4 sm:$0xff]   ;;  %v7576_v24 = vld [vmem:[#allocation6 + $0x264] ss:$8 sps:$4 sm:$0xff]  }
 0x4dc   :  { %2392 = vmatprep.subr.bf16.mxu0 %v7531_v27  ;;  %v7571_v27 = vld [vmem:[#allocation6 + $0x190] ss:$8 sps:$4 sm:$0xff]  }
 0x4de   :  { %2596 = vmatpush1.bf16.msra.mxu1 %v7481_v28  ;;  %v7573_v28 = vld [vmem:[#allocation6 + $0x194] ss:$8 sps:$4 sm:$0xff]  }
 0x4df   :  { %2597 = vmatprep.subr.bf16.mxu1 %v7486_v29  ;;  %2393 = vmatpush1.bf16.msra.mxu0 %v7529_v32  ;;  %v7574_v29 = vld [vmem:[#allocation6 + $0x260] ss:$8 sps:$4 sm:$0xff]   ;;  %v7582_v32 = vld [vmem:[#allocation6 + $0x254] ss:$8 sps:$4 sm:$0xff]  }
 0x4e0   :  { %2394 = vmatprep.subr.bf16.mxu0 %v7534_v33  ;;  %v7579_v33 = vld [vmem:[#allocation6 + $0x184] ss:$8 sps:$4 sm:$0xff]  }
 0x4e2   :  { %2598 = vmatpush1.bf16.msra.mxu1 %v7484_v35  ;;  %v7577_v35 = vld [vmem:[#allocation6 + $0x180] ss:$8 sps:$4 sm:$0xff]  }
 0x4e3   :  { %2599 = vmatprep.subr.bf16.mxu1 %v7489_v36  ;;  %2395 = vmatpush1.bf16.msra.mxu0 %v7532_v38  ;;  %v7580_v36 = vld [vmem:[#allocation6 + $0x250] ss:$8 sps:$4 sm:$0xff]   ;;  %v7588_v38 = vld [vmem:[#allocation6 + $0x244] ss:$8 sps:$4 sm:$0xff]  }
 0x4e4   :  { %2396 = vmatprep.subr.bf16.mxu0 %v7537_v39  ;;  %v7585_v39 = vld [vmem:[#allocation6 + $0x374] ss:$8 sps:$4 sm:$0xff]  }
 0x4e6   :  { %2600 = vmatpush1.bf16.msra.mxu1 %v7487_v40  ;;  %v7586_v40 = vld [vmem:[#allocation6 + $0x240] ss:$8 sps:$4 sm:$0xff]  }
 0x4e7   :  { %2601 = vmatprep.subr.bf16.mxu1 %v7492_v11  ;;  %2397 = vmatpush1.bf16.msra.mxu0 %v7535_v41  ;;  %v7594_v11 = vld [vmem:[#allocation6 + $0x234] ss:$8 sps:$4 sm:$0xff]   ;;  %v7592_v41 = vld [vmem:[#allocation6 + $0x230] ss:$8 sps:$4 sm:$0xff]  }
 0x4e8   :  { %2398 = vmatprep.subr.bf16.mxu0 %v7540_v42  ;;  %v7600_v42 = vld [vmem:[#allocation6 + $0x224] ss:$8 sps:$4 sm:$0xff]  }
 0x4ea   :  { %2602 = vmatpush1.bf16.msra.mxu1 %v7490_v43  ;;  %v7598_v43 = vld [vmem:[#allocation6 + $0x220] ss:$8 sps:$4 sm:$0xff]  }
 0x4eb   :  { %2603 = vmatprep.subr.bf16.mxu1 %v7495_v44  ;;  %2399 = vmatpush1.bf16.msra.mxu0 %v7538_v45  ;;  %v7606_v44 = vld [vmem:[#allocation6 + $0x214] ss:$8 sps:$4 sm:$0xff]   ;;  %v7604_v45 = vld [vmem:[#allocation6 + $0x210] ss:$8 sps:$4 sm:$0xff]  }
 0x4ec   :  { %2400 = vmatprep.subr.bf16.mxu0 %v7543_v46  ;;  %v7612_v46 = vld [vmem:[#allocation6 + $0x204] ss:$8 sps:$4 sm:$0xff]  }
 0x4ee   :  { %2604 = vmatpush1.bf16.msra.mxu1 %v7493_v49  ;;  %v7610_v49 = vld [vmem:[#allocation6 + $0x200] ss:$8 sps:$4 sm:$0xff]  }
 0x4ef   :  { %2605 = vmatprep.subr.bf16.mxu1 %v7498_v47  ;;  %2401 = vmatpush1.bf16.msra.mxu0 %v7541_v34  ;;  %v7618_v47 = vld [vmem:[#allocation6 + $0x2f4] ss:$8 sps:$4 sm:$0xff]   ;;  %v7616_v34 = vld [vmem:[#allocation6 + $0x2f0] ss:$8 sps:$4 sm:$0xff]  }
 0x4f0   :  { %2402 = vmatprep.subr.bf16.mxu0 %v7546_v50  ;;  %v7624_v50 = vld [vmem:[#allocation6 + $0x2e4] ss:$8 sps:$4 sm:$0xff]  }
 0x4f2   :  { %2606 = vmatpush1.bf16.msra.mxu1 %v7496_v51  ;;  %v7622_v51 = vld [vmem:[#allocation6 + $0x2e0] ss:$8 sps:$4 sm:$0xff]  }
 0x4f3   :  { %2607 = vmatprep.subr.bf16.mxu1 %v7501_v52  ;;  %2403 = vmatpush1.bf16.msra.mxu0 %v7544_v53  ;;  %v7630_v52 = vld [vmem:[#allocation6 + $0x2d4] ss:$8 sps:$4 sm:$0xff]   ;;  %v7628_v53 = vld [vmem:[#allocation6 + $0x2d0] ss:$8 sps:$4 sm:$0xff]  }
 0x4f4   :  { %2404 = vmatprep.subr.bf16.mxu0 %v7549_v54  ;;  %v7636_v54 = vld [vmem:[#allocation6 + $0x2c4] ss:$8 sps:$4 sm:$0xff]  }
 0x4f6   :  { %2608 = vmatpush1.bf16.msra.mxu1 %v7499_v55  ;;  %v7634_v55 = vld [vmem:[#allocation6 + $0x2c0] ss:$8 sps:$4 sm:$0xff]  }
 0x4f7   :  { %2609 = vmatprep.subr.bf16.mxu1 %v7504_v56  ;;  %2405 = vmatpush1.bf16.msra.mxu0 %v7547_v57  ;;  %v7642_v56 = vld [vmem:[#allocation6 + $0x2b4] ss:$8 sps:$4 sm:$0xff]   ;;  %v7640_v57 = vld [vmem:[#allocation6 + $0x2b0] ss:$8 sps:$4 sm:$0xff]  }
 0x4f8   :  { %2406 = vmatprep.subr.bf16.mxu0 %v7552_v58  ;;  %v7648_v58 = vld [vmem:[#allocation6 + $0x2a4] ss:$8 sps:$4 sm:$0xff]  }
 0x4fa   :  { %2610 = vmatpush2.bf16.msra.mxu1 %v7502_v59  ;;  %v7646_v59 = vld [vmem:[#allocation6 + $0x2a0] ss:$8 sps:$4 sm:$0xff]  }
 0x4fb   :  { %2611 = vmatprep.subr.bf16.mxu1 %v7507_v60  ;;  %2407 = vmatpush2.bf16.msra.mxu0 %v7550_v61  ;;  %v7654_v60 = vld [vmem:[#allocation6 + $0x294] ss:$8 sps:$4 sm:$0xff]   ;;  %v7652_v61 = vld [vmem:[#allocation6 + $0x290] ss:$8 sps:$4 sm:$0xff]  }
 0x4fc   :  { %2408 = vmatprep.subr.bf16.mxu0 %v7555_v62  ;;  %v7660_v62 = vld [vmem:[#allocation6 + $0x284] ss:$8 sps:$4 sm:$0xff]  }
 0x4fe   :  { %2612 = vmatpush2.bf16.msra.mxu1 %v7505_v63  ;;  %v7658_v63 = vld [vmem:[#allocation6 + $0x280] ss:$8 sps:$4 sm:$0xff]  }
 0x4ff   :  { %2613 = vmatprep.subr.bf16.mxu1 %v7510_v1  ;;  %2409 = vmatpush2.bf16.msra.mxu0 %v7553_v2 }
 0x500   :  { %2410 = vmatprep.subr.bf16.mxu0 %v7558_v3 }
 0x502   :  { %2614 = vmatpush2.bf16.msra.mxu1 %v7508_v4 }
 0x503   :  { %2615 = vmatprep.subr.bf16.mxu1 %v7513_v5  ;;  %2411 = vmatpush2.bf16.msra.mxu0 %v7556_v6 }
 0x504   :  { %2412 = vmatprep.subr.bf16.mxu0 %v7561_v7 }
 0x506   :  { %2616 = vmatpush2.bf16.msra.mxu1 %v7511_v8 }
 0x507   :  { %2617 = vmatprep.subr.bf16.mxu1 %v7516_v9  ;;  %2413 = vmatpush2.bf16.msra.mxu0 %v7559_v12 }
 0x508   :  { %2414 = vmatprep.subr.bf16.mxu0 %v7564_v13  ;;  %v7583_v13 = vld [vmem:[#allocation6 + $0x370] ss:$8 sps:$4 sm:$0xff]  }
 0x50a   :  { %2618 = vmatpush2.bf16.msra.mxu1 %v7514_v14 }
 0x50b   :  { %2619 = vmatprep.subr.bf16.mxu1 %v7519_v15  ;;  %2415 = vmatpush2.bf16.msra.mxu0 %v7562_v16  ;;  %v7591_v16 = vld [vmem:[#allocation6 + $0x364] ss:$8 sps:$4 sm:$0xff]  }
 0x50c   :  { %2416 = vmatprep.subr.bf16.mxu0 %v7567_v17  ;;  %v7589_v17 = vld [vmem:[#allocation6 + $0x360] ss:$8 sps:$4 sm:$0xff]  }
 0x50e   :  { %2620 = vmatpush2.bf16.msra.mxu1 %v7517_v18  ;;  %v7597_v18 = vld [vmem:[#allocation6 + $0x354] ss:$8 sps:$4 sm:$0xff]  }
 0x50f   :  { %2621 = vmatprep.subr.bf16.mxu1 %v7522_v20  ;;  %2417 = vmatpush2.bf16.msra.mxu0 %v7565_v37  ;;  %v7595_v20 = vld [vmem:[#allocation6 + $0x350] ss:$8 sps:$4 sm:$0xff]   ;;  %v7603_v37 = vld [vmem:[#allocation6 + $0x344] ss:$8 sps:$4 sm:$0xff]  }
 0x510   :  { %2418 = vmatprep.subr.bf16.mxu0 %v7573_v28  ;;  %v7625_v28 = vld [vmem:[#allocation6 + $0x300] ss:$8 sps:$4 sm:$0xff]  }
 0x512   :  { %2622 = vmatpush2.bf16.msra.mxu1 %v7520_v22  ;;  %v7601_v22 = vld [vmem:[#allocation6 + $0x340] ss:$8 sps:$4 sm:$0xff]  }
 0x513   :  { %2623 = vmatprep.subr.bf16.mxu1 %v7525_v31  ;;  %2419 = vmatpush2.bf16.msra.mxu0 %v7571_v27  ;;  %v7609_v31 = vld [vmem:[#allocation6 + $0x334] ss:$8 sps:$4 sm:$0xff]   ;;  %v7627_v27 = vld [vmem:[#allocation6 + $0x304] ss:$8 sps:$4 sm:$0xff]  }
 0x514   :  { %2420 = vmatprep.subr.bf16.mxu0 %v7579_v33  ;;  %v7639_v33 = vld [vmem:[#allocation6 + $0x3e4] ss:$8 sps:$4 sm:$0xff]  }
 0x516   :  { %2624 = vmatpush2.bf16.msra.mxu1 %v7523_v10  ;;  %v7607_v10 = vld [vmem:[#allocation6 + $0x330] ss:$8 sps:$4 sm:$0xff]  }
 0x517   :  { %3065 = vmatprep.subr.bf16.mxu1 %v7570_v48  ;;  %2421 = vmatpush2.bf16.msra.mxu0 %v7577_v35  ;;  %v7615_v48 = vld [vmem:[#allocation6 + $0x324] ss:$8 sps:$4 sm:$0xff]   ;;  %v7637_v35 = vld [vmem:[#allocation6 + $0x3e0] ss:$8 sps:$4 sm:$0xff]  }
 0x518   :  { %2862 = vmatprep.subr.bf16.mxu0 %v7585_v39  ;;  %v7651_v39 = vld [vmem:[#allocation6 + $0x3c4] ss:$8 sps:$4 sm:$0xff]  }
 0x519   :  { %2626 = vmatmul.mubr.bf16.vlgmr.msra.gmra.mxu1 %v8822_v30 }
 0x51a   :  { %3066 = vmatpush1.bf16.msra.mxu1 %v7568_v23  ;;  %v7613_v23 = vld [vmem:[#allocation6 + $0x320] ss:$8 sps:$4 sm:$0xff]  }
 0x51b   :  { %3067 = vmatprep.subr.bf16.mxu1 %v7576_v24  ;;  %v7621_v24 = vld [vmem:[#allocation6 + $0x314] ss:$8 sps:$4 sm:$0xff]  }
 0x51e   :  { %3068 = vmatpush1.bf16.msra.mxu1 %v7574_v29  ;;  %v7633_v29 = vld [vmem:[#allocation6 + $0x3f4] ss:$8 sps:$4 sm:$0xff]  }
 0x51f   :  { %3069 = vmatprep.subr.bf16.mxu1 %v7582_v32  ;;  %v7631_v32 = vld [vmem:[#allocation6 + $0x3f0] ss:$8 sps:$4 sm:$0xff]  }
 0x522   :  { %3070 = vmatpush1.bf16.msra.mxu1 %v7580_v36  ;;  %v7645_v36 = vld [vmem:[#allocation6 + $0x3d4] ss:$8 sps:$4 sm:$0xff]  }
 0x523   :  { %3071 = vmatprep.subr.bf16.mxu1 %v7588_v38  ;;  %v7643_v38 = vld [vmem:[#allocation6 + $0x3d0] ss:$8 sps:$4 sm:$0xff]  }
 0x526   :  { %3072 = vmatpush1.bf16.msra.mxu1 %v7586_v40  ;;  %v7649_v40 = vld [vmem:[#allocation6 + $0x3c0] ss:$8 sps:$4 sm:$0xff]  }
 0x527   :  { %3073 = vmatprep.subr.bf16.mxu1 %v7594_v11  ;;  %v7657_v11 = vld [vmem:[#allocation6 + $0x3b4] ss:$8 sps:$4 sm:$0xff]  }
 0x52a   :  { %3074 = vmatpush1.bf16.msra.mxu1 %v7592_v41  ;;  %v7655_v41 = vld [vmem:[#allocation6 + $0x3b0] ss:$8 sps:$4 sm:$0xff]  }
 0x52b   :  { %3075 = vmatprep.subr.bf16.mxu1 %v7600_v42  ;;  %v7663_v42 = vld [vmem:[#allocation6 + $0x3a4] ss:$8 sps:$4 sm:$0xff]  }
 0x52e   :  { %3076 = vmatpush1.bf16.msra.mxu1 %v7598_v43  ;;  %v7661_v43 = vld [vmem:[#allocation6 + $0x3a0] ss:$8 sps:$4 sm:$0xff]  }
 0x52f   :  { %3077 = vmatprep.subr.bf16.mxu1 %v7606_v44  ;;  %v7666_v44 = vld [vmem:[#allocation6 + $0x394] ss:$8 sps:$4 sm:$0xff]  }
 0x532   :  { %3078 = vmatpush1.bf16.msra.mxu1 %v7604_v45  ;;  %v7664_v45 = vld [vmem:[#allocation6 + $0x390] ss:$8 sps:$4 sm:$0xff]  }
 0x533   :  { %3079 = vmatprep.subr.bf16.mxu1 %v7612_v46  ;;  %v7669_v46 = vld [vmem:[#allocation6 + $0x384] ss:$8 sps:$4 sm:$0xff]  }
 0x536   :  { %3080 = vmatpush1.bf16.msra.mxu1 %v7610_v49  ;;  %v7667_v49 = vld [vmem:[#allocation6 + $0x380] ss:$8 sps:$4 sm:$0xff]  }
 0x537   :  { %3081 = vmatprep.subr.bf16.mxu1 %v7618_v47  ;;  %v3208_v47 = vld [vmem:[#allocation10 + $0x4f8] sm:$0xff] }
 0x53a   :  { %3082 = vmatpush2.bf16.msra.mxu1 %v7616_v34  ;;  %v3207_v34 = vld [vmem:[#allocation10 + $0x4f0] sm:$0xff] }
 0x53b   :  { %3083 = vmatprep.subr.bf16.mxu1 %v7624_v50  ;;  %v3206_v50 = vld [vmem:[#allocation10 + $0x4e8] sm:$0xff] }
 0x53e   :  { %3084 = vmatpush2.bf16.msra.mxu1 %v7622_v51  ;;  %v3205_v51 = vld [vmem:[#allocation10 + $0x4e0] sm:$0xff] }
 0x53f   :  { %3085 = vmatprep.subr.bf16.mxu1 %v7630_v52  ;;  %v3204_v52 = vld [vmem:[#allocation10 + $0x4d8] sm:$0xff] }
 0x542   :  { %3086 = vmatpush2.bf16.msra.mxu1 %v7628_v53  ;;  %v3203_v53 = vld [vmem:[#allocation10 + $0x4d0] sm:$0xff] }
 0x543   :  { %3087 = vmatprep.subr.bf16.mxu1 %v7636_v54  ;;  %v3202_v54 = vld [vmem:[#allocation10 + $0x4c8] sm:$0xff] }
 0x546   :  { %3088 = vmatpush2.bf16.msra.mxu1 %v7634_v55  ;;  %v3201_v55 = vld [vmem:[#allocation10 + $0x4c0] sm:$0xff] }
 0x547   :  { %3089 = vmatprep.subr.bf16.mxu1 %v7642_v56  ;;  %v3199_v56 = vld [vmem:[#allocation10 + $0x4b0] sm:$0xff] }
 0x54a   :  { %3090 = vmatpush2.bf16.msra.mxu1 %v7640_v57  ;;  %v3198_v57 = vld [vmem:[#allocation10 + $0x4a8] sm:$0xff] }
 0x54b   :  { %3091 = vmatprep.subr.bf16.mxu1 %v7648_v58  ;;  %v3197_v58 = vld [vmem:[#allocation10 + $0x4a0] sm:$0xff] }
 0x54e   :  { %3092 = vmatpush2.bf16.msra.mxu1 %v7646_v59  ;;  %v3196_v59 = vld [vmem:[#allocation10 + $0x498] sm:$0xff] }
 0x54f   :  { %3093 = vmatprep.subr.bf16.mxu1 %v7654_v60  ;;  %v3195_v60 = vld [vmem:[#allocation10 + $0x490] sm:$0xff] }
 0x552   :  { %3094 = vmatpush2.bf16.msra.mxu1 %v7652_v61  ;;  %v3194_v61 = vld [vmem:[#allocation10 + $0x488] sm:$0xff] }
 0x553   :  { %3095 = vmatprep.subr.bf16.mxu1 %v7660_v62  ;;  %v3193_v62 = vld [vmem:[#allocation10 + $0x480] sm:$0xff] }
 0x556   :  { %3096 = vmatpush2.bf16.msra.mxu1 %v7658_v63  ;;  %v3192_v63 = vld [vmem:[#allocation10 + $0x478] sm:$0xff] }
 0x557   :  { %3315 = vmatprep.subr.mxu1 %v3208_v47 }
 0x599   :  { %v2098_v1 = vpop.f32.mrf.mxu0  ;;  %v2154_v2 = vpop.f32.mrf.mxu1 }
 0x59b   :  { %v2100_v3 = vpop.f32.mrf.mxu0  ;;  %v2156_v4 = vpop.f32.mrf.mxu1 }
 0x59d   :  { %v2102_v5 = vpop.f32.mrf.mxu0  ;;  %v2158_v6 = vpop.f32.mrf.mxu1 }
 0x59e   :  { %v2163_v8 = vpack.c.bf16 %v2158_v6, %v2154_v2  ;;  %v2107_v15 = vpack.c.bf16 %v2102_v5, %v2098_v1  ;;  %v3191_v1 = vld [vmem:[#allocation10 + $0x470] sm:$0xff]  ;;  %v3190_v2 = vld [vmem:[#allocation10 + $0x468] sm:$0xff] }
 0x59f   :  { %v2104_v7 = vpop.f32.mrf.mxu0  ;;  %v2160_v9 = vpop.f32.mrf.mxu1  ;;  %v3187_v5 = vld [vmem:[#allocation10 + $0x450] sm:$0xff]  ;;  %v3186_v6 = vld [vmem:[#allocation10 + $0x448] sm:$0xff] }
 0x5a0   :  { %v2108_v12 = vpack.c.bf16 %v2104_v7, %v2100_v3  ;;  %v2164_v14 = vpack.c.bf16 %v2160_v9, %v2156_v4  ;;  %v3189_v3 = vld [vmem:[#allocation10 + $0x460] sm:$0xff]  ;;  %v3188_v4 = vld [vmem:[#allocation10 + $0x458] sm:$0xff]  ;;  %v3183_v9 = vld [vmem:[#allocation10 + $0x430] sm:$0xff] }
 0x5a1   :  { %v3185_v7 = vld [vmem:[#allocation10 + $0x440] sm:$0xff] }
 0x5a2   :  { %2422 = vmatprep.mubr.bf16.mxu0 %v2108_v12  ;;  %3097 = vmatprep.mubr.bf16.mxu1 %v2164_v14  ;;  %v3182_v12 = vld [vmem:[#allocation10 + $0x428] sm:$0xff]  ;;  %v3180_v14 = vld [vmem:[#allocation10 + $0x418] sm:$0xff] }
 0x5a3   :  { %2423 = vmatmul.mubr.bf16.vlgmr.msra.gmra.mxu0 %v2107_v15  ;;  %3098 = vmatmul.mubr.bf16.vlgmr.msra.gmra.mxu1 %v2163_v8  ;;  %v3184_v8 = vld [vmem:[#allocation10 + $0x438] sm:$0xff]  ;;  %v3179_v15 = vld [vmem:[#allocation10 + $0x410] sm:$0xff] }
 0x5a4   :  { %2863 = vmatpush1.bf16.msra.mxu0 %v7583_v13  ;;  %2894 = vmatprep.mubr.bf16.mxu0 %v8820_v21  ;;  %v7619_v21 = vld [vmem:[#allocation6 + $0x310] ss:$8 sps:$4 sm:$0xff]   ;;  %v3181_v13 = vld [vmem:[#allocation10 + $0x420] sm:$0xff] }
 0x5a5   :  { %2864 = vmatprep.subr.bf16.mxu0 %v7591_v16  ;;  %3316 = vmatpush1.msra.mxu1 %v3207_v34  ;;  %v3178_v16 = vld [vmem:[#allocation10 + $0x408] sm:$0xff] }
 0x5a6   :  { %3317 = vmatprep.subr.mxu1 %v3206_v50 }
 0x5a7   :  { %3318 = vmatpush1.msra.mxu1 %v3205_v51 }
 0x5a8   :  { %2865 = vmatpush1.bf16.msra.mxu0 %v7589_v17  ;;  %3319 = vmatprep.subr.mxu1 %v3204_v52  ;;  %v3177_v17 = vld [vmem:[#allocation10 + $0x400] sm:$0xff] }
 0x5a9   :  { %2866 = vmatprep.subr.bf16.mxu0 %v7597_v18  ;;  %3320 = vmatpush1.msra.mxu1 %v3203_v53  ;;  %v3240_v18 = vld [vmem:[#allocation10 + $0x5f8] sm:$0xff] }
 0x5aa   :  { %3321 = vmatprep.subr.mxu1 %v3202_v54 }
 0x5ab   :  { %3322 = vmatpush1.msra.mxu1 %v3201_v55 }
 0x5ac   :  { %2867 = vmatpush1.bf16.msra.mxu0 %v7595_v20  ;;  %v3239_v20 = vld [vmem:[#allocation10 + $0x5f0] sm:$0xff] }
 0x5ad   :  { %2868 = vmatprep.subr.bf16.mxu0 %v7603_v37  ;;  %v3238_v37 = vld [vmem:[#allocation10 + $0x5e8] sm:$0xff] }
 0x5b0   :  { %2869 = vmatpush1.bf16.msra.mxu0 %v7601_v22  ;;  %v3237_v22 = vld [vmem:[#allocation10 + $0x5e0] sm:$0xff] }
 0x5b1   :  { %2870 = vmatprep.subr.bf16.mxu0 %v7609_v31  ;;  %v3236_v31 = vld [vmem:[#allocation10 + $0x5d8] sm:$0xff] }
 0x5b4   :  { %2871 = vmatpush1.bf16.msra.mxu0 %v7607_v10  ;;  %v3235_v10 = vld [vmem:[#allocation10 + $0x5d0] sm:$0xff] }
 0x5b5   :  { %2872 = vmatprep.subr.bf16.mxu0 %v7615_v48  ;;  %v3234_v48 = vld [vmem:[#allocation10 + $0x5c8] sm:$0xff] }
 0x5b8   :  { %2873 = vmatpush1.bf16.msra.mxu0 %v7613_v23  ;;  %v3233_v23 = vld [vmem:[#allocation10 + $0x5c0] sm:$0xff] }
 0x5b9   :  { %2874 = vmatprep.subr.bf16.mxu0 %v7621_v24  ;;  %v3232_v24 = vld [vmem:[#allocation10 + $0x5b8] sm:$0xff] }
 0x5bc   :  { %2875 = vmatpush1.bf16.msra.mxu0 %v7619_v21  ;;  %v3231_v21 = vld [vmem:[#allocation10 + $0x5b0] sm:$0xff] }
 0x5bd   :  { %2876 = vmatprep.subr.bf16.mxu0 %v7627_v27  ;;  %v3230_v27 = vld [vmem:[#allocation10 + $0x5a8] sm:$0xff] }
 0x5c0   :  { %2877 = vmatpush1.bf16.msra.mxu0 %v7625_v28  ;;  %v3229_v28 = vld [vmem:[#allocation10 + $0x5a0] sm:$0xff] }
 0x5c1   :  { %2878 = vmatprep.subr.bf16.mxu0 %v7633_v29  ;;  %v3228_v29 = vld [vmem:[#allocation10 + $0x598] sm:$0xff] }
 0x5c4   :  { %2879 = vmatpush2.bf16.msra.mxu0 %v7631_v32  ;;  %v3227_v32 = vld [vmem:[#allocation10 + $0x590] sm:$0xff] }
 0x5c5   :  { %2880 = vmatprep.subr.bf16.mxu0 %v7639_v33  ;;  %v3226_v33 = vld [vmem:[#allocation10 + $0x588] sm:$0xff] }
 0x5c8   :  { %2881 = vmatpush2.bf16.msra.mxu0 %v7637_v35  ;;  %v3225_v35 = vld [vmem:[#allocation10 + $0x580] sm:$0xff] }
 0x5c9   :  { %2882 = vmatprep.subr.bf16.mxu0 %v7645_v36  ;;  %v3224_v36 = vld [vmem:[#allocation10 + $0x578] sm:$0xff] }
 0x5cc   :  { %2883 = vmatpush2.bf16.msra.mxu0 %v7643_v38  ;;  %v3223_v38 = vld [vmem:[#allocation10 + $0x570] sm:$0xff] }
 0x5cd   :  { %2884 = vmatprep.subr.bf16.mxu0 %v7651_v39  ;;  %v3222_v39 = vld [vmem:[#allocation10 + $0x568] sm:$0xff] }
 0x5d0   :  { %2885 = vmatpush2.bf16.msra.mxu0 %v7649_v40  ;;  %v3221_v40 = vld [vmem:[#allocation10 + $0x560] sm:$0xff] }
 0x5d1   :  { %2886 = vmatprep.subr.bf16.mxu0 %v7657_v11  ;;  %v3220_v11 = vld [vmem:[#allocation10 + $0x558] sm:$0xff] }
 0x5d4   :  { %2887 = vmatpush2.bf16.msra.mxu0 %v7655_v41  ;;  %v3219_v41 = vld [vmem:[#allocation10 + $0x550] sm:$0xff] }
 0x5d5   :  { %2888 = vmatprep.subr.bf16.mxu0 %v7663_v42  ;;  %v3218_v42 = vld [vmem:[#allocation10 + $0x548] sm:$0xff] }
 0x5d8   :  { %2889 = vmatpush2.bf16.msra.mxu0 %v7661_v43  ;;  %v3217_v43 = vld [vmem:[#allocation10 + $0x540] sm:$0xff] }
 0x5d9   :  { %2890 = vmatprep.subr.bf16.mxu0 %v7666_v44  ;;  %v3216_v44 = vld [vmem:[#allocation10 + $0x538] sm:$0xff] }
 0x5dc   :  { %2891 = vmatpush2.bf16.msra.mxu0 %v7664_v45  ;;  %v3215_v45 = vld [vmem:[#allocation10 + $0x530] sm:$0xff] }
 0x5dd   :  { %2892 = vmatprep.subr.bf16.mxu0 %v7669_v46  ;;  %v3214_v46 = vld [vmem:[#allocation10 + $0x528] sm:$0xff] }
 0x5e0   :  { %2893 = vmatpush2.bf16.msra.mxu0 %v7667_v49  ;;  %v3213_v49 = vld [vmem:[#allocation10 + $0x520] sm:$0xff] }
 0x5e1   :  { %3241 = vmatprep.subr.mxu0 %v3208_v47  ;;  %v3212_v47 = vld [vmem:[#allocation10 + $0x518] sm:$0xff] }
 0x5e3   :  { %2895 = vmatmul.mubr.bf16.vlgmr.msra.gmra.mxu0 %v8822_v30  ;;  %v3200_v30 = vld [vmem:[#allocation10 + $0x4b8] sm:$0xff] }
 0x5e4   :  { %3242 = vmatpush1.msra.mxu0 %v3207_v34  ;;  %3323 = vmatprep.subr.mxu1 %v3200_v30  ;;  %v3211_v34 = vld [vmem:[#allocation10 + $0x510] sm:$0xff] }
 0x5e5   :  { %3243 = vmatprep.subr.mxu0 %v3206_v50  ;;  %3324 = vmatpush1.msra.mxu1 %v3199_v56  ;;  %v3210_v50 = vld [vmem:[#allocation10 + $0x508] sm:$0xff] }
 0x5e6   :  { %3244 = vmatpush1.msra.mxu0 %v3205_v51  ;;  %3325 = vmatprep.subr.mxu1 %v3198_v57  ;;  %v3209_v51 = vld [vmem:[#allocation10 + $0x500] sm:$0xff] }
 0x5e7   :  { %3245 = vmatprep.subr.mxu0 %v3204_v52  ;;  %3326 = vmatpush1.msra.mxu1 %v3197_v58 }
 0x5e8   :  { %3246 = vmatpush1.msra.mxu0 %v3203_v53  ;;  %3327 = vmatprep.subr.mxu1 %v3196_v59  ;;  %v2627_v53 = vpop.f32.mrf.mxu1 }
 0x5e9   :  { %3247 = vmatprep.subr.mxu0 %v3202_v54  ;;  %3328 = vmatpush1.msra.mxu1 %v3195_v60 }
 0x5ea   :  { %3248 = vmatpush1.msra.mxu0 %v3201_v55  ;;  %3329 = vmatprep.subr.mxu1 %v3194_v61  ;;  %v2629_v55 = vpop.f32.mrf.mxu1 }
 0x5eb   :  { %3249 = vmatprep.subr.mxu0 %v3200_v30  ;;  %3330 = vmatpush1.msra.mxu1 %v3193_v62 }
 0x5ec   :  { %3250 = vmatpush1.msra.mxu0 %v3199_v56  ;;  %3331 = vmatprep.subr.mxu1 %v3192_v63  ;;  %v2631_v56 = vpop.f32.mrf.mxu1 }
 0x5ed   :  { %3251 = vmatprep.subr.mxu0 %v3198_v57  ;;  %3332 = vmatpush1.msra.mxu1 %v3191_v1 }
 0x5ee   :  { %3252 = vmatpush1.msra.mxu0 %v3197_v58  ;;  %3333 = vmatprep.subr.mxu1 %v3190_v2  ;;  %v2633_v58 = vpop.f32.mrf.mxu1 }
 0x5ef   :  { %3253 = vmatprep.subr.mxu0 %v3196_v59  ;;  %3334 = vmatpush1.msra.mxu1 %v3189_v3 }
 0x5f0   :  { %3254 = vmatpush1.msra.mxu0 %v3195_v60  ;;  %3335 = vmatprep.subr.mxu1 %v3188_v4 }
 0x5f1   :  { %3255 = vmatprep.subr.mxu0 %v3194_v61  ;;  %3336 = vmatpush1.msra.mxu1 %v3187_v5 }
 0x5f2   :  { %3256 = vmatpush1.msra.mxu0 %v3193_v62  ;;  %3337 = vmatprep.subr.mxu1 %v3186_v6 }
 0x5f3   :  { %3257 = vmatprep.subr.mxu0 %v3192_v63  ;;  %3338 = vmatpush1.msra.mxu1 %v3185_v7 }
 0x5f4   :  { %3258 = vmatpush1.msra.mxu0 %v3191_v1  ;;  %3339 = vmatprep.subr.mxu1 %v3184_v8 }
 0x5f5   :  { %3259 = vmatprep.subr.mxu0 %v3190_v2  ;;  %3340 = vmatpush1.msra.mxu1 %v3183_v9 }
 0x5f6   :  { %3260 = vmatpush1.msra.mxu0 %v3189_v3  ;;  %3341 = vmatprep.subr.mxu1 %v3182_v12 }
 0x5f7   :  { %3261 = vmatprep.subr.mxu0 %v3188_v4  ;;  %3342 = vmatpush1.msra.mxu1 %v3181_v13 }
 0x5f8   :  { %3262 = vmatpush1.msra.mxu0 %v3187_v5  ;;  %3343 = vmatprep.subr.mxu1 %v3180_v14 }
 0x5f9   :  { %3263 = vmatprep.subr.mxu0 %v3186_v6  ;;  %3344 = vmatpush1.msra.mxu1 %v3179_v15 }
 0x5fa   :  { %3264 = vmatpush1.msra.mxu0 %v3185_v7  ;;  %3345 = vmatprep.subr.mxu1 %v3178_v16 }
 0x5fb   :  { %3265 = vmatprep.subr.mxu0 %v3184_v8  ;;  %3346 = vmatpush1.msra.mxu1 %v3177_v17 }
 0x5fc   :  { %3266 = vmatpush1.msra.mxu0 %v3183_v9  ;;  %3347 = vmatprep.subr.mxu1 %v3240_v18 }
 0x5fd   :  { %3267 = vmatprep.subr.mxu0 %v3182_v12  ;;  %3348 = vmatpush2.msra.mxu1 %v3239_v20 }
 0x5fe   :  { %3268 = vmatpush1.msra.mxu0 %v3181_v13  ;;  %3349 = vmatprep.subr.mxu1 %v3238_v37 }
 0x5ff   :  { %3269 = vmatprep.subr.mxu0 %v3180_v14  ;;  %3350 = vmatpush2.msra.mxu1 %v3237_v22 }
 0x600   :  { %3270 = vmatpush1.msra.mxu0 %v3179_v15  ;;  %3351 = vmatprep.subr.mxu1 %v3236_v31 }
 0x601   :  { %3271 = vmatprep.subr.mxu0 %v3178_v16  ;;  %3352 = vmatpush2.msra.mxu1 %v3235_v10 }
 0x602   :  { %3272 = vmatpush1.msra.mxu0 %v3177_v17  ;;  %3353 = vmatprep.subr.mxu1 %v3234_v48 }
 0x603   :  { %3273 = vmatprep.subr.mxu0 %v3240_v18  ;;  %3354 = vmatpush2.msra.mxu1 %v3233_v23 }
 0x604   :  { %3274 = vmatpush2.msra.mxu0 %v3239_v20  ;;  %3355 = vmatprep.subr.mxu1 %v3232_v24 }
 0x605   :  { %3275 = vmatprep.subr.mxu0 %v3238_v37  ;;  %3356 = vmatpush2.msra.mxu1 %v3231_v21 }
 0x606   :  { %3276 = vmatpush2.msra.mxu0 %v3237_v22  ;;  %3357 = vmatprep.subr.mxu1 %v3230_v27 }
 0x607   :  { %3277 = vmatprep.subr.mxu0 %v3236_v31  ;;  %3358 = vmatpush2.msra.mxu1 %v3229_v28 }
 0x608   :  { %3278 = vmatpush2.msra.mxu0 %v3235_v10  ;;  %3359 = vmatprep.subr.mxu1 %v3228_v29 }
 0x609   :  { %3279 = vmatprep.subr.mxu0 %v3234_v48  ;;  %3360 = vmatpush2.msra.mxu1 %v3227_v32 }
 0x60a   :  { %3280 = vmatpush2.msra.mxu0 %v3233_v23  ;;  %3361 = vmatprep.subr.mxu1 %v3226_v33 }
 0x60b   :  { %3281 = vmatprep.subr.mxu0 %v3232_v24  ;;  %3362 = vmatpush2.msra.mxu1 %v3225_v35 }
 0x60c   :  { %3282 = vmatpush2.msra.mxu0 %v3231_v21  ;;  %3363 = vmatprep.subr.mxu1 %v3224_v36 }
 0x60d   :  { %3283 = vmatprep.subr.mxu0 %v3230_v27  ;;  %3364 = vmatpush2.msra.mxu1 %v3223_v38 }
 0x60e   :  { %3284 = vmatpush2.msra.mxu0 %v3229_v28  ;;  %3365 = vmatprep.subr.mxu1 %v3222_v39 }
 0x60f   :  { %3285 = vmatprep.subr.mxu0 %v3228_v29  ;;  %3366 = vmatpush2.msra.mxu1 %v3221_v40 }
 0x610   :  { %3286 = vmatpush2.msra.mxu0 %v3227_v32  ;;  %3367 = vmatprep.subr.mxu1 %v3220_v11 }
 0x611   :  { %3287 = vmatprep.subr.mxu0 %v3226_v33  ;;  %3368 = vmatpush2.msra.mxu1 %v3219_v41 }
 0x612   :  { %3288 = vmatpush2.msra.mxu0 %v3225_v35  ;;  %3369 = vmatprep.subr.mxu1 %v3218_v42 }
 0x613   :  { %3289 = vmatprep.subr.mxu0 %v3224_v36  ;;  %3370 = vmatpush2.msra.mxu1 %v3217_v43 }
 0x614   :  { %3290 = vmatpush2.msra.mxu0 %v3223_v38  ;;  %3371 = vmatprep.subr.mxu1 %v3216_v44 }
 0x615   :  { %3291 = vmatprep.subr.mxu0 %v3222_v39  ;;  %3372 = vmatpush2.msra.mxu1 %v3215_v45 }
 0x616   :  { %3292 = vmatpush2.msra.mxu0 %v3221_v40  ;;  %3373 = vmatprep.subr.mxu1 %v3214_v46 }
 0x617   :  { %3293 = vmatprep.subr.mxu0 %v3220_v11  ;;  %3374 = vmatpush2.msra.mxu1 %v3213_v49 }
 0x618   :  { %3294 = vmatpush2.msra.mxu0 %v3219_v41  ;;  %3375 = vmatprep.subr.mxu1 %v3212_v47 }
 0x619   :  { %3295 = vmatprep.subr.mxu0 %v3218_v42  ;;  %3376 = vmatpush2.msra.mxu1 %v3211_v34 }
 0x61a   :  { %3296 = vmatpush2.msra.mxu0 %v3217_v43  ;;  %3377 = vmatprep.subr.mxu1 %v3210_v50 }
 0x61b   :  { %3297 = vmatprep.subr.mxu0 %v3216_v44  ;;  %3378 = vmatpush2.msra.mxu1 %v3209_v51 }
 0x61c   :  { %3298 = vmatpush2.msra.mxu0 %v3215_v45 }
 0x61d   :  { %3299 = vmatprep.subr.mxu0 %v3214_v46 }
 0x61e   :  { %3300 = vmatpush2.msra.mxu0 %v3213_v49 }
 0x61f   :  { %3301 = vmatprep.subr.mxu0 %v3212_v47 }
 0x620   :  { %3302 = vmatpush2.msra.mxu0 %v3211_v34 }
 0x621   :  { %3303 = vmatprep.subr.mxu0 %v3210_v50 }
 0x622   :  { %3304 = vmatpush2.msra.mxu0 %v3209_v51 }
 0x663   :  { %v2424_v52 = vpop.f32.mrf.mxu0  ;;  %v3099_v1 = vpop.f32.mrf.mxu1 }
 0x664   :  { %v8846_v62 = vadd.f32 %v2627_v53, %v2424_v52 }
 0x665   :  { %v2426_v54 = vpop.f32.mrf.mxu0  ;;  %v3101_v8 = vpop.f32.mrf.mxu1 }
 0x666   :  { %v8842_v60 = vadd.f32 %v2629_v55, %v2426_v54  ;;  %v3122_v5 = vmul.f32 %v8846_v62, %v8846_v62 }
 0x667   :  { %v2428_v30 = vpop.f32.mrf.mxu0  ;;  %v3103_v16 = vpop.f32.mrf.mxu1 }
 0x668   :  { %v8844_v61 = vadd.f32 %v2631_v56, %v2428_v30  ;;  %v3123_v2 = vmul.f32 %v8842_v60, %v8842_v60 }
 0x669   :  { %v2430_v57 = vpop.f32.mrf.mxu0  ;;  %v3105_v24 = vpop.f32.mrf.mxu1 }
 0x66a   :  { %v8840_v59 = vadd.f32 %v2633_v58, %v2430_v57  ;;  %v3124_v3 = vmul.f32 %v8844_v61, %v8844_v61  ;;  %v3108_v6 = vadd.f32 %v8844_v61, %v8846_v62 }
 0x66c   :  { %v3125_v63 = vmul.f32 %v8840_v59, %v8840_v59  ;;  %v3115_v4 = vadd.f32 %v8840_v59, %v8842_v60  ;;  %v3126_v9 = vadd.f32 %v3124_v3, %v3122_v5  ;;  %v3109_v14 = vrot.slane %v3108_v6, 4 }
 0x66e   :  { %v3133_v7 = vadd.f32 %v3125_v63, %v3123_v2  ;;  %v3116_v12 = vrot.slane %v3115_v4, 4  ;;  %v3127_v20 = vrot.slane %v3126_v9, 4  ;;  %v3110_v48 = vadd.f32 %v3109_v14, %v3108_v6 }
 0x670   :  { %v3134_v15 = vrot.slane %v3133_v7, 4  ;;  %v3117_v37 = vadd.f32 %v3116_v12, %v3115_v4  ;;  %v3128_v33 = vadd.f32 %v3127_v20, %v3126_v9  ;;  %v3111_v41 = vrot.slane %v3110_v48, 2 }
 0x672   :  { %v3135_v23 = vadd.f32 %v3134_v15, %v3133_v7  ;;  %v3118_v35 = vrot.slane %v3117_v37, 2  ;;  %v3129_v49 = vrot.slane %v3128_v33, 2  ;;  %v3112_v53 = vadd.f32 %v3111_v41, %v3110_v48 }
 0x674   :  { %v3136_v42 = vrot.slane %v3135_v23, 2  ;;  %v3119_v47 = vadd.f32 %v3118_v35, %v3117_v37  ;;  %v3130_v58 = vadd.f32 %v3129_v49, %v3128_v33  ;;  %v3113_v5 = vrot.slane %v3112_v53, 1 }
 0x676   :  { %v3137_v54 = vadd.f32 %v3136_v42, %v3135_v23  ;;  %v3120_v63 = vrot.slane %v3119_v47, 1 }
 0x678   :  { %v3138_v7 = vrot.slane %v3137_v54, 1  ;;  %v3121_v14 = vadd.f32 %v3120_v63, %v3119_v47 }
 0x6a3   :  { %v2896_v13 = vpop.f32.mrf.mxu0 }
 0x6a4   :  { %v8860_v18 = vadd.f32 %v3099_v1, %v2896_v13  ;;  %v3131_v13 = vrot.slane %v3130_v58, 1 }
 0x6a5   :  { %v2898_v17 = vpop.f32.mrf.mxu0 }
 0x6a6   :  { %v8862_v22 = vadd.f32 %v3101_v8, %v2898_v17  ;;  %v3156_v27 = vmul.f32 %v8860_v18, %v8860_v18  ;;  %v3114_v17 = vadd.f32 %v3113_v5, %v3112_v53 }
 0x6a7   :  { %v2900_v31 = vpop.f32.mrf.mxu0 }
 0x6a8   :  { %v8864_v10 = vadd.f32 %v3103_v16, %v2900_v31  ;;  %v3157_v36 = vmul.f32 %v8862_v22, %v8862_v22  ;;  %v3139_v31 = vadd.f32 %v3138_v7, %v3137_v54 }
 0x6a9   :  { %v2902_v21 = vpop.f32.mrf.mxu0 }
 0x6aa   :  { %v3140_v28 = vadd.f32 %v8864_v10, %v8860_v18  ;;  %v3158_v29 = vmul.f32 %v8864_v10, %v8864_v10  ;;  %v8872_v32 = vadd.f32 %v3105_v24, %v2902_v21  ;;  %v3132_v24 = vadd.f32 %v3131_v13, %v3130_v58  ;;  %v6872_v58 = vld [vmem:[%s9652_s12 + $0x4] sm:$0x3] }
 0x6ac   :  { %v3141_v38 = vrot.slane %v3140_v28, 4  ;;  %v3160_v39 = vadd.f32 %v3158_v29, %v3156_v27  ;;  %v3147_v40 = vadd.f32 %v8872_v32, %v8862_v22  ;;  %v3159_v11 = vmul.f32 %v8872_v32, %v8872_v32 }
 0x6ae   :  { %v3142_v43 = vadd.f32 %v3141_v38, %v3140_v28  ;;  %v3161_v44 = vrot.slane %v3160_v39, 4  ;;  %v3148_v45 = vrot.slane %v3147_v40, 4  ;;  %v3167_v46 = vadd.f32 %v3159_v11, %v3157_v36 }
 0x6b0   :  { %v3143_v34 = vrot.slane %v3142_v43, 2  ;;  %v3162_v50 = vadd.f32 %v3161_v44, %v3160_v39  ;;  %v3149_v51 = vadd.f32 %v3148_v45, %v3147_v40  ;;  %v3168_v52 = vrot.slane %v3167_v46, 4 }
 0x6b2   :  { %v3144_v55 = vadd.f32 %v3143_v34, %v3142_v43  ;;  %v3163_v30 = vrot.slane %v3162_v50, 2  ;;  %v3150_v56 = vrot.slane %v3149_v51, 2  ;;  %v3169_v57 = vadd.f32 %v3168_v52, %v3167_v46 }
 0x6b4   :  { %v3145_v1 = vrot.slane %v3144_v55, 1  ;;  %v3164_v2 = vadd.f32 %v3163_v30, %v3162_v50  ;;  %v3151_v3 = vadd.f32 %v3150_v56, %v3149_v51  ;;  %v3170_v4 = vrot.slane %v3169_v57, 2  ;;  %v6871_v50 = vld [vmem:[%s9651_s11 + $0x4] sm:$0x3] }
 0x6b6   :  { %v3152_v6 = vrot.slane %v3151_v3, 1  ;;  %v3171_v8 = vadd.f32 %v3170_v4, %v3169_v57  ;;  %v3165_v9 = vrot.slane %v3164_v2, 1  ;;  %v3146_v12 = vadd.f32 %v3145_v1, %v3144_v55 }
 0x6b8   :  { %v3153_v15 = vadd.f32 %v3152_v6, %v3151_v3  ;;  %v3172_v16 = vrot.slane %v3171_v8, 1  ;;  %v3166_v20 = vadd.f32 %v3165_v9, %v3164_v2  ;;  %v3154_v23 = vadd.f32 %v3146_v12, %v3114_v17 }
 0x6ba   :  { %v3155_v37 = vadd.f32 %v3153_v15, %v3121_v14  ;;  %v3173_v48 = vadd.f32 %v3172_v16, %v3171_v8  ;;  %v3174_v27 = vadd.f32 %v3166_v20, %v3132_v24 }
 0x6bc   :  { %3305 = vmatprep.mubr.f32.mxu0 %v3155_v37  ;;  %v3175_v21 = vadd.f32 %v3173_v48, %v3139_v31 }
 0x6bd   :  { %3306 = vmatmul.mubr.f32.vlgmr.msra.gmra.mxu0 %v3154_v23 }
 0x6be   :  { %3379 = vmatprep.mubr.f32.mxu1 %v3175_v21  ;;  %3559 = vmatprep.mubr.bf16.mxu0 %v8217_v0 }
 0x6bf   :  { %3380 = vmatmul.mubr.f32.vlgmr.msra.gmra.mxu1 %v3174_v27  ;;  %v7674_v27 = vld [vmem:[#allocation8 + $0x74] ss:$8 sps:$4 sm:$0xff]  }
 0x6c0   :  { %3637 = vmatprep.mubr.bf16.mxu1 %v8217_v0 }
 0x77d   :  { %v3307_v28 = vpop.f32.mrf.mxu0 }
 0x77e   :  { %v3313_v29 = vmul.f32 0.001953125, %v3307_v28  ;;  %v7724_v28 = vld [vmem:[#allocation8 + $0x174] ss:$8 sps:$4 sm:$0xff]  }
 0x77f   :  { %v3309_v33 = vpop.f32.mrf.mxu0  ;;  %v3381_v35 = vpop.f32.mrf.mxu1 }
 0x780   :  { %v3388_v36 = vmul.f32 %v3313_v29, %v3313_v29  ;;  %v3314_v38 = vmul.f32 0.001953125, %v3309_v33  ;;  %v3386_v39 = vmul.f32 0.001953125, %v3381_v35  ;;  %v7670_v33 = vld [vmem:[%s9648_s8] sm:$0xff]   ;;  %v7671_v35 = vld [vmem:[%s9648_s8 + $0x10] sm:$0xff]  }
 0x781   :  { %v3383_v40 = vpop.f32.mrf.mxu1 }
 0x782   :  { %v3389_v11 = vmul.f32 %v3314_v38, %v3314_v38  ;;  %v3390_v41 = vsub.f32 %v3386_v39, %v3388_v36  ;;  %v3387_v42 = vmul.f32 0.001953125, %v3383_v40  ;;  %v7672_v36 = vld [vmem:[#allocation8 + $0x70] ss:$8 sps:$4 sm:$0xff]   ;;  %v7727_v40 = vld [vmem:[#allocation8 + $0x164] ss:$8 sps:$4 sm:$0xff]  }
 0x783   :  { %v7722_v39 = vld [vmem:[#allocation8 + $0x170] ss:$8 sps:$4 sm:$0xff]  }
 0x784   :  { %v3392_v43 = vadd.f32 1e-05, %v3390_v41  ;;  %v3391_v44 = vsub.f32 %v3387_v42, %v3389_v11  ;;  %v7675_v11 = vld [vmem:[#allocation8 + $0x60] ss:$8 sps:$4 sm:$0xff]   ;;  %v7682_v41 = vld [vmem:[#allocation8 + $0x54] ss:$8 sps:$4 sm:$0xff]  }
 0x785   :  { %v7725_v42 = vld [vmem:[#allocation8 + $0x160] ss:$8 sps:$4 sm:$0xff]  }
 0x786   :  { %v3393_v45 = vadd.f32 1e-05, %v3391_v44  ;;  %8074 = vrsqrt.f32 %v3392_v43  ;;  %v7678_v43 = vld [vmem:[%s9648_s8 + $0x8] sm:$0xff]   ;;  %v7679_v44 = vld [vmem:[%s9648_s8 + $0x18] sm:$0xff]  }
 0x788   :  { %8076 = vrsqrt.f32 %v3393_v45  ;;  %v7680_v45 = vld [vmem:[#allocation8 + $0x50] ss:$8 sps:$4 sm:$0xff]  }
 0x793   :  { %v8075_v46 = vpop.eup %8074 }
 0x795   :  { %v8077_v49 = vpop.eup %8076 }
 0x796   :  { %v3400_v47 = vcombine.low %v8075_v46, %v8077_v49  ;;  %v7685_v46 = vld [vmem:[#allocation8 + $0x44] ss:$8 sps:$4 sm:$0xff]   ;;  %v7730_v49 = vld [vmem:[#allocation8 + $0x154] ss:$8 sps:$4 sm:$0xff]  }
 0x798   :  { %v3407_v34 = vrot.slane %v3400_v47, %v8347_v19  ;;  %v7728_v47 = vld [vmem:[#allocation8 + $0x150] ss:$8 sps:$4 sm:$0xff]  }
 0x79a   :  { %v3414_v51 = vrot.slane %v3407_v34, %v8347_v19  ;;  %v7733_v34 = vld [vmem:[#allocation8 + $0x144] ss:$8 sps:$4 sm:$0xff]  }
 0x79c   :  { %v3416_v52 = vmul.f32 %v6871_v50, %v3414_v51  ;;  %v7683_v50 = vld [vmem:[#allocation8 + $0x40] ss:$8 sps:$4 sm:$0xff]   ;;  %v7688_v51 = vld [vmem:[#allocation8 + $0x34] ss:$8 sps:$4 sm:$0xff]  }
 0x79e   :  { %v3423_v53 = vrot.slane %v3416_v52, %v8354_v25  ;;  %v3427_v54 = vrot.slane %v3416_v52, %v8356_v26  ;;  %v7731_v52 = vld [vmem:[#allocation8 + $0x140] ss:$8 sps:$4 sm:$0xff]  }
 0x7a0   :  { %v3430_v55 = vmul.f32 %v3423_v53, %v3313_v29  ;;  %v3431_v30 = vmul.f32 %v3427_v54, %v3314_v38  ;;  %v3475_v2 = vmul.f32 %v3427_v54, %v8862_v22  ;;  %v3477_v3 = vmul.f32 %v3427_v54, %v8872_v32  ;;  %v7677_v38 = vld [vmem:[#allocation8 + $0x64] ss:$8 sps:$4 sm:$0xff]  }
 0x7a1   :  { %v3474_v6 = vmul.f32 %v3423_v53, %v8860_v18  ;;  %v3476_v7 = vmul.f32 %v3423_v53, %v8864_v10  ;;  %v3452_v8 = vmul.f32 %v3427_v54, %v8842_v60  ;;  %v3454_v9 = vmul.f32 %v3427_v54, %v8840_v59  ;;  %v7686_v54 = vld [vmem:[#allocation8 + $0x30] ss:$8 sps:$4 sm:$0xff]  }
 0x7a2   :  { %v3434_v56 = vcombine.low %v3430_v55, %v3431_v30  ;;  %v3451_v12 = vmul.f32 %v3423_v53, %v8846_v62  ;;  %v3453_v13 = vmul.f32 %v3423_v53, %v8844_v61  ;;  %v7736_v53 = vld [vmem:[#allocation8 + $0x134] ss:$8 sps:$4 sm:$0xff]   ;;  %v7691_v55 = vld [vmem:[#allocation8 + $0x24] ss:$8 sps:$4 sm:$0xff]   ;;  %v7734_v30 = vld [vmem:[#allocation8 + $0x130] ss:$8 sps:$4 sm:$0xff]  }
 0x7a4   :  { %v3441_v57 = vrot.slane %v3434_v56, %v8347_v19  ;;  %v7739_v56 = vld [vmem:[#allocation8 + $0x124] ss:$8 sps:$4 sm:$0xff]  }
 0x7a6   :  { %v3448_v63 = vrot.slane %v3441_v57, %v8347_v19  ;;  %v7689_v57 = vld [vmem:[#allocation8 + $0x20] ss:$8 sps:$4 sm:$0xff]  }
 0x7a8   :  { %v3450_v1 = vsub.f32 %v6872_v58, %v3448_v63  ;;  %v7694_v58 = vld [vmem:[#allocation8 + $0x14] ss:$8 sps:$4 sm:$0xff]   ;;  %v7737_v63 = vld [vmem:[#allocation8 + $0x120] ss:$8 sps:$4 sm:$0xff]  }
 0x7aa   :  { %v3463_v4 = vrot.slane %v3450_v1, %v8356_v26  ;;  %v3459_v5 = vrot.slane %v3450_v1, %v8354_v25  ;;  %v7742_v1 = vld [vmem:[#allocation8 + $0x114] ss:$8 sps:$4 sm:$0xff]  }
 0x7ac   :  { %v3479_v14 = vadd.f32 %v3475_v2, %v3463_v4  ;;  %v3481_v22 = vadd.f32 %v3477_v3, %v3463_v4  ;;  %v3478_v15 = vadd.f32 %v3474_v6, %v3459_v5  ;;  %v3480_v32 = vadd.f32 %v3476_v7, %v3459_v5  ;;  %v7692_v2 = vld [vmem:[#allocation8 + $0x10] ss:$8 sps:$4 sm:$0xff]   ;;  %v7697_v3 = vld [vmem:[#allocation8 + $0x4] ss:$8 sps:$4 sm:$0xff]   ;;  %v7695_v6 = vld [vmem:[#allocation8] ss:$8 sps:$4 sm:$0xff]  }
 0x7ad   :  { %v3467_v16 = vadd.f32 %v3463_v4, %v3452_v8  ;;  %v3469_v17 = vadd.f32 %v3463_v4, %v3454_v9  ;;  %v3466_v20 = vadd.f32 %v3459_v5, %v3451_v12  ;;  %v3468_v37 = vadd.f32 %v3459_v5, %v3453_v13  ;;  %v7740_v4 = vld [vmem:[#allocation8 + $0x110] ss:$8 sps:$4 sm:$0xff]   ;;  %v7745_v5 = vld [vmem:[#allocation8 + $0x104] ss:$8 sps:$4 sm:$0xff]   ;;  %v7700_v7 = vld [vmem:[#allocation8 + $0xf4] ss:$8 sps:$4 sm:$0xff]  }
 0x7ae   :  { %v3483_v31 = vmax.f32 %v3479_v14, 0.0  ;;  %v3485_v18 = vmax.f32 %v3481_v22, 0.0  ;;  %v3482_v48 = vmax.f32 %v3478_v15, 0.0  ;;  %v3484_v10 = vmax.f32 %v3480_v32, 0.0  ;;  %v7743_v8 = vld [vmem:[#allocation8 + $0x100] ss:$8 sps:$4 sm:$0xff]  }
 0x7af   :  { %v3471_v23 = vmax.f32 %v3467_v16, 0.0  ;;  %v3473_v60 = vmax.f32 %v3469_v17, 0.0  ;;  %v3470_v62 = vmax.f32 %v3466_v20, 0.0  ;;  %v3472_v61 = vmax.f32 %v3468_v37, 0.0  ;;  %v7748_v9 = vld [vmem:[#allocation8 + $0x1f4] ss:$8 sps:$4 sm:$0xff]  }
 0x7b0   :  { %v8904_v24 = vpack.c.bf16 %v3485_v18, %v3483_v31  ;;  %v8906_v59 = vpack.c.bf16 %v3484_v10, %v3482_v48  ;;  %v7698_v12 = vld [vmem:[#allocation8 + $0xf0] ss:$8 sps:$4 sm:$0xff]   ;;  %v7703_v13 = vld [vmem:[#allocation8 + $0xe4] ss:$8 sps:$4 sm:$0xff]   ;;  %v7701_v15 = vld [vmem:[#allocation8 + $0xe0] ss:$8 sps:$4 sm:$0xff]  }
 0x7b1   :  { %v8910_v21 = vpack.c.bf16 %v3473_v60, %v3471_v23  ;;  %v8916_v29 = vpack.c.bf16 %v3472_v61, %v3470_v62  ;;  %v7746_v14 = vld [vmem:[#allocation8 + $0x1f0] ss:$8 sps:$4 sm:$0xff]   ;;  %v7751_v22 = vld [vmem:[#allocation8 + $0x1e4] ss:$8 sps:$4 sm:$0xff]   ;;  %v7706_v32 = vld [vmem:[#allocation8 + $0xd4] ss:$8 sps:$4 sm:$0xff]  }
 0x7b2   :  { %3539 = vmatprep.subr.bf16.mxu0 %v8904_v24  ;;  %3617 = vmatprep.subr.bf16.mxu1 %v8904_v24  ;;  %v7749_v16 = vld [vmem:[#allocation8 + $0x1e0] ss:$8 sps:$4 sm:$0xff]   ;;  %v7754_v17 = vld [vmem:[#allocation8 + $0x1d4] ss:$8 sps:$4 sm:$0xff]   ;;  %v7704_v20 = vld [vmem:[#allocation8 + $0xd0] ss:$8 sps:$4 sm:$0xff]  }
 0x7b3   :  { %3540 = vmatpush1.bf16.msra.mxu0 %v8906_v59  ;;  %3618 = vmatpush1.bf16.msra.mxu1 %v8906_v59  ;;  %v7709_v37 = vld [vmem:[#allocation8 + $0xc4] ss:$8 sps:$4 sm:$0xff]   ;;  %v7752_v31 = vld [vmem:[#allocation8 + $0x1d0] ss:$8 sps:$4 sm:$0xff]   ;;  %v7707_v48 = vld [vmem:[#allocation8 + $0xc0] ss:$8 sps:$4 sm:$0xff]  }
 0x7b4   :  { %3541 = vmatprep.subr.bf16.mxu0 %v8910_v21  ;;  %3619 = vmatprep.subr.bf16.mxu1 %v8910_v21  ;;  %v7757_v18 = vld [vmem:[#allocation8 + $0x1c4] ss:$8 sps:$4 sm:$0xff]   ;;  %v7712_v10 = vld [vmem:[#allocation8 + $0xb4] ss:$8 sps:$4 sm:$0xff]   ;;  %v7755_v23 = vld [vmem:[#allocation8 + $0x1c0] ss:$8 sps:$4 sm:$0xff]  }
 0x7b5   :  { %v7760_v60 = vld [vmem:[#allocation8 + $0x1b4] ss:$8 sps:$4 sm:$0xff]   ;;  %v7710_v62 = vld [vmem:[#allocation8 + $0xb0] ss:$8 sps:$4 sm:$0xff]   ;;  %v7715_v61 = vld [vmem:[#allocation8 + $0xa4] ss:$8 sps:$4 sm:$0xff]  }
 0x7b7   :  { %3542 = vmatpush1.bf16.msra.mxu0 %v8916_v29  ;;  %3620 = vmatpush1.bf16.msra.mxu1 %v8916_v29 }
 0x7b8   :  { %4100 = vmatprep.subr.bf16.mxu1 %v7674_v27  ;;  %3887 = vmatprep.subr.bf16.mxu0 %v7724_v28  ;;  %v7758_v27 = vld [vmem:[#allocation8 + $0x1b0] ss:$8 sps:$4 sm:$0xff]   ;;  %v7763_v28 = vld [vmem:[#allocation8 + $0x1a4] ss:$8 sps:$4 sm:$0xff]  }
 0x7ba   :  { %6875 = vmatmul.mubr.msk.bf16.vlgmr.msra.gmra.mxu0 %vm3520_vm3, %v7670_v33  ;;  %6883 = vmatmul.mubr.msk.bf16.vlgmr.msra.gmra.mxu1 %vm3520_vm3, %v7671_v35  ;;  %v7713_v33 = vld [vmem:[#allocation8 + $0xa0] ss:$8 sps:$4 sm:$0xff]   ;;  %v7718_v35 = vld [vmem:[#allocation8 + $0x94] ss:$8 sps:$4 sm:$0xff]  }
 0x7bb   :  { %4101 = vmatpush1.bf16.msra.mxu1 %v7672_v36  ;;  %3569 = vmatprep.mubr.bf16.mxu0 %v8217_v0  ;;  %v7761_v36 = vld [vmem:[#allocation8 + $0x1a0] ss:$8 sps:$4 sm:$0xff]  }
 0x7bc   :  { %4102 = vmatprep.subr.bf16.mxu1 %v7677_v38  ;;  %3647 = vmatprep.mubr.bf16.mxu1 %v8217_v0  ;;  %v7716_v38 = vld [vmem:[#allocation8 + $0x90] ss:$8 sps:$4 sm:$0xff]  }
 0x7bd   :  { %3888 = vmatpush1.bf16.msra.mxu0 %v7722_v39  ;;  %v7721_v39 = vld [vmem:[#allocation8 + $0x84] ss:$8 sps:$4 sm:$0xff]  }
 0x7be   :  { %3889 = vmatprep.subr.bf16.mxu0 %v7727_v40  ;;  %v7719_v40 = vld [vmem:[#allocation8 + $0x80] ss:$8 sps:$4 sm:$0xff]  }
 0x7bf   :  { %4103 = vmatpush1.bf16.msra.mxu1 %v7675_v11  ;;  %v7766_v11 = vld [vmem:[#allocation8 + $0x274] ss:$8 sps:$4 sm:$0xff]  }
 0x7c0   :  { %4104 = vmatprep.subr.bf16.mxu1 %v7682_v41  ;;  %v7764_v41 = vld [vmem:[#allocation8 + $0x270] ss:$8 sps:$4 sm:$0xff]  }
 0x7c1   :  { %3890 = vmatpush1.bf16.msra.mxu0 %v7725_v42  ;;  %v7767_v42 = vld [vmem:[#allocation8 + $0x190] ss:$8 sps:$4 sm:$0xff]  }
 0x7c2   :  { %6876 = vmatmul.mubr.msk.bf16.gmra.mxu0 %vm3520_vm3, %v7678_v43  ;;  %6884 = vmatmul.mubr.msk.bf16.gmra.mxu1 %vm3520_vm3, %v7679_v44  ;;  %v7769_v43 = vld [vmem:[#allocation8 + $0x194] ss:$8 sps:$4 sm:$0xff]   ;;  %v7770_v44 = vld [vmem:[#allocation8 + $0x260] ss:$8 sps:$4 sm:$0xff]  }
 0x7c3   :  { %4105 = vmatpush1.bf16.msra.mxu1 %v7680_v45  ;;  %4132 = vmatprep.mubr.bf16.mxu1 %v8910_v21  ;;  %v7772_v45 = vld [vmem:[#allocation8 + $0x264] ss:$8 sps:$4 sm:$0xff]  }
 0x7c4   :  { %4106 = vmatprep.subr.bf16.mxu1 %v7685_v46  ;;  %3891 = vmatprep.subr.bf16.mxu0 %v7730_v49  ;;  %v7778_v46 = vld [vmem:[#allocation8 + $0x254] ss:$8 sps:$4 sm:$0xff]   ;;  %v7773_v49 = vld [vmem:[#allocation8 + $0x180] ss:$8 sps:$4 sm:$0xff]  }
 0x7c5   :  { %3892 = vmatpush1.bf16.msra.mxu0 %v7728_v47  ;;  %v7775_v47 = vld [vmem:[#allocation8 + $0x184] ss:$8 sps:$4 sm:$0xff]  }
 0x7c6   :  { %3893 = vmatprep.subr.bf16.mxu0 %v7733_v34  ;;  %v7776_v34 = vld [vmem:[#allocation8 + $0x250] ss:$8 sps:$4 sm:$0xff]  }
 0x7c7   :  { %4107 = vmatpush1.bf16.msra.mxu1 %v7683_v50  ;;  %v7784_v50 = vld [vmem:[#allocation8 + $0x244] ss:$8 sps:$4 sm:$0xff]  }
 0x7c8   :  { %4108 = vmatprep.subr.bf16.mxu1 %v7688_v51  ;;  %v7781_v51 = vld [vmem:[#allocation8 + $0x374] ss:$8 sps:$4 sm:$0xff]  }
 0x7c9   :  { %3894 = vmatpush1.bf16.msra.mxu0 %v7731_v52  ;;  %v7782_v52 = vld [vmem:[#allocation8 + $0x240] ss:$8 sps:$4 sm:$0xff]  }
 0x7ca   :  { %3895 = vmatprep.subr.bf16.mxu0 %v7736_v53  ;;  %v7790_v53 = vld [vmem:[#allocation8 + $0x234] ss:$8 sps:$4 sm:$0xff]  }
 0x7cb   :  { %4109 = vmatpush1.bf16.msra.mxu1 %v7686_v54  ;;  %v7788_v54 = vld [vmem:[#allocation8 + $0x230] ss:$8 sps:$4 sm:$0xff]  }
 0x7cc   :  { %4110 = vmatprep.subr.bf16.mxu1 %v7691_v55  ;;  %v7796_v55 = vld [vmem:[#allocation8 + $0x224] ss:$8 sps:$4 sm:$0xff]  }
 0x7cd   :  { %3896 = vmatpush1.bf16.msra.mxu0 %v7734_v30  ;;  %v7794_v30 = vld [vmem:[#allocation8 + $0x220] ss:$8 sps:$4 sm:$0xff]  }
 0x7ce   :  { %3897 = vmatprep.subr.bf16.mxu0 %v7739_v56  ;;  %v7802_v56 = vld [vmem:[#allocation8 + $0x214] ss:$8 sps:$4 sm:$0xff]  }
 0x7cf   :  { %4111 = vmatpush1.bf16.msra.mxu1 %v7689_v57  ;;  %v7800_v57 = vld [vmem:[#allocation8 + $0x210] ss:$8 sps:$4 sm:$0xff]  }
 0x7d0   :  { %4112 = vmatprep.subr.bf16.mxu1 %v7694_v58  ;;  %v7808_v58 = vld [vmem:[#allocation8 + $0x204] ss:$8 sps:$4 sm:$0xff]  }
 0x7d1   :  { %3898 = vmatpush1.bf16.msra.mxu0 %v7737_v63  ;;  %v7806_v63 = vld [vmem:[#allocation8 + $0x200] ss:$8 sps:$4 sm:$0xff]  }
 0x7d2   :  { %3899 = vmatprep.subr.bf16.mxu0 %v7742_v1  ;;  %v7814_v1 = vld [vmem:[#allocation8 + $0x2f4] ss:$8 sps:$4 sm:$0xff]  }
 0x7d3   :  { %4113 = vmatpush1.bf16.msra.mxu1 %v7692_v2  ;;  %v7812_v2 = vld [vmem:[#allocation8 + $0x2f0] ss:$8 sps:$4 sm:$0xff]  }
 0x7d4   :  { %4114 = vmatprep.subr.bf16.mxu1 %v7697_v3  ;;  %v7820_v3 = vld [vmem:[#allocation8 + $0x2e4] ss:$8 sps:$4 sm:$0xff]  }
 0x7d5   :  { %3900 = vmatpush1.bf16.msra.mxu0 %v7740_v4  ;;  %v7818_v4 = vld [vmem:[#allocation8 + $0x2e0] ss:$8 sps:$4 sm:$0xff]  }
 0x7d6   :  { %3901 = vmatprep.subr.bf16.mxu0 %v7745_v5  ;;  %v7826_v5 = vld [vmem:[#allocation8 + $0x2d4] ss:$8 sps:$4 sm:$0xff]  }
 0x7d7   :  { %4115 = vmatpush1.bf16.msra.mxu1 %v7695_v6  ;;  %v7824_v6 = vld [vmem:[#allocation8 + $0x2d0] ss:$8 sps:$4 sm:$0xff]  }
 0x7d8   :  { %4116 = vmatprep.subr.bf16.mxu1 %v7700_v7  ;;  %v7832_v7 = vld [vmem:[#allocation8 + $0x2c4] ss:$8 sps:$4 sm:$0xff]  }
 0x7d9   :  { %3902 = vmatpush1.bf16.msra.mxu0 %v7743_v8  ;;  %v7830_v8 = vld [vmem:[#allocation8 + $0x2c0] ss:$8 sps:$4 sm:$0xff]  }
 0x7da   :  { %3903 = vmatprep.subr.bf16.mxu0 %v7748_v9  ;;  %v7838_v9 = vld [vmem:[#allocation8 + $0x2b4] ss:$8 sps:$4 sm:$0xff]  }
 0x7db   :  { %4117 = vmatpush2.bf16.msra.mxu1 %v7698_v12  ;;  %v7836_v12 = vld [vmem:[#allocation8 + $0x2b0] ss:$8 sps:$4 sm:$0xff]  }
 0x7dc   :  { %4118 = vmatprep.subr.bf16.mxu1 %v7703_v13  ;;  %v7844_v13 = vld [vmem:[#allocation8 + $0x2a4] ss:$8 sps:$4 sm:$0xff]  }
 0x7dd   :  { %3904 = vmatpush2.bf16.msra.mxu0 %v7746_v14  ;;  %v7842_v14 = vld [vmem:[#allocation8 + $0x2a0] ss:$8 sps:$4 sm:$0xff]  }
 0x7de   :  { %3905 = vmatprep.subr.bf16.mxu0 %v7751_v22  ;;  %v7850_v22 = vld [vmem:[#allocation8 + $0x294] ss:$8 sps:$4 sm:$0xff]  }
 0x7df   :  { %4119 = vmatpush2.bf16.msra.mxu1 %v7701_v15  ;;  %v7848_v15 = vld [vmem:[#allocation8 + $0x290] ss:$8 sps:$4 sm:$0xff]  }
 0x7e0   :  { %4120 = vmatprep.subr.bf16.mxu1 %v7706_v32  ;;  %v7856_v32 = vld [vmem:[#allocation8 + $0x284] ss:$8 sps:$4 sm:$0xff]  }
 0x7e1   :  { %3906 = vmatpush2.bf16.msra.mxu0 %v7749_v16  ;;  %v7854_v16 = vld [vmem:[#allocation8 + $0x280] ss:$8 sps:$4 sm:$0xff]  }
 0x7e2   :  { %3907 = vmatprep.subr.bf16.mxu0 %v7754_v17 }
 0x7e3   :  { %4121 = vmatpush2.bf16.msra.mxu1 %v7704_v20 }
 0x7e4   :  { %4122 = vmatprep.subr.bf16.mxu1 %v7709_v37 }
 0x7e5   :  { %3908 = vmatpush2.bf16.msra.mxu0 %v7752_v31 }
 0x7e6   :  { %3909 = vmatprep.subr.bf16.mxu0 %v7757_v18 }
 0x7e7   :  { %4123 = vmatpush2.bf16.msra.mxu1 %v7707_v48 }
 0x7e8   :  { %4124 = vmatprep.subr.bf16.mxu1 %v7712_v10 }
 0x7e9   :  { %3910 = vmatpush2.bf16.msra.mxu0 %v7755_v23 }
 0x7ea   :  { %3911 = vmatprep.subr.bf16.mxu0 %v7760_v60 }
 0x7eb   :  { %4125 = vmatpush2.bf16.msra.mxu1 %v7710_v62 }
 0x7ec   :  { %4126 = vmatprep.subr.bf16.mxu1 %v7715_v61  ;;  %v7779_v61 = vld [vmem:[#allocation8 + $0x370] ss:$8 sps:$4 sm:$0xff]  }
 0x7ed   :  { %3912 = vmatpush2.bf16.msra.mxu0 %v7758_v27 }
 0x7ee   :  { %3913 = vmatprep.subr.bf16.mxu0 %v7763_v28 }
 0x7ef   :  { %4127 = vmatpush2.bf16.msra.mxu1 %v7713_v33 }
 0x7f0   :  { %4128 = vmatprep.subr.bf16.mxu1 %v7718_v35  ;;  %v7787_v35 = vld [vmem:[#allocation8 + $0x364] ss:$8 sps:$4 sm:$0xff]  }
 0x7f1   :  { %3914 = vmatpush2.bf16.msra.mxu0 %v7761_v36 }
 0x7f2   :  { %3915 = vmatprep.subr.bf16.mxu0 %v7769_v43 }
 0x7f3   :  { %4129 = vmatpush2.bf16.msra.mxu1 %v7716_v38 }
 0x7f4   :  { %4130 = vmatprep.subr.bf16.mxu1 %v7721_v39 }
 0x7f5   :  { %3916 = vmatpush2.bf16.msra.mxu0 %v7767_v42 }
 0x7f6   :  { %3917 = vmatprep.subr.bf16.mxu0 %v7775_v47  ;;  %v7791_v47 = vld [vmem:[#allocation8 + $0x350] ss:$8 sps:$4 sm:$0xff]  }
 0x7f7   :  { %4131 = vmatpush2.bf16.msra.mxu1 %v7719_v40  ;;  %v7785_v40 = vld [vmem:[#allocation8 + $0x360] ss:$8 sps:$4 sm:$0xff]  }
 0x7f8   :  { %4592 = vmatprep.subr.bf16.mxu1 %v7766_v11 }
 0x7f9   :  { %3918 = vmatpush2.bf16.msra.mxu0 %v7773_v49 }
 0x7fa   :  { %4133 = vmatmul.mubr.bf16.vlgmr.msra.gmra.mxu1 %v8916_v29  ;;  %4379 = vmatprep.subr.bf16.mxu0 %v7781_v51  ;;  %v7797_v51 = vld [vmem:[#allocation8 + $0x340] ss:$8 sps:$4 sm:$0xff]  }
 0x7fb   :  { %4142 = vmatprep.mubr.bf16.mxu1 %v8904_v24  ;;  %4593 = vmatpush1.bf16.msra.mxu1 %v7764_v41  ;;  %v7793_v41 = vld [vmem:[#allocation8 + $0x354] ss:$8 sps:$4 sm:$0xff]  }
 0x7fc   :  { %4594 = vmatprep.subr.bf16.mxu1 %v7772_v45 }
 0x7ff   :  { %4595 = vmatpush1.bf16.msra.mxu1 %v7770_v44 }
 0x800   :  { %4596 = vmatprep.subr.bf16.mxu1 %v7778_v46 }
 0x802   :  { %4143 = vmatmul.mubr.bf16.gmra.mxu1 %v8906_v59 }
 0x803   :  { %4597 = vmatpush1.bf16.msra.mxu1 %v7776_v34 }
 0x804   :  { %4598 = vmatprep.subr.bf16.mxu1 %v7784_v50  ;;  %v7799_v50 = vld [vmem:[#allocation8 + $0x344] ss:$8 sps:$4 sm:$0xff]  }
 0x807   :  { %4599 = vmatpush1.bf16.msra.mxu1 %v7782_v52  ;;  %v7805_v52 = vld [vmem:[#allocation8 + $0x334] ss:$8 sps:$4 sm:$0xff]  }
 0x808   :  { %4600 = vmatprep.subr.bf16.mxu1 %v7790_v53  ;;  %v7803_v53 = vld [vmem:[#allocation8 + $0x330] ss:$8 sps:$4 sm:$0xff]  }
 0x80b   :  { %4601 = vmatpush1.bf16.msra.mxu1 %v7788_v54  ;;  %v7811_v54 = vld [vmem:[#allocation8 + $0x324] ss:$8 sps:$4 sm:$0xff]  }
 0x80c   :  { %4602 = vmatprep.subr.bf16.mxu1 %v7796_v55  ;;  %v7809_v55 = vld [vmem:[#allocation8 + $0x320] ss:$8 sps:$4 sm:$0xff]  }
 0x80f   :  { %4603 = vmatpush1.bf16.msra.mxu1 %v7794_v30  ;;  %v7817_v30 = vld [vmem:[#allocation8 + $0x314] ss:$8 sps:$4 sm:$0xff]  }
 0x810   :  { %4604 = vmatprep.subr.bf16.mxu1 %v7802_v56  ;;  %v7815_v56 = vld [vmem:[#allocation8 + $0x310] ss:$8 sps:$4 sm:$0xff]  }
 0x813   :  { %4605 = vmatpush1.bf16.msra.mxu1 %v7800_v57  ;;  %v7823_v57 = vld [vmem:[#allocation8 + $0x304] ss:$8 sps:$4 sm:$0xff]  }
 0x814   :  { %4606 = vmatprep.subr.bf16.mxu1 %v7808_v58  ;;  %v7821_v58 = vld [vmem:[#allocation8 + $0x300] ss:$8 sps:$4 sm:$0xff]  }
 0x817   :  { %4607 = vmatpush1.bf16.msra.mxu1 %v7806_v63  ;;  %v7829_v63 = vld [vmem:[#allocation8 + $0x3f4] ss:$8 sps:$4 sm:$0xff]  }
 0x818   :  { %4608 = vmatprep.subr.bf16.mxu1 %v7814_v1  ;;  %v7835_v1 = vld [vmem:[#allocation8 + $0x3e4] ss:$8 sps:$4 sm:$0xff]  }
 0x81b   :  { %4609 = vmatpush2.bf16.msra.mxu1 %v7812_v2  ;;  %v7833_v2 = vld [vmem:[#allocation8 + $0x3e0] ss:$8 sps:$4 sm:$0xff]  }
 0x81c   :  { %4610 = vmatprep.subr.bf16.mxu1 %v7820_v3  ;;  %v7841_v3 = vld [vmem:[#allocation8 + $0x3d4] ss:$8 sps:$4 sm:$0xff]  }
 0x81f   :  { %4611 = vmatpush2.bf16.msra.mxu1 %v7818_v4  ;;  %v7839_v4 = vld [vmem:[#allocation8 + $0x3d0] ss:$8 sps:$4 sm:$0xff]  }
 0x820   :  { %4612 = vmatprep.subr.bf16.mxu1 %v7826_v5  ;;  %v7847_v5 = vld [vmem:[#allocation8 + $0x3c4] ss:$8 sps:$4 sm:$0xff]  }
 0x823   :  { %4613 = vmatpush2.bf16.msra.mxu1 %v7824_v6  ;;  %v7845_v6 = vld [vmem:[#allocation8 + $0x3c0] ss:$8 sps:$4 sm:$0xff]  }
 0x824   :  { %4614 = vmatprep.subr.bf16.mxu1 %v7832_v7  ;;  %v7853_v7 = vld [vmem:[#allocation8 + $0x3b4] ss:$8 sps:$4 sm:$0xff]  }
 0x827   :  { %4615 = vmatpush2.bf16.msra.mxu1 %v7830_v8  ;;  %v7851_v8 = vld [vmem:[#allocation8 + $0x3b0] ss:$8 sps:$4 sm:$0xff]  }
 0x828   :  { %4616 = vmatprep.subr.bf16.mxu1 %v7838_v9  ;;  %v7859_v9 = vld [vmem:[#allocation8 + $0x3a4] ss:$8 sps:$4 sm:$0xff]  }
 0x82b   :  { %4617 = vmatpush2.bf16.msra.mxu1 %v7836_v12  ;;  %v7857_v12 = vld [vmem:[#allocation8 + $0x3a0] ss:$8 sps:$4 sm:$0xff]  }
 0x82c   :  { %4618 = vmatprep.subr.bf16.mxu1 %v7844_v13  ;;  %v7862_v13 = vld [vmem:[#allocation8 + $0x394] ss:$8 sps:$4 sm:$0xff]  }
 0x82f   :  { %4619 = vmatpush2.bf16.msra.mxu1 %v7842_v14  ;;  %v7860_v14 = vld [vmem:[#allocation8 + $0x390] ss:$8 sps:$4 sm:$0xff]  }
 0x830   :  { %4620 = vmatprep.subr.bf16.mxu1 %v7850_v22  ;;  %v7865_v22 = vld [vmem:[#allocation8 + $0x384] ss:$8 sps:$4 sm:$0xff]  }
 0x833   :  { %4621 = vmatpush2.bf16.msra.mxu1 %v7848_v15  ;;  %v7863_v15 = vld [vmem:[#allocation8 + $0x380] ss:$8 sps:$4 sm:$0xff]  }
 0x834   :  { %4622 = vmatprep.subr.bf16.mxu1 %v7856_v32  ;;  %v4769_v32 = vld [vmem:[#allocation10 + $0x6f8] sm:$0xff] }
 0x837   :  { %4623 = vmatpush2.bf16.msra.mxu1 %v7854_v16  ;;  %v4768_v16 = vld [vmem:[#allocation10 + $0x6f0] sm:$0xff] }
 0x838   :  { %4876 = vmatprep.subr.mxu1 %v4769_v32 }
 0x87a   :  { %v3561_v17 = vpop.f32.mrf.mxu0  ;;  %v3639_v20 = vpop.f32.mrf.mxu1 }
 0x87c   :  { %v3563_v37 = vpop.f32.mrf.mxu0  ;;  %v3641_v31 = vpop.f32.mrf.mxu1 }
 0x87e   :  { %v3565_v18 = vpop.f32.mrf.mxu0  ;;  %v3643_v48 = vpop.f32.mrf.mxu1 }
 0x87f   :  { %v3658_v23 = vpack.c.bf16 %v3643_v48, %v3639_v20  ;;  %v3580_v28 = vpack.c.bf16 %v3565_v18, %v3561_v17  ;;  %v4767_v17 = vld [vmem:[#allocation10 + $0x6e8] sm:$0xff]  ;;  %v4766_v20 = vld [vmem:[#allocation10 + $0x6e0] sm:$0xff] }
 0x880   :  { %v3567_v10 = vpop.f32.mrf.mxu0  ;;  %v3645_v60 = vpop.f32.mrf.mxu1  ;;  %v4763_v18 = vld [vmem:[#allocation10 + $0x6c8] sm:$0xff] }
 0x881   :  { %v3581_v62 = vpack.c.bf16 %v3567_v10, %v3563_v37  ;;  %v3659_v27 = vpack.c.bf16 %v3645_v60, %v3641_v31  ;;  %v4765_v37 = vld [vmem:[#allocation10 + $0x6d8] sm:$0xff]  ;;  %v4764_v31 = vld [vmem:[#allocation10 + $0x6d0] sm:$0xff]  ;;  %v4759_v48 = vld [vmem:[#allocation10 + $0x6a8] sm:$0xff] }
 0x882   :  { %v3571_v33 = vpop.f32.mrf.mxu0  ;;  %v3649_v36 = vpop.f32.mrf.mxu1  ;;  %v4758_v10 = vld [vmem:[#allocation10 + $0x6a0] sm:$0xff]  ;;  %v4756_v60 = vld [vmem:[#allocation10 + $0x690] sm:$0xff] }
 0x883   :  { %3919 = vmatprep.mubr.bf16.mxu0 %v3581_v62  ;;  %4624 = vmatprep.mubr.bf16.mxu1 %v3659_v27  ;;  %v4755_v62 = vld [vmem:[#allocation10 + $0x688] sm:$0xff]  ;;  %v4753_v27 = vld [vmem:[#allocation10 + $0x678] sm:$0xff] }
 0x884   :  { %v3573_v38 = vpop.f32.mrf.mxu0  ;;  %3920 = vmatmul.mubr.bf16.vlgmr.msra.gmra.mxu0 %v3580_v28  ;;  %v3651_v39 = vpop.f32.mrf.mxu1  ;;  %4625 = vmatmul.mubr.bf16.vlgmr.msra.gmra.mxu1 %v3658_v23  ;;  %v4757_v23 = vld [vmem:[#allocation10 + $0x698] sm:$0xff]  ;;  %v4752_v28 = vld [vmem:[#allocation10 + $0x670] sm:$0xff] }
 0x885   :  { %4380 = vmatpush1.bf16.msra.mxu0 %v7779_v61  ;;  %4877 = vmatpush1.msra.mxu1 %v4768_v16  ;;  %v4754_v61 = vld [vmem:[#allocation10 + $0x680] sm:$0xff] }
 0x886   :  { %v3575_v11 = vpop.f32.mrf.mxu0  ;;  %4381 = vmatprep.subr.bf16.mxu0 %v7787_v35  ;;  %v3653_v42 = vpop.f32.mrf.mxu1  ;;  %4878 = vmatprep.subr.mxu1 %v4767_v17  ;;  %v4750_v35 = vld [vmem:[#allocation10 + $0x660] sm:$0xff] }
 0x887   :  { %v3582_v43 = vpack.c.bf16 %v3575_v11, %v3571_v33  ;;  %v3660_v45 = vpack.c.bf16 %v3653_v42, %v3649_v36  ;;  %4879 = vmatpush1.msra.mxu1 %v4766_v20  ;;  %v4751_v33 = vld [vmem:[#allocation10 + $0x668] sm:$0xff]  ;;  %v4749_v36 = vld [vmem:[#allocation10 + $0x658] sm:$0xff] }
 0x888   :  { %v3577_v44 = vpop.f32.mrf.mxu0  ;;  %v3655_v46 = vpop.f32.mrf.mxu1  ;;  %4880 = vmatprep.subr.mxu1 %v4765_v37  ;;  %v4745_v11 = vld [vmem:[#allocation10 + $0x638] sm:$0xff]  ;;  %v4743_v42 = vld [vmem:[#allocation10 + $0x628] sm:$0xff] }
 0x889   :  { %v3583_v49 = vpack.c.bf16 %v3577_v44, %v3573_v38  ;;  %4382 = vmatpush1.bf16.msra.mxu0 %v7785_v40  ;;  %v3661_v34 = vpack.c.bf16 %v3655_v46, %v3651_v39  ;;  %4881 = vmatpush1.msra.mxu1 %v4764_v31  ;;  %v4748_v38 = vld [vmem:[#allocation10 + $0x650] sm:$0xff]  ;;  %v4747_v39 = vld [vmem:[#allocation10 + $0x648] sm:$0xff]  ;;  %v4746_v40 = vld [vmem:[#allocation10 + $0x640] sm:$0xff] }
 0x88a   :  { %4383 = vmatprep.subr.bf16.mxu0 %v7793_v41  ;;  %4882 = vmatprep.subr.mxu1 %v4763_v18  ;;  %v4744_v41 = vld [vmem:[#allocation10 + $0x630] sm:$0xff]  ;;  %v4741_v44 = vld [vmem:[#allocation10 + $0x618] sm:$0xff]  ;;  %v4739_v46 = vld [vmem:[#allocation10 + $0x608] sm:$0xff] }
 0x88b   :  { %3929 = vmatprep.mubr.bf16.mxu0 %v3583_v49  ;;  %4634 = vmatprep.mubr.bf16.mxu1 %v3661_v34  ;;  %v4738_v49 = vld [vmem:[#allocation10 + $0x600] sm:$0xff]  ;;  %v4800_v34 = vld [vmem:[#allocation10 + $0x7f0] sm:$0xff] }
 0x88c   :  { %3930 = vmatmul.mubr.bf16.gmra.mxu0 %v3582_v43  ;;  %4635 = vmatmul.mubr.bf16.gmra.mxu1 %v3660_v45  ;;  %v4742_v43 = vld [vmem:[#allocation10 + $0x620] sm:$0xff]  ;;  %v4740_v45 = vld [vmem:[#allocation10 + $0x610] sm:$0xff] }
 0x88d   :  { %4384 = vmatpush1.bf16.msra.mxu0 %v7791_v47  ;;  %4411 = vmatprep.mubr.bf16.mxu0 %v8910_v21  ;;  %v7827_v21 = vld [vmem:[#allocation8 + $0x3f0] ss:$8 sps:$4 sm:$0xff]  }
 0x88e   :  { %4385 = vmatprep.subr.bf16.mxu0 %v7799_v50  ;;  %v4801_v47 = vld [vmem:[#allocation10 + $0x7f8] sm:$0xff]  ;;  %v4799_v50 = vld [vmem:[#allocation10 + $0x7e8] sm:$0xff] }
 0x891   :  { %4386 = vmatpush1.bf16.msra.mxu0 %v7797_v51  ;;  %v4798_v51 = vld [vmem:[#allocation10 + $0x7e0] sm:$0xff] }
 0x892   :  { %4387 = vmatprep.subr.bf16.mxu0 %v7805_v52  ;;  %v4797_v52 = vld [vmem:[#allocation10 + $0x7d8] sm:$0xff] }
 0x895   :  { %4388 = vmatpush1.bf16.msra.mxu0 %v7803_v53  ;;  %v4796_v53 = vld [vmem:[#allocation10 + $0x7d0] sm:$0xff] }
 0x896   :  { %4389 = vmatprep.subr.bf16.mxu0 %v7811_v54  ;;  %v4795_v54 = vld [vmem:[#allocation10 + $0x7c8] sm:$0xff] }
 0x899   :  { %4390 = vmatpush1.bf16.msra.mxu0 %v7809_v55  ;;  %v4794_v55 = vld [vmem:[#allocation10 + $0x7c0] sm:$0xff] }
 0x89a   :  { %4391 = vmatprep.subr.bf16.mxu0 %v7817_v30  ;;  %v4793_v30 = vld [vmem:[#allocation10 + $0x7b8] sm:$0xff] }
 0x89d   :  { %4392 = vmatpush1.bf16.msra.mxu0 %v7815_v56  ;;  %v4792_v56 = vld [vmem:[#allocation10 + $0x7b0] sm:$0xff] }
 0x89e   :  { %4393 = vmatprep.subr.bf16.mxu0 %v7823_v57  ;;  %v4791_v57 = vld [vmem:[#allocation10 + $0x7a8] sm:$0xff] }
 0x8a1   :  { %4394 = vmatpush1.bf16.msra.mxu0 %v7821_v58  ;;  %v4790_v58 = vld [vmem:[#allocation10 + $0x7a0] sm:$0xff] }
 0x8a2   :  { %4395 = vmatprep.subr.bf16.mxu0 %v7829_v63  ;;  %v4789_v63 = vld [vmem:[#allocation10 + $0x798] sm:$0xff] }
 0x8a5   :  { %4396 = vmatpush2.bf16.msra.mxu0 %v7827_v21  ;;  %v4788_v21 = vld [vmem:[#allocation10 + $0x790] sm:$0xff] }
 0x8a6   :  { %4397 = vmatprep.subr.bf16.mxu0 %v7835_v1  ;;  %v4787_v1 = vld [vmem:[#allocation10 + $0x788] sm:$0xff] }
 0x8a9   :  { %4398 = vmatpush2.bf16.msra.mxu0 %v7833_v2  ;;  %v4786_v2 = vld [vmem:[#allocation10 + $0x780] sm:$0xff] }
 0x8aa   :  { %4399 = vmatprep.subr.bf16.mxu0 %v7841_v3  ;;  %v4785_v3 = vld [vmem:[#allocation10 + $0x778] sm:$0xff] }
 0x8ad   :  { %4400 = vmatpush2.bf16.msra.mxu0 %v7839_v4  ;;  %v4784_v4 = vld [vmem:[#allocation10 + $0x770] sm:$0xff] }
 0x8ae   :  { %4401 = vmatprep.subr.bf16.mxu0 %v7847_v5  ;;  %v4783_v5 = vld [vmem:[#allocation10 + $0x768] sm:$0xff] }
 0x8b1   :  { %4402 = vmatpush2.bf16.msra.mxu0 %v7845_v6  ;;  %v4782_v6 = vld [vmem:[#allocation10 + $0x760] sm:$0xff] }
 0x8b2   :  { %4403 = vmatprep.subr.bf16.mxu0 %v7853_v7  ;;  %v4781_v7 = vld [vmem:[#allocation10 + $0x758] sm:$0xff] }
 0x8b5   :  { %4404 = vmatpush2.bf16.msra.mxu0 %v7851_v8  ;;  %v4780_v8 = vld [vmem:[#allocation10 + $0x750] sm:$0xff] }
 0x8b6   :  { %4405 = vmatprep.subr.bf16.mxu0 %v7859_v9  ;;  %v4779_v9 = vld [vmem:[#allocation10 + $0x748] sm:$0xff] }
 0x8b9   :  { %4406 = vmatpush2.bf16.msra.mxu0 %v7857_v12  ;;  %v4778_v12 = vld [vmem:[#allocation10 + $0x740] sm:$0xff] }
 0x8ba   :  { %4407 = vmatprep.subr.bf16.mxu0 %v7862_v13  ;;  %v4777_v13 = vld [vmem:[#allocation10 + $0x738] sm:$0xff] }
 0x8bd   :  { %4408 = vmatpush2.bf16.msra.mxu0 %v7860_v14  ;;  %v4776_v14 = vld [vmem:[#allocation10 + $0x730] sm:$0xff] }
 0x8be   :  { %4409 = vmatprep.subr.bf16.mxu0 %v7865_v22  ;;  %v4775_v22 = vld [vmem:[#allocation10 + $0x728] sm:$0xff] }
 0x8c1   :  { %4410 = vmatpush2.bf16.msra.mxu0 %v7863_v15  ;;  %v4774_v15 = vld [vmem:[#allocation10 + $0x720] sm:$0xff] }
 0x8c2   :  { %4802 = vmatprep.subr.mxu0 %v4769_v32  ;;  %v4773_v32 = vld [vmem:[#allocation10 + $0x718] sm:$0xff] }
 0x8c4   :  { %4412 = vmatmul.mubr.bf16.vlgmr.msra.gmra.mxu0 %v8916_v29  ;;  %v4760_v29 = vld [vmem:[#allocation10 + $0x6b0] sm:$0xff] }
 0x8c5   :  { %4421 = vmatprep.mubr.bf16.mxu0 %v8904_v24  ;;  %4803 = vmatpush1.msra.mxu0 %v4768_v16  ;;  %v4762_v24 = vld [vmem:[#allocation10 + $0x6c0] sm:$0xff]  ;;  %v4772_v16 = vld [vmem:[#allocation10 + $0x710] sm:$0xff] }
 0x8c6   :  { %4804 = vmatprep.subr.mxu0 %v4767_v17  ;;  %4883 = vmatpush1.msra.mxu1 %v4762_v24  ;;  %v4771_v17 = vld [vmem:[#allocation10 + $0x708] sm:$0xff] }
 0x8c7   :  { %4805 = vmatpush1.msra.mxu0 %v4766_v20  ;;  %v4770_v20 = vld [vmem:[#allocation10 + $0x700] sm:$0xff] }
 0x8c8   :  { %4806 = vmatprep.subr.mxu0 %v4765_v37  ;;  %v4134_v37 = vpop.f32.mrf.mxu1 }
 0x8c9   :  { %4807 = vmatpush1.msra.mxu0 %v4764_v31 }
 0x8ca   :  { %4808 = vmatprep.subr.mxu0 %v4763_v18  ;;  %v4136_v31 = vpop.f32.mrf.mxu1 }
 0x8cb   :  { %4809 = vmatpush1.msra.mxu0 %v4762_v24 }
 0x8cc   :  { %4422 = vmatmul.mubr.bf16.gmra.mxu0 %v8906_v59  ;;  %v4761_v59 = vld [vmem:[#allocation10 + $0x6b8] sm:$0xff]  ;;  %v4138_v18 = vpop.f32.mrf.mxu1 }
 0x8cd   :  { %4810 = vmatprep.subr.mxu0 %v4761_v59  ;;  %4884 = vmatprep.subr.mxu1 %v4761_v59 }
 0x8ce   :  { %4811 = vmatpush1.msra.mxu0 %v4760_v29  ;;  %4885 = vmatpush1.msra.mxu1 %v4760_v29  ;;  %v4140_v59 = vpop.f32.mrf.mxu1 }
 0x8cf   :  { %4812 = vmatprep.subr.mxu0 %v4759_v48  ;;  %4886 = vmatprep.subr.mxu1 %v4759_v48 }
 0x8d0   :  { %4813 = vmatpush1.msra.mxu0 %v4758_v10  ;;  %4887 = vmatpush1.msra.mxu1 %v4758_v10  ;;  %v4144_v48 = vpop.f32.mrf.mxu1 }
 0x8d1   :  { %4814 = vmatprep.subr.mxu0 %v4757_v23  ;;  %4888 = vmatprep.subr.mxu1 %v4757_v23 }
 0x8d2   :  { %4815 = vmatpush1.msra.mxu0 %v4756_v60  ;;  %4889 = vmatpush1.msra.mxu1 %v4756_v60  ;;  %v4146_v23 = vpop.f32.mrf.mxu1 }
 0x8d3   :  { %4816 = vmatprep.subr.mxu0 %v4755_v62  ;;  %4890 = vmatprep.subr.mxu1 %v4755_v62 }
 0x8d4   :  { %4817 = vmatpush1.msra.mxu0 %v4754_v61  ;;  %4891 = vmatpush1.msra.mxu1 %v4754_v61  ;;  %v4148_v62 = vpop.f32.mrf.mxu1 }
 0x8d5   :  { %4818 = vmatprep.subr.mxu0 %v4753_v27  ;;  %4892 = vmatprep.subr.mxu1 %v4753_v27 }
 0x8d6   :  { %4819 = vmatpush1.msra.mxu0 %v4752_v28  ;;  %4893 = vmatpush1.msra.mxu1 %v4752_v28  ;;  %v4150_v27 = vpop.f32.mrf.mxu1 }
 0x8d7   :  { %4820 = vmatprep.subr.mxu0 %v4751_v33  ;;  %4894 = vmatprep.subr.mxu1 %v4751_v33 }
 0x8d8   :  { %4821 = vmatpush1.msra.mxu0 %v4750_v35  ;;  %4895 = vmatpush1.msra.mxu1 %v4750_v35 }
 0x8d9   :  { %4822 = vmatprep.subr.mxu0 %v4749_v36  ;;  %4896 = vmatprep.subr.mxu1 %v4749_v36 }
 0x8da   :  { %4823 = vmatpush1.msra.mxu0 %v4748_v38  ;;  %4897 = vmatpush1.msra.mxu1 %v4748_v38 }
 0x8db   :  { %4824 = vmatprep.subr.mxu0 %v4747_v39  ;;  %4898 = vmatprep.subr.mxu1 %v4747_v39 }
 0x8dc   :  { %4825 = vmatpush1.msra.mxu0 %v4746_v40  ;;  %4899 = vmatpush1.msra.mxu1 %v4746_v40 }
 0x8dd   :  { %4826 = vmatprep.subr.mxu0 %v4745_v11  ;;  %4900 = vmatprep.subr.mxu1 %v4745_v11 }
 0x8de   :  { %4827 = vmatpush1.msra.mxu0 %v4744_v41  ;;  %4901 = vmatpush1.msra.mxu1 %v4744_v41 }
 0x8df   :  { %4828 = vmatprep.subr.mxu0 %v4743_v42  ;;  %4902 = vmatprep.subr.mxu1 %v4743_v42 }
 0x8e0   :  { %4829 = vmatpush1.msra.mxu0 %v4742_v43  ;;  %4903 = vmatpush1.msra.mxu1 %v4742_v43 }
 0x8e1   :  { %4830 = vmatprep.subr.mxu0 %v4741_v44  ;;  %4904 = vmatprep.subr.mxu1 %v4741_v44 }
 0x8e2   :  { %4831 = vmatpush1.msra.mxu0 %v4740_v45  ;;  %4905 = vmatpush1.msra.mxu1 %v4740_v45 }
 0x8e3   :  { %4832 = vmatprep.subr.mxu0 %v4739_v46  ;;  %4906 = vmatprep.subr.mxu1 %v4739_v46 }
 0x8e4   :  { %4833 = vmatpush1.msra.mxu0 %v4738_v49  ;;  %4907 = vmatpush1.msra.mxu1 %v4738_v49 }
 0x8e5   :  { %4834 = vmatprep.subr.mxu0 %v4801_v47  ;;  %4908 = vmatprep.subr.mxu1 %v4801_v47 }
 0x8e6   :  { %4835 = vmatpush2.msra.mxu0 %v4800_v34  ;;  %4909 = vmatpush2.msra.mxu1 %v4800_v34 }
 0x8e7   :  { %4836 = vmatprep.subr.mxu0 %v4799_v50  ;;  %4910 = vmatprep.subr.mxu1 %v4799_v50 }
 0x8e8   :  { %4837 = vmatpush2.msra.mxu0 %v4798_v51  ;;  %4911 = vmatpush2.msra.mxu1 %v4798_v51 }
 0x8e9   :  { %4838 = vmatprep.subr.mxu0 %v4797_v52  ;;  %4912 = vmatprep.subr.mxu1 %v4797_v52 }
 0x8ea   :  { %4839 = vmatpush2.msra.mxu0 %v4796_v53  ;;  %4913 = vmatpush2.msra.mxu1 %v4796_v53 }
 0x8eb   :  { %4840 = vmatprep.subr.mxu0 %v4795_v54  ;;  %4914 = vmatprep.subr.mxu1 %v4795_v54 }
 0x8ec   :  { %4841 = vmatpush2.msra.mxu0 %v4794_v55  ;;  %4915 = vmatpush2.msra.mxu1 %v4794_v55 }
 0x8ed   :  { %4842 = vmatprep.subr.mxu0 %v4793_v30  ;;  %4916 = vmatprep.subr.mxu1 %v4793_v30 }
 0x8ee   :  { %4843 = vmatpush2.msra.mxu0 %v4792_v56  ;;  %4917 = vmatpush2.msra.mxu1 %v4792_v56 }
 0x8ef   :  { %4844 = vmatprep.subr.mxu0 %v4791_v57  ;;  %4918 = vmatprep.subr.mxu1 %v4791_v57 }
 0x8f0   :  { %4845 = vmatpush2.msra.mxu0 %v4790_v58  ;;  %4919 = vmatpush2.msra.mxu1 %v4790_v58 }
 0x8f1   :  { %4846 = vmatprep.subr.mxu0 %v4789_v63  ;;  %4920 = vmatprep.subr.mxu1 %v4789_v63 }
 0x8f2   :  { %4847 = vmatpush2.msra.mxu0 %v4788_v21  ;;  %4921 = vmatpush2.msra.mxu1 %v4788_v21 }
 0x8f3   :  { %4848 = vmatprep.subr.mxu0 %v4787_v1  ;;  %4922 = vmatprep.subr.mxu1 %v4787_v1 }
 0x8f4   :  { %4849 = vmatpush2.msra.mxu0 %v4786_v2  ;;  %4923 = vmatpush2.msra.mxu1 %v4786_v2 }
 0x8f5   :  { %4850 = vmatprep.subr.mxu0 %v4785_v3  ;;  %4924 = vmatprep.subr.mxu1 %v4785_v3 }
 0x8f6   :  { %4851 = vmatpush2.msra.mxu0 %v4784_v4  ;;  %4925 = vmatpush2.msra.mxu1 %v4784_v4 }
 0x8f7   :  { %4852 = vmatprep.subr.mxu0 %v4783_v5  ;;  %4926 = vmatprep.subr.mxu1 %v4783_v5 }
 0x8f8   :  { %4853 = vmatpush2.msra.mxu0 %v4782_v6  ;;  %4927 = vmatpush2.msra.mxu1 %v4782_v6 }
 0x8f9   :  { %4854 = vmatprep.subr.mxu0 %v4781_v7  ;;  %4928 = vmatprep.subr.mxu1 %v4781_v7 }
 0x8fa   :  { %4855 = vmatpush2.msra.mxu0 %v4780_v8  ;;  %4929 = vmatpush2.msra.mxu1 %v4780_v8 }
 0x8fb   :  { %4856 = vmatprep.subr.mxu0 %v4779_v9  ;;  %4930 = vmatprep.subr.mxu1 %v4779_v9 }
 0x8fc   :  { %4857 = vmatpush2.msra.mxu0 %v4778_v12  ;;  %4931 = vmatpush2.msra.mxu1 %v4778_v12 }
 0x8fd   :  { %4858 = vmatprep.subr.mxu0 %v4777_v13  ;;  %4932 = vmatprep.subr.mxu1 %v4777_v13 }
 0x8fe   :  { %4859 = vmatpush2.msra.mxu0 %v4776_v14  ;;  %4933 = vmatpush2.msra.mxu1 %v4776_v14 }
 0x8ff   :  { %4860 = vmatprep.subr.mxu0 %v4775_v22  ;;  %4934 = vmatprep.subr.mxu1 %v4775_v22 }
 0x900   :  { %4861 = vmatpush2.msra.mxu0 %v4774_v15  ;;  %4935 = vmatpush2.msra.mxu1 %v4774_v15 }
 0x901   :  { %4862 = vmatprep.subr.mxu0 %v4773_v32  ;;  %4936 = vmatprep.subr.mxu1 %v4773_v32 }
 0x902   :  { %4863 = vmatpush2.msra.mxu0 %v4772_v16  ;;  %4937 = vmatpush2.msra.mxu1 %v4772_v16 }
 0x903   :  { %4864 = vmatprep.subr.mxu0 %v4771_v17  ;;  %4938 = vmatprep.subr.mxu1 %v4771_v17 }
 0x904   :  { %4865 = vmatpush2.msra.mxu0 %v4770_v20  ;;  %4939 = vmatpush2.msra.mxu1 %v4770_v20 }
 0x944   :  { %v3921_v24 = vpop.f32.mrf.mxu0  ;;  %v4626_v28 = vpop.f32.mrf.mxu1 }
 0x945   :  { %v8954_v43 = vadd.f32 %v4134_v37, %v3921_v24 }
 0x946   :  { %v3923_v29 = vpop.f32.mrf.mxu0  ;;  %v4628_v35 = vpop.f32.mrf.mxu1 }
 0x947   :  { %v8950_v41 = vadd.f32 %v4136_v31, %v3923_v29  ;;  %v4663_v54 = vmul.f32 %v8954_v43, %v8954_v43 }
 0x948   :  { %v3925_v10 = vpop.f32.mrf.mxu0  ;;  %v4630_v39 = vpop.f32.mrf.mxu1 }
 0x949   :  { %v8948_v40 = vadd.f32 %v4138_v18, %v3925_v10  ;;  %v4664_v34 = vmul.f32 %v8950_v41, %v8950_v41 }
 0x94a   :  { %v3927_v60 = vpop.f32.mrf.mxu0  ;;  %v4632_v49 = vpop.f32.mrf.mxu1 }
 0x94b   :  { %v8946_v38 = vadd.f32 %v4140_v59, %v3927_v60  ;;  %v4665_v47 = vmul.f32 %v8948_v40, %v8948_v40  ;;  %v4645_v55 = vadd.f32 %v8948_v40, %v8954_v43 }
 0x94c   :  { %v3931_v61 = vpop.f32.mrf.mxu0  ;;  %v4636_v63 = vpop.f32.mrf.mxu1 }
 0x94d   :  { %v4666_v44 = vmul.f32 %v8946_v38, %v8946_v38  ;;  %v8958_v45 = vadd.f32 %v4144_v48, %v3931_v61  ;;  %v4654_v50 = vadd.f32 %v8946_v38, %v8950_v41  ;;  %v4671_v1 = vadd.f32 %v4665_v47, %v4663_v54 }
 0x94e   :  { %v3933_v33 = vpop.f32.mrf.mxu0  ;;  %v4638_v13 = vpop.f32.mrf.mxu1 }
 0x94f   :  { %v8952_v42 = vadd.f32 %v4146_v23, %v3933_v33  ;;  %v4680_v30 = vadd.f32 %v4666_v44, %v4664_v34  ;;  %v4667_v56 = vmul.f32 %v8958_v45, %v8958_v45  ;;  %v4646_v2 = vadd.f32 %v4645_v55, %v8958_v45 }
 0x950   :  { %v3935_v36 = vpop.f32.mrf.mxu0  ;;  %v4640_v29 = vpop.f32.mrf.mxu1 }
 0x951   :  { %v4668_v51 = vmul.f32 %v8952_v42, %v8952_v42  ;;  %v8970_v52 = vadd.f32 %v4148_v62, %v3935_v36  ;;  %v4655_v57 = vadd.f32 %v4654_v50, %v8952_v42  ;;  %v4672_v8 = vadd.f32 %v4671_v1, %v4667_v56 }
 0x952   :  { %v3937_v11 = vpop.f32.mrf.mxu0  ;;  %v4642_v34 = vpop.f32.mrf.mxu1 }
 0x953   :  { %v8960_v46 = vadd.f32 %v4150_v27, %v3937_v11  ;;  %v4681_v3 = vadd.f32 %v4680_v30, %v4668_v51  ;;  %v4669_v4 = vmul.f32 %v8970_v52, %v8970_v52  ;;  %v4647_v9 = vadd.f32 %v4646_v2, %v8970_v52 }
 0x955   :  { %v4670_v58 = vmul.f32 %v8960_v46, %v8960_v46  ;;  %v4656_v5 = vadd.f32 %v4655_v57, %v8960_v46  ;;  %v4673_v32 = vadd.f32 %v4672_v8, %v4669_v4  ;;  %v4648_v18 = vrot.slane %v4647_v9, 4 }
 0x957   :  { %v4682_v12 = vadd.f32 %v4681_v3, %v4670_v58  ;;  %v4657_v16 = vrot.slane %v4656_v5, 4  ;;  %v4674_v61 = vrot.slane %v4673_v32, 4 }
 0x959   :  { %v4683_v24 = vrot.slane %v4682_v12, 4  ;;  %v4658_v27 = vadd.f32 %v4657_v16, %v4656_v5  ;;  %v4675_v57 = vadd.f32 %v4674_v61, %v4673_v32 }
 0x95b   :  { %v4684_v47 = vadd.f32 %v4683_v24, %v4682_v12  ;;  %v4659_v58 = vrot.slane %v4658_v27, 2 }
 0x95d   :  { %v4685_v5 = vrot.slane %v4684_v47, 2 }
 0x95f   :  { %v4686_v24 = vadd.f32 %v4685_v5, %v4684_v47 }
 0x984   :  { %v4413_v53 = vpop.f32.mrf.mxu0 }
 0x985   :  { %v8988_v14 = vadd.f32 %v4626_v28, %v4413_v53 }
 0x986   :  { %v4415_v21 = vpop.f32.mrf.mxu0 }
 0x987   :  { %v8992_v17 = vadd.f32 %v4628_v35, %v4415_v21  ;;  %v4709_v59 = vmul.f32 %v8988_v14, %v8988_v14 }
 0x988   :  { %v4417_v6 = vpop.f32.mrf.mxu0 }
 0x989   :  { %v8985_v7 = vadd.f32 %v4630_v39, %v4417_v6  ;;  %v4710_v28 = vmul.f32 %v8992_v17, %v8992_v17 }
 0x98a   :  { %v4419_v22 = vpop.f32.mrf.mxu0 }
 0x98b   :  { %v8990_v15 = vadd.f32 %v4632_v49, %v4419_v22  ;;  %v4711_v20 = vmul.f32 %v8985_v7, %v8985_v7  ;;  %v4689_v23 = vadd.f32 %v8985_v7, %v8988_v14  ;;  %v4649_v49 = vadd.f32 %v4648_v18, %v4647_v9 }
 0x98c   :  { %v4423_v37 = vpop.f32.mrf.mxu0  ;;  %v4660_v22 = vadd.f32 %v4659_v58, %v4658_v27  ;;  %v4687_v27 = vrot.slane %v4686_v24, 1 }
 0x98d   :  { %v8996_v31 = vadd.f32 %v4636_v63, %v4423_v37  ;;  %v4712_v48 = vmul.f32 %v8990_v15, %v8990_v15  ;;  %v4717_v33 = vadd.f32 %v4711_v20, %v4709_v59  ;;  %v4698_v36 = vadd.f32 %v8990_v15, %v8992_v17 }
 0x98e   :  { %v4425_v10 = vpop.f32.mrf.mxu0  ;;  %v4650_v4 = vrot.slane %v4649_v49, 2  ;;  %v4688_v58 = vadd.f32 %v4687_v27, %v4686_v24 }
 0x98f   :  { %v4713_v60 = vmul.f32 %v8996_v31, %v8996_v31  ;;  %v9006_v62 = vadd.f32 %v4638_v13, %v4425_v10  ;;  %v4690_v39 = vadd.f32 %v4689_v23, %v8996_v31  ;;  %v4726_v50 = vadd.f32 %v4712_v48, %v4710_v28 }
 0x990   :  { %v4427_v35 = vpop.f32.mrf.mxu0  ;;  %v4676_v13 = vrot.slane %v4675_v57, 2  ;;  %v4651_v18 = vadd.f32 %v4650_v4, %v4649_v49 }
 0x991   :  { %v4714_v11 = vmul.f32 %v9006_v62, %v9006_v62  ;;  %v9015_v44 = vadd.f32 %v4640_v29, %v4427_v35  ;;  %v4718_v51 = vadd.f32 %v4717_v33, %v4713_v60  ;;  %v4699_v54 = vadd.f32 %v4698_v36, %v9006_v62 }
 0x992   :  { %v4429_v53 = vpop.f32.mrf.mxu0  ;;  %v4677_v23 = vadd.f32 %v4676_v13, %v4675_v57  ;;  %v4661_v60 = vrot.slane %v4660_v22, 1  ;;  %v4652_v36 = vrot.slane %v4651_v18, 1 }
 0x993   :  { %v4691_v55 = vadd.f32 %v4690_v39, %v9015_v44  ;;  %v4715_v30 = vmul.f32 %v9015_v44, %v9015_v44  ;;  %v9021_v56 = vadd.f32 %v4642_v34, %v4429_v53  ;;  %v4727_v63 = vadd.f32 %v4726_v50, %v4714_v11 }
 0x994   :  { %v4678_v50 = vrot.slane %v4677_v23, 1  ;;  %v4662_v53 = vadd.f32 %v4661_v60, %v4660_v22 }
 0x995   :  { %v4692_v21 = vrot.slane %v4691_v55, 4  ;;  %v4719_v1 = vadd.f32 %v4718_v51, %v4715_v30  ;;  %v4700_v2 = vadd.f32 %v4699_v54, %v9021_v56  ;;  %v4716_v3 = vmul.f32 %v9021_v56, %v9021_v56 }
 0x996   :  { %v4653_v54 = vadd.f32 %v4652_v36, %v4651_v18 }
 0x997   :  { %v4693_v6 = vadd.f32 %v4692_v21, %v4691_v55  ;;  %v4720_v8 = vrot.slane %v4719_v1, 4  ;;  %v4701_v9 = vrot.slane %v4700_v2, 4  ;;  %v4728_v12 = vadd.f32 %v4727_v63, %v4716_v3 }
 0x998   :  { %v4679_v63 = vadd.f32 %v4678_v50, %v4677_v23 }
 0x999   :  { %v4694_v16 = vrot.slane %v4693_v6, 2  ;;  %v4721_v20 = vadd.f32 %v4720_v8, %v4719_v1  ;;  %v4702_v32 = vadd.f32 %v4701_v9, %v4700_v2  ;;  %v4729_v37 = vrot.slane %v4728_v12, 4 }
 0x99b   :  { %v4695_v59 = vadd.f32 %v4694_v16, %v4693_v6  ;;  %v4722_v29 = vrot.slane %v4721_v20, 2  ;;  %v4703_v48 = vrot.slane %v4702_v32, 2  ;;  %v4730_v10 = vadd.f32 %v4729_v37, %v4728_v12 }
 0x99d   :  { %v4696_v61 = vrot.slane %v4695_v59, 1  ;;  %v4723_v28 = vadd.f32 %v4722_v29, %v4721_v20  ;;  %v4704_v33 = vadd.f32 %v4703_v48, %v4702_v32  ;;  %v4731_v35 = vrot.slane %v4730_v10, 2 }
 0x99f   :  { %v4724_v39 = vrot.slane %v4723_v28, 1  ;;  %v4705_v11 = vrot.slane %v4704_v33, 1  ;;  %v4732_v34 = vadd.f32 %v4731_v35, %v4730_v10  ;;  %v4697_v51 = vadd.f32 %v4696_v61, %v4695_v59  ;;  %v7013_v10 = vld [vmem:[%s9651_s11 + $0x6] sm:$0x3] }
 0x9a1   :  { %v4706_v49 = vadd.f32 %v4705_v11, %v4704_v33  ;;  %v4733_v47 = vrot.slane %v4732_v34, 1  ;;  %v4725_v55 = vadd.f32 %v4724_v39, %v4723_v28  ;;  %v4707_v21 = vadd.f32 %v4697_v51, %v4653_v54  ;;  %v7014_v11 = vld [vmem:[%s9652_s12 + $0x6] sm:$0x3] }
 0x9a3   :  { %v4708_v30 = vadd.f32 %v4706_v49, %v4662_v53  ;;  %v4734_v57 = vadd.f32 %v4733_v47, %v4732_v34  ;;  %v4735_v2 = vadd.f32 %v4725_v55, %v4679_v63 }
 0x9a5   :  { %4866 = vmatprep.mubr.f32.mxu0 %v4708_v30  ;;  %v4736_v1 = vadd.f32 %v4734_v57, %v4688_v58 }
 0x9a6   :  { %4867 = vmatmul.mubr.f32.vlgmr.msra.gmra.mxu0 %v4707_v21 }
 0x9a7   :  { %4940 = vmatprep.mubr.f32.mxu1 %v4736_v1  ;;  %5184 = vmatprep.mubr.bf16.mxu0 %v8217_v0 }
 0x9a8   :  { %4941 = vmatmul.mubr.f32.vlgmr.msra.gmra.mxu1 %v4735_v2 }
 0x9a9   :  { %5306 = vmatprep.mubr.bf16.mxu1 %v8217_v0 }
 0xa66   :  { %v4868_v3 = vpop.f32.mrf.mxu0 }
 0xa67   :  { %v4874_v4 = vmul.f32 0.00048828125, %v4868_v3 }
 0xa68   :  { %v4870_v5 = vpop.f32.mrf.mxu0  ;;  %v4942_v6 = vpop.f32.mrf.mxu1 }
 0xa69   :  { %v4949_v8 = vmul.f32 %v4874_v4, %v4874_v4  ;;  %v4875_v9 = vmul.f32 0.00048828125, %v4870_v5  ;;  %v4947_v12 = vmul.f32 0.00048828125, %v4942_v6 }
 0xa6a   :  { %v4944_v13 = vpop.f32.mrf.mxu1 }
 0xa6b   :  { %v4950_v22 = vmul.f32 %v4875_v9, %v4875_v9  ;;  %v4951_v16 = vsub.f32 %v4947_v12, %v4949_v8  ;;  %v4948_v20 = vmul.f32 0.00048828125, %v4944_v13 }
 0xa6d   :  { %v4953_v32 = vadd.f32 1e-05, %v4951_v16  ;;  %v4952_v37 = vsub.f32 %v4948_v20, %v4950_v22 }
 0xa6f   :  { %v4954_v18 = vadd.f32 1e-05, %v4952_v37  ;;  %8078 = vrsqrt.f32 %v4953_v32 }
 0xa71   :  { %8080 = vrsqrt.f32 %v4954_v18 }
 0xa7c   :  { %v8079_v24 = vpop.eup %8078 }
 0xa7e   :  { %v8081_v59 = vpop.eup %8080 }
 0xa7f   :  { %v4961_v29 = vcombine.low %v8079_v24, %v8081_v59 }
 0xa81   :  { %v4968_v48 = vrot.slane %v4961_v29, %v8347_v19 }
 0xa83   :  { %v4975_v23 = vrot.slane %v4968_v48, %v8347_v19 }
 0xa85   :  { %v4977_v60 = vmul.f32 %v7013_v10, %v4975_v23 }
 0xa87   :  { %v4984_v61 = vrot.slane %v4977_v60, %v8354_v25  ;;  %v4988_v28 = vrot.slane %v4977_v60, %v8356_v26 }
 0xa89   :  { %v4991_v33 = vmul.f32 %v4984_v61, %v4874_v4  ;;  %v4992_v35 = vmul.f32 %v4988_v28, %v4875_v9  ;;  %v5052_v34 = vmul.f32 %v4988_v28, %v9006_v62  ;;  %v5054_v51 = vmul.f32 %v4988_v28, %v9021_v56 }
 0xa8a   :  { %v5051_v53 = vmul.f32 %v4984_v61, %v8996_v31  ;;  %v5053_v49 = vmul.f32 %v4984_v61, %v9015_v44  ;;  %v5048_v47 = vmul.f32 %v4988_v28, %v8992_v17  ;;  %v5050_v54 = vmul.f32 %v4988_v28, %v8990_v15 }
 0xa8b   :  { %v4995_v36 = vcombine.low %v4991_v33, %v4992_v35  ;;  %v5047_v55 = vmul.f32 %v4984_v61, %v8988_v14  ;;  %v5049_v30 = vmul.f32 %v4984_v61, %v8985_v7  ;;  %v5017_v62 = vmul.f32 %v4988_v28, %v8952_v42  ;;  %v7870_v35 = vld [vmem:[%s9645_s5 + $0x74] ss:$8 sps:$4 sm:$0xff]  }
 0xa8c   :  { %v5019_v56 = vmul.f32 %v4988_v28, %v8960_v46  ;;  %v5016_v31 = vmul.f32 %v4984_v61, %v8958_v45  ;;  %v5018_v44 = vmul.f32 %v4984_v61, %v8970_v52  ;;  %v5013_v17 = vmul.f32 %v4988_v28, %v8950_v41 }
 0xa8d   :  { %v5002_v39 = vrot.slane %v4995_v36, %v8347_v19  ;;  %v5015_v15 = vmul.f32 %v4988_v28, %v8946_v38  ;;  %v5012_v37 = vmul.f32 %v4984_v61, %v8954_v43  ;;  %v5014_v18 = vmul.f32 %v4984_v61, %v8948_v40  ;;  %v7924_v36 = vld [vmem:[%s9645_s5 + $0x174] ss:$8 sps:$4 sm:$0xff]  }
 0xa8f   :  { %v5009_v27 = vrot.slane %v5002_v39, %v8347_v19 }
 0xa91   :  { %v5011_v50 = vsub.f32 %v7014_v11, %v5009_v27  ;;  %v7866_v11 = vld [vmem:[%s9649_s9] sm:$0xff]  }
 0xa92   :  { %v7867_v27 = vld [vmem:[%s9649_s9 + $0x20] sm:$0xff]  }
 0xa93   :  { %v5028_v58 = vrot.slane %v5011_v50, %v8356_v26  ;;  %v5024_v19 = vrot.slane %v5011_v50, %v8354_v25  ;;  %v7873_v50 = vld [vmem:[%s9645_s5 + $0x64] ss:$8 sps:$4 sm:$0xff]  }
 0xa95   :  { %v5060_v57 = vadd.f32 %v5052_v34, %v5028_v58  ;;  %v5062_v14 = vadd.f32 %v5054_v51, %v5028_v58  ;;  %v5059_v63 = vadd.f32 %v5051_v53, %v5024_v19  ;;  %v5061_v7 = vadd.f32 %v5053_v49, %v5024_v19  ;;  %v7868_v34 = vld [vmem:[%s9645_s5 + $0x70] ss:$8 sps:$4 sm:$0xff]   ;;  %v7927_v53 = vld [vmem:[%s9645_s5 + $0x164] ss:$8 sps:$4 sm:$0xff]   ;;  %v7871_v49 = vld [vmem:[%s9645_s5 + $0x60] ss:$8 sps:$4 sm:$0xff]  }
 0xa96   :  { %v5056_v21 = vadd.f32 %v5048_v47, %v5028_v58  ;;  %v5058_v26 = vadd.f32 %v5050_v54, %v5028_v58  ;;  %v5055_v1 = vadd.f32 %v5047_v55, %v5024_v19  ;;  %v5057_v25 = vadd.f32 %v5049_v30, %v5024_v19  ;;  %v7922_v51 = vld [vmem:[%s9645_s5 + $0x170] ss:$8 sps:$4 sm:$0xff]   ;;  %v7878_v47 = vld [vmem:[%s9645_s5 + $0x54] ss:$8 sps:$4 sm:$0xff]   ;;  %v7925_v54 = vld [vmem:[%s9645_s5 + $0x160] ss:$8 sps:$4 sm:$0xff]  }
 0xa97   :  { %v5068_v2 = vmax.f32 %v5060_v57, 0.0  ;;  %v5070_v42 = vmax.f32 %v5062_v14, 0.0  ;;  %v5067_v3 = vmax.f32 %v5059_v63, 0.0  ;;  %v5069_v46 = vmax.f32 %v5061_v7, 0.0  ;;  %v7874_v55 = vld [vmem:[%s9649_s9 + $0x8] sm:$0xff]   ;;  %v7883_v57 = vld [vmem:[%s9649_s9 + $0x30] sm:$0xff]  }
 0xa98   :  { %v5064_v4 = vmax.f32 %v5056_v21, 0.0  ;;  %v5066_v45 = vmax.f32 %v5058_v26, 0.0  ;;  %v5063_v5 = vmax.f32 %v5055_v1, 0.0  ;;  %v5065_v52 = vmax.f32 %v5057_v25, 0.0  ;;  %v7875_v30 = vld [vmem:[%s9649_s9 + $0x28] sm:$0xff]  }
 0xa99   :  { %v9056_v6 = vpack.c.bf16 %v5070_v42, %v5068_v2  ;;  %v9058_v41 = vpack.c.bf16 %v5069_v46, %v5067_v3  ;;  %v5036_v38 = vadd.f32 %v5028_v58, %v5017_v62  ;;  %v5038_v8 = vadd.f32 %v5028_v58, %v5019_v56  ;;  %v7930_v62 = vld [vmem:[%s9645_s5 + $0x154] ss:$8 sps:$4 sm:$0xff]   ;;  %v7928_v56 = vld [vmem:[%s9645_s5 + $0x150] ss:$8 sps:$4 sm:$0xff]   ;;  %v7889_v63 = vld [vmem:[%s9645_s5 + $0x24] ss:$8 sps:$4 sm:$0xff]  }
 0xa9a   :  { %v9060_v9 = vpack.c.bf16 %v5066_v45, %v5064_v4  ;;  %v5035_v12 = vadd.f32 %v5024_v19, %v5016_v31  ;;  %v5037_v13 = vadd.f32 %v5024_v19, %v5018_v44  ;;  %v5032_v20 = vadd.f32 %v5028_v58, %v5013_v17  ;;  %v7879_v31 = vld [vmem:[%s9645_s5 + $0x40] ss:$8 sps:$4 sm:$0xff]   ;;  %v7933_v44 = vld [vmem:[%s9645_s5 + $0x144] ss:$8 sps:$4 sm:$0xff]   ;;  %v7886_v17 = vld [vmem:[%s9645_s5 + $0x34] ss:$8 sps:$4 sm:$0xff]  }
 0xa9b   :  { %5160 = vmatprep.subr.bf16.mxu0 %v9056_v6  ;;  %5282 = vmatprep.subr.bf16.mxu1 %v9056_v6  ;;  %v5044_v22 = vmax.f32 %v5036_v38, 0.0  ;;  %v5046_v16 = vmax.f32 %v5038_v8, 0.0  ;;  %v5034_v32 = vadd.f32 %v5028_v58, %v5015_v15  ;;  %v9070_v24 = vpack.c.bf16 %v5065_v52, %v5063_v5  ;;  %v7876_v58 = vld [vmem:[%s9645_s5 + $0x50] ss:$8 sps:$4 sm:$0xff]   ;;  %v7931_v7 = vld [vmem:[%s9645_s5 + $0x140] ss:$8 sps:$4 sm:$0xff]  }
 0xa9c   :  { %5161 = vmatpush1.bf16.msra.mxu0 %v9058_v41  ;;  %5283 = vmatpush1.bf16.msra.mxu1 %v9058_v41  ;;  %v5043_v59 = vmax.f32 %v5035_v12, 0.0  ;;  %v5045_v29 = vmax.f32 %v5037_v13, 0.0  ;;  %v5031_v48 = vadd.f32 %v5024_v19, %v5012_v37  ;;  %v5033_v10 = vadd.f32 %v5024_v19, %v5014_v18  ;;  %v7881_v19 = vld [vmem:[%s9645_s5 + $0x44] ss:$8 sps:$4 sm:$0xff]   ;;  %v7882_v15 = vld [vmem:[%s9649_s9 + $0x10] sm:$0xff]   ;;  %v7890_v2 = vld [vmem:[%s9649_s9 + $0x18] sm:$0xff]  }
 0xa9d   :  { %5162 = vmatprep.subr.bf16.mxu0 %v9060_v9  ;;  %5284 = vmatprep.subr.bf16.mxu1 %v9060_v9  ;;  %v9072_v23 = vpack.c.bf16 %v5046_v16, %v5044_v22  ;;  %v5040_v60 = vmax.f32 %v5032_v20, 0.0  ;;  %v5042_v28 = vmax.f32 %v5034_v32, 0.0  ;;  %v7884_v14 = vld [vmem:[%s9645_s5 + $0x30] ss:$8 sps:$4 sm:$0xff]   ;;  %v7936_v21 = vld [vmem:[%s9645_s5 + $0x134] ss:$8 sps:$4 sm:$0xff]  }
 0xa9e   :  { %v9078_v40 = vpack.c.bf16 %v5045_v29, %v5043_v59  ;;  %v5039_v43 = vmax.f32 %v5031_v48, 0.0  ;;  %v5041_v61 = vmax.f32 %v5033_v10, 0.0  ;;  %v7887_v26 = vld [vmem:[%s9645_s5 + $0x20] ss:$8 sps:$4 sm:$0xff]   ;;  %v7894_v1 = vld [vmem:[%s9645_s5 + $0x14] ss:$8 sps:$4 sm:$0xff]  }
 0xa9f   :  { %v9080_v33 = vpack.c.bf16 %v5042_v28, %v5040_v60  ;;  %v7934_v25 = vld [vmem:[%s9645_s5 + $0x130] ss:$8 sps:$4 sm:$0xff]   ;;  %v7897_v3 = vld [vmem:[%s9645_s5 + $0x4] ss:$8 sps:$4 sm:$0xff]   ;;  %v7937_v4 = vld [vmem:[%s9645_s5 + $0x120] ss:$8 sps:$4 sm:$0xff]  }
 0xaa0   :  { %5163 = vmatpush1.bf16.msra.mxu0 %v9070_v24  ;;  %5285 = vmatpush1.bf16.msra.mxu1 %v9070_v24  ;;  %v9092_v39 = vpack.c.bf16 %v5041_v61, %v5039_v43  ;;  %v7891_v42 = vld [vmem:[%s9649_s9 + $0x38] sm:$0xff]   ;;  %v7939_v46 = vld [vmem:[%s9645_s5 + $0x124] ss:$8 sps:$4 sm:$0xff]   ;;  %v7895_v5 = vld [vmem:[%s9645_s5] ss:$8 sps:$4 sm:$0xff]  }
 0xaa1   :  { %5164 = vmatprep.subr.bf16.mxu0 %v9072_v23  ;;  %5286 = vmatprep.subr.bf16.mxu1 %v9072_v23  ;;  %v7942_v45 = vld [vmem:[%s9645_s5 + $0x114] ss:$8 sps:$4 sm:$0xff]   ;;  %v7940_v38 = vld [vmem:[%s9645_s5 + $0x110] ss:$8 sps:$4 sm:$0xff]   ;;  %v7945_v8 = vld [vmem:[%s9645_s5 + $0x104] ss:$8 sps:$4 sm:$0xff]  }
 0xaa2   :  { %v7900_v52 = vld [vmem:[%s9645_s5 + $0xf4] ss:$8 sps:$4 sm:$0xff]   ;;  %v7898_v12 = vld [vmem:[%s9645_s5 + $0xf0] ss:$8 sps:$4 sm:$0xff]   ;;  %v7903_v13 = vld [vmem:[%s9645_s5 + $0xe4] ss:$8 sps:$4 sm:$0xff]  }
 0xaa3   :  { %v7943_v22 = vld [vmem:[%s9645_s5 + $0x100] ss:$8 sps:$4 sm:$0xff]   ;;  %v7948_v16 = vld [vmem:[%s9645_s5 + $0x1f4] ss:$8 sps:$4 sm:$0xff]   ;;  %v7946_v37 = vld [vmem:[%s9645_s5 + $0x1f0] ss:$8 sps:$4 sm:$0xff]  }
 0xaa4   :  { %5165 = vmatpush1.bf16.msra.mxu0 %v9078_v40  ;;  %5287 = vmatpush1.bf16.msra.mxu1 %v9078_v40  ;;  %v7901_v20 = vld [vmem:[%s9645_s5 + $0xe0] ss:$8 sps:$4 sm:$0xff]   ;;  %v7906_v32 = vld [vmem:[%s9645_s5 + $0xd4] ss:$8 sps:$4 sm:$0xff]   ;;  %v7951_v18 = vld [vmem:[%s9645_s5 + $0x1e4] ss:$8 sps:$4 sm:$0xff]  }
 0xaa5   :  { %5166 = vmatprep.subr.bf16.mxu0 %v9080_v33  ;;  %5288 = vmatprep.subr.bf16.mxu1 %v9080_v33  ;;  %v7904_v59 = vld [vmem:[%s9645_s5 + $0xd0] ss:$8 sps:$4 sm:$0xff]   ;;  %v7909_v29 = vld [vmem:[%s9645_s5 + $0xc4] ss:$8 sps:$4 sm:$0xff]   ;;  %v7949_v48 = vld [vmem:[%s9645_s5 + $0x1e0] ss:$8 sps:$4 sm:$0xff]  }
 0xaa6   :  { %v7954_v10 = vld [vmem:[%s9645_s5 + $0x1d4] ss:$8 sps:$4 sm:$0xff]   ;;  %v7907_v60 = vld [vmem:[%s9645_s5 + $0xc0] ss:$8 sps:$4 sm:$0xff]   ;;  %v7952_v43 = vld [vmem:[%s9645_s5 + $0x1d0] ss:$8 sps:$4 sm:$0xff]  }
 0xaa7   :  { %v7912_v28 = vld [vmem:[%s9645_s5 + $0xb4] ss:$8 sps:$4 sm:$0xff]   ;;  %v7957_v61 = vld [vmem:[%s9645_s5 + $0x1c4] ss:$8 sps:$4 sm:$0xff]  }
 0xaa8   :  { %5167 = vmatpush1.bf16.msra.mxu0 %v9092_v39  ;;  %5289 = vmatpush1.bf16.msra.mxu1 %v9092_v39 }
 0xaa9   :  { %5813 = vmatprep.subr.bf16.mxu1 %v7870_v35  ;;  %5580 = vmatprep.subr.bf16.mxu0 %v7924_v36  ;;  %v7910_v35 = vld [vmem:[%s9645_s5 + $0xb0] ss:$8 sps:$4 sm:$0xff]   ;;  %v7915_v36 = vld [vmem:[%s9645_s5 + $0xa4] ss:$8 sps:$4 sm:$0xff]  }
 0xaab   :  { %7019 = vmatmul.mubr.msk.bf16.vlgmr.msra.gmra.mxu0 %vm5139_vm4, %v7866_v11  ;;  %7035 = vmatmul.mubr.msk.bf16.vlgmr.msra.gmra.mxu1 %vm5139_vm4, %v7867_v27  ;;  %v7955_v11 = vld [vmem:[%s9645_s5 + $0x1c0] ss:$8 sps:$4 sm:$0xff]   ;;  %v7960_v27 = vld [vmem:[%s9645_s5 + $0x1b4] ss:$8 sps:$4 sm:$0xff]  }
 0xaac   :  { %5814 = vmatpush1.bf16.msra.mxu1 %v7868_v34  ;;  %5194 = vmatprep.mubr.bf16.mxu0 %v8217_v0  ;;  %v7913_v34 = vld [vmem:[%s9645_s5 + $0xa0] ss:$8 sps:$4 sm:$0xff]  }
 0xaad   :  { %5815 = vmatprep.subr.bf16.mxu1 %v7873_v50  ;;  %5316 = vmatprep.mubr.bf16.mxu1 %v8217_v0  ;;  %v7918_v50 = vld [vmem:[%s9645_s5 + $0x94] ss:$8 sps:$4 sm:$0xff]  }
 0xaae   :  { %5581 = vmatpush1.bf16.msra.mxu0 %v7922_v51  ;;  %v7958_v51 = vld [vmem:[%s9645_s5 + $0x1b0] ss:$8 sps:$4 sm:$0xff]  }
 0xaaf   :  { %5582 = vmatprep.subr.bf16.mxu0 %v7927_v53  ;;  %v7963_v53 = vld [vmem:[%s9645_s5 + $0x1a4] ss:$8 sps:$4 sm:$0xff]  }
 0xab0   :  { %5816 = vmatpush1.bf16.msra.mxu1 %v7871_v49  ;;  %v7916_v49 = vld [vmem:[%s9645_s5 + $0x90] ss:$8 sps:$4 sm:$0xff]  }
 0xab1   :  { %5817 = vmatprep.subr.bf16.mxu1 %v7878_v47  ;;  %v7921_v47 = vld [vmem:[%s9645_s5 + $0x84] ss:$8 sps:$4 sm:$0xff]  }
 0xab2   :  { %5583 = vmatpush1.bf16.msra.mxu0 %v7925_v54  ;;  %v7961_v54 = vld [vmem:[%s9645_s5 + $0x1a0] ss:$8 sps:$4 sm:$0xff]  }
 0xab3   :  { %7020 = vmatmul.mubr.msk.bf16.gmra.mxu0 %vm5139_vm4, %v7874_v55  ;;  %7036 = vmatmul.mubr.msk.bf16.gmra.mxu1 %vm5139_vm4, %v7875_v30  ;;  %v7919_v55 = vld [vmem:[%s9645_s5 + $0x80] ss:$8 sps:$4 sm:$0xff]   ;;  %v7966_v30 = vld [vmem:[%s9645_s5 + $0x274] ss:$8 sps:$4 sm:$0xff]  }
 0xab4   :  { %5818 = vmatpush1.bf16.msra.mxu1 %v7876_v58  ;;  %5204 = vmatprep.mubr.bf16.mxu0 %v8217_v0  ;;  %v7964_v58 = vld [vmem:[%s9645_s5 + $0x270] ss:$8 sps:$4 sm:$0xff]  }
 0xab5   :  { %5819 = vmatprep.subr.bf16.mxu1 %v7881_v19  ;;  %5326 = vmatprep.mubr.bf16.mxu1 %v8217_v0  ;;  %v7967_v19 = vld [vmem:[%s9645_s5 + $0x190] ss:$8 sps:$4 sm:$0xff]  }
 0xab6   :  { %5584 = vmatprep.subr.bf16.mxu0 %v7930_v62  ;;  %v7969_v62 = vld [vmem:[%s9645_s5 + $0x194] ss:$8 sps:$4 sm:$0xff]  }
 0xab7   :  { %5585 = vmatpush1.bf16.msra.mxu0 %v7928_v56  ;;  %v7970_v56 = vld [vmem:[%s9645_s5 + $0x260] ss:$8 sps:$4 sm:$0xff]  }
 0xab8   :  { %5820 = vmatpush1.bf16.msra.mxu1 %v7879_v31  ;;  %5586 = vmatprep.subr.bf16.mxu0 %v7933_v44  ;;  %v7972_v31 = vld [vmem:[%s9645_s5 + $0x264] ss:$8 sps:$4 sm:$0xff]   ;;  %v7973_v44 = vld [vmem:[%s9645_s5 + $0x180] ss:$8 sps:$4 sm:$0xff]  }
 0xab9   :  { %5821 = vmatprep.subr.bf16.mxu1 %v7886_v17  ;;  %v7975_v17 = vld [vmem:[%s9645_s5 + $0x184] ss:$8 sps:$4 sm:$0xff]  }
 0xabb   :  { %7021 = vmatmul.mubr.msk.bf16.gmra.mxu0 %vm5139_vm4, %v7882_v15  ;;  %7037 = vmatmul.mubr.msk.bf16.gmra.mxu1 %vm5139_vm4, %v7883_v57  ;;  %v7976_v15 = vld [vmem:[%s9645_s5 + $0x250] ss:$8 sps:$4 sm:$0xff]   ;;  %v7978_v57 = vld [vmem:[%s9645_s5 + $0x254] ss:$8 sps:$4 sm:$0xff]  }
 0xabc   :  { %5822 = vmatpush1.bf16.msra.mxu1 %v7884_v14  ;;  %5214 = vmatprep.mubr.bf16.mxu0 %v8217_v0  ;;  %v7981_v14 = vld [vmem:[%s9645_s5 + $0x374] ss:$8 sps:$4 sm:$0xff]  }
 0xabd   :  { %5823 = vmatprep.subr.bf16.mxu1 %v7889_v63  ;;  %5336 = vmatprep.mubr.bf16.mxu1 %v8217_v0  ;;  %v7892_v0 = vld [vmem:[%s9645_s5 + $0x10] ss:$8 sps:$4 sm:$0xff]   ;;  %v7982_v63 = vld [vmem:[%s9645_s5 + $0x240] ss:$8 sps:$4 sm:$0xff]  }
 0xabe   :  { %5587 = vmatpush1.bf16.msra.mxu0 %v7931_v7  ;;  %v7984_v7 = vld [vmem:[%s9645_s5 + $0x244] ss:$8 sps:$4 sm:$0xff]  }
 0xabf   :  { %5588 = vmatprep.subr.bf16.mxu0 %v7936_v21  ;;  %v7988_v21 = vld [vmem:[%s9645_s5 + $0x230] ss:$8 sps:$4 sm:$0xff]  }
 0xac0   :  { %5824 = vmatpush1.bf16.msra.mxu1 %v7887_v26  ;;  %v7990_v26 = vld [vmem:[%s9645_s5 + $0x234] ss:$8 sps:$4 sm:$0xff]  }
 0xac1   :  { %5825 = vmatprep.subr.bf16.mxu1 %v7894_v1  ;;  %v7994_v1 = vld [vmem:[%s9645_s5 + $0x220] ss:$8 sps:$4 sm:$0xff]  }
 0xac2   :  { %5589 = vmatpush1.bf16.msra.mxu0 %v7934_v25  ;;  %v7996_v25 = vld [vmem:[%s9645_s5 + $0x224] ss:$8 sps:$4 sm:$0xff]  }
 0xac3   :  { %7022 = vmatmul.mubr.msk.bf16.gmra.mxu0 %vm5139_vm4, %v7890_v2  ;;  %7038 = vmatmul.mubr.msk.bf16.gmra.mxu1 %vm5139_vm4, %v7891_v42  ;;  %v8000_v2 = vld [vmem:[%s9645_s5 + $0x210] ss:$8 sps:$4 sm:$0xff]   ;;  %v8002_v42 = vld [vmem:[%s9645_s5 + $0x214] ss:$8 sps:$4 sm:$0xff]  }
 0xac4   :  { %5826 = vmatpush1.bf16.msra.mxu1 %v7892_v0  ;;  %5845 = vmatprep.mubr.bf16.mxu1 %v9080_v33  ;;  %v8006_v0 = vld [vmem:[%s9645_s5 + $0x200] ss:$8 sps:$4 sm:$0xff]  }
 0xac5   :  { %5827 = vmatprep.subr.bf16.mxu1 %v7897_v3  ;;  %5590 = vmatprep.subr.bf16.mxu0 %v7939_v46  ;;  %v8008_v3 = vld [vmem:[%s9645_s5 + $0x204] ss:$8 sps:$4 sm:$0xff]   ;;  %v8012_v46 = vld [vmem:[%s9645_s5 + $0x2f0] ss:$8 sps:$4 sm:$0xff]  }
 0xac6   :  { %5591 = vmatpush1.bf16.msra.mxu0 %v7937_v4  ;;  %v8014_v4 = vld [vmem:[%s9645_s5 + $0x2f4] ss:$8 sps:$4 sm:$0xff]  }
 0xac7   :  { %5592 = vmatprep.subr.bf16.mxu0 %v7942_v45  ;;  %v8018_v45 = vld [vmem:[%s9645_s5 + $0x2e0] ss:$8 sps:$4 sm:$0xff]  }
 0xac8   :  { %5828 = vmatpush1.bf16.msra.mxu1 %v7895_v5  ;;  %v8020_v5 = vld [vmem:[%s9645_s5 + $0x2e4] ss:$8 sps:$4 sm:$0xff]  }
 0xac9   :  { %5829 = vmatprep.subr.bf16.mxu1 %v7900_v52  ;;  %v8026_v52 = vld [vmem:[%s9645_s5 + $0x2d4] ss:$8 sps:$4 sm:$0xff]  }
 0xaca   :  { %5593 = vmatpush1.bf16.msra.mxu0 %v7940_v38  ;;  %v8024_v38 = vld [vmem:[%s9645_s5 + $0x2d0] ss:$8 sps:$4 sm:$0xff]  }
 0xacb   :  { %5594 = vmatprep.subr.bf16.mxu0 %v7945_v8  ;;  %v8032_v8 = vld [vmem:[%s9645_s5 + $0x2c4] ss:$8 sps:$4 sm:$0xff]  }
 0xacc   :  { %5830 = vmatpush2.bf16.msra.mxu1 %v7898_v12  ;;  %v8030_v12 = vld [vmem:[%s9645_s5 + $0x2c0] ss:$8 sps:$4 sm:$0xff]  }
 0xacd   :  { %5831 = vmatprep.subr.bf16.mxu1 %v7903_v13  ;;  %v8038_v13 = vld [vmem:[%s9645_s5 + $0x2b4] ss:$8 sps:$4 sm:$0xff]  }
 0xace   :  { %5595 = vmatpush1.bf16.msra.mxu0 %v7943_v22  ;;  %v8036_v22 = vld [vmem:[%s9645_s5 + $0x2b0] ss:$8 sps:$4 sm:$0xff]  }
 0xacf   :  { %5596 = vmatprep.subr.bf16.mxu0 %v7948_v16  ;;  %v8044_v16 = vld [vmem:[%s9645_s5 + $0x2a4] ss:$8 sps:$4 sm:$0xff]  }
 0xad0   :  { %5832 = vmatpush2.bf16.msra.mxu1 %v7901_v20  ;;  %v8042_v20 = vld [vmem:[%s9645_s5 + $0x2a0] ss:$8 sps:$4 sm:$0xff]  }
 0xad1   :  { %5833 = vmatprep.subr.bf16.mxu1 %v7906_v32  ;;  %v8050_v32 = vld [vmem:[%s9645_s5 + $0x294] ss:$8 sps:$4 sm:$0xff]  }
 0xad2   :  { %5597 = vmatpush2.bf16.msra.mxu0 %v7946_v37  ;;  %v8048_v37 = vld [vmem:[%s9645_s5 + $0x290] ss:$8 sps:$4 sm:$0xff]  }
 0xad3   :  { %5598 = vmatprep.subr.bf16.mxu0 %v7951_v18  ;;  %v8056_v18 = vld [vmem:[%s9645_s5 + $0x284] ss:$8 sps:$4 sm:$0xff]  }
 0xad4   :  { %5834 = vmatpush2.bf16.msra.mxu1 %v7904_v59  ;;  %v8054_v59 = vld [vmem:[%s9645_s5 + $0x280] ss:$8 sps:$4 sm:$0xff]  }
 0xad5   :  { %5835 = vmatprep.subr.bf16.mxu1 %v7909_v29 }
 0xad6   :  { %5599 = vmatpush2.bf16.msra.mxu0 %v7949_v48 }
 0xad7   :  { %5600 = vmatprep.subr.bf16.mxu0 %v7954_v10 }
 0xad8   :  { %5836 = vmatpush2.bf16.msra.mxu1 %v7907_v60 }
 0xad9   :  { %5837 = vmatprep.subr.bf16.mxu1 %v7912_v28 }
 0xada   :  { %5601 = vmatpush2.bf16.msra.mxu0 %v7952_v43 }
 0xadb   :  { %5602 = vmatprep.subr.bf16.mxu0 %v7957_v61 }
 0xadc   :  { %5838 = vmatpush2.bf16.msra.mxu1 %v7910_v35 }
 0xadd   :  { %5839 = vmatprep.subr.bf16.mxu1 %v7915_v36 }
 0xade   :  { %5603 = vmatpush2.bf16.msra.mxu0 %v7955_v11 }
 0xadf   :  { %5604 = vmatprep.subr.bf16.mxu0 %v7960_v27  ;;  %v7979_v27 = vld [vmem:[%s9645_s5 + $0x370] ss:$8 sps:$4 sm:$0xff]  }
 0xae0   :  { %5840 = vmatpush2.bf16.msra.mxu1 %v7913_v34 }
 0xae1   :  { %5841 = vmatprep.subr.bf16.mxu1 %v7918_v50 }
 0xae2   :  { %5605 = vmatpush2.bf16.msra.mxu0 %v7958_v51 }
 0xae3   :  { %5606 = vmatprep.subr.bf16.mxu0 %v7963_v53  ;;  %v7987_v53 = vld [vmem:[%s9645_s5 + $0x364] ss:$8 sps:$4 sm:$0xff]  }
 0xae4   :  { %5842 = vmatpush2.bf16.msra.mxu1 %v7916_v49 }
 0xae5   :  { %5843 = vmatprep.subr.bf16.mxu1 %v7921_v47 }
 0xae6   :  { %5607 = vmatpush2.bf16.msra.mxu0 %v7961_v54 }
 0xae7   :  { %5608 = vmatprep.subr.bf16.mxu0 %v7969_v62 }
 0xae8   :  { %5844 = vmatpush2.bf16.msra.mxu1 %v7919_v55  ;;  %v7985_v55 = vld [vmem:[%s9645_s5 + $0x360] ss:$8 sps:$4 sm:$0xff]  }
 0xae9   :  { %6345 = vmatprep.subr.bf16.mxu1 %v7966_v30 }
 0xaea   :  { %5609 = vmatpush2.bf16.msra.mxu0 %v7967_v19 }
 0xaeb   :  { %5846 = vmatmul.mubr.bf16.vlgmr.msra.gmra.mxu1 %v9092_v39  ;;  %5610 = vmatprep.subr.bf16.mxu0 %v7975_v17 }
 0xaec   :  { %5855 = vmatprep.mubr.bf16.mxu1 %v9072_v23  ;;  %6346 = vmatpush1.bf16.msra.mxu1 %v7964_v58  ;;  %v7993_v58 = vld [vmem:[%s9645_s5 + $0x354] ss:$8 sps:$4 sm:$0xff]  }
 0xaed   :  { %6347 = vmatprep.subr.bf16.mxu1 %v7972_v31 }
 0xaee   :  { %5611 = vmatpush2.bf16.msra.mxu0 %v7973_v44 }
 0xaef   :  { %6112 = vmatprep.subr.bf16.mxu0 %v7981_v14 }
 0xaf0   :  { %6348 = vmatpush1.bf16.msra.mxu1 %v7970_v56 }
 0xaf1   :  { %6349 = vmatprep.subr.bf16.mxu1 %v7978_v57 }
 0xaf3   :  { %5856 = vmatmul.mubr.bf16.gmra.mxu1 %v9078_v40 }
 0xaf4   :  { %5865 = vmatprep.mubr.bf16.mxu1 %v9060_v9  ;;  %6350 = vmatpush1.bf16.msra.mxu1 %v7976_v15  ;;  %v7991_v15 = vld [vmem:[%s9645_s5 + $0x350] ss:$8 sps:$4 sm:$0xff]  }
 0xaf5   :  { %6351 = vmatprep.subr.bf16.mxu1 %v7984_v7 }
 0xaf8   :  { %6352 = vmatpush1.bf16.msra.mxu1 %v7982_v63  ;;  %v7999_v63 = vld [vmem:[%s9645_s5 + $0x344] ss:$8 sps:$4 sm:$0xff]  }
 0xaf9   :  { %6353 = vmatprep.subr.bf16.mxu1 %v7990_v26 }
 0xafb   :  { %5866 = vmatmul.mubr.bf16.gmra.mxu1 %v9070_v24 }
 0xafc   :  { %5875 = vmatprep.mubr.bf16.mxu1 %v9056_v6  ;;  %6354 = vmatpush1.bf16.msra.mxu1 %v7988_v21 }
 0xafd   :  { %6355 = vmatprep.subr.bf16.mxu1 %v7996_v25 }
 0xb00   :  { %6356 = vmatpush1.bf16.msra.mxu1 %v7994_v1  ;;  %v7997_v1 = vld [vmem:[%s9645_s5 + $0x340] ss:$8 sps:$4 sm:$0xff]  }
 0xb01   :  { %6357 = vmatprep.subr.bf16.mxu1 %v8002_v42 }
 0xb03   :  { %5876 = vmatmul.mubr.bf16.gmra.mxu1 %v9058_v41 }
 0xb04   :  { %6358 = vmatpush1.bf16.msra.mxu1 %v8000_v2  ;;  %v8005_v2 = vld [vmem:[%s9645_s5 + $0x334] ss:$8 sps:$4 sm:$0xff]  }
 0xb05   :  { %6359 = vmatprep.subr.bf16.mxu1 %v8008_v3 }
 0xb08   :  { %6360 = vmatpush1.bf16.msra.mxu1 %v8006_v0 }
 0xb09   :  { %6361 = vmatprep.subr.bf16.mxu1 %v8014_v4 }
 0xb0c   :  { %6362 = vmatpush2.bf16.msra.mxu1 %v8012_v46 }
 0xb0d   :  { %6363 = vmatprep.subr.bf16.mxu1 %v8020_v5  ;;  %v8003_v5 = vld [vmem:[%s9645_s5 + $0x330] ss:$8 sps:$4 sm:$0xff]  }
 0xb10   :  { %6364 = vmatpush2.bf16.msra.mxu1 %v8018_v45 }
 0xb11   :  { %6365 = vmatprep.subr.bf16.mxu1 %v8026_v52 }
 0xb14   :  { %6366 = vmatpush2.bf16.msra.mxu1 %v8024_v38 }
 0xb15   :  { %6367 = vmatprep.subr.bf16.mxu1 %v8032_v8  ;;  %v8011_v8 = vld [vmem:[%s9645_s5 + $0x324] ss:$8 sps:$4 sm:$0xff]  }
 0xb18   :  { %6368 = vmatpush2.bf16.msra.mxu1 %v8030_v12 }
 0xb19   :  { %6369 = vmatprep.subr.bf16.mxu1 %v8038_v13 }
 0xb1c   :  { %6370 = vmatpush2.bf16.msra.mxu1 %v8036_v22 }
 0xb1d   :  { %6371 = vmatprep.subr.bf16.mxu1 %v8044_v16  ;;  %v8009_v16 = vld [vmem:[%s9645_s5 + $0x320] ss:$8 sps:$4 sm:$0xff]  }
 0xb20   :  { %6372 = vmatpush2.bf16.msra.mxu1 %v8042_v20 }
 0xb21   :  { %6373 = vmatprep.subr.bf16.mxu1 %v8050_v32  ;;  %v8017_v32 = vld [vmem:[%s9645_s5 + $0x314] ss:$8 sps:$4 sm:$0xff]  }
 0xb24   :  { %6374 = vmatpush2.bf16.msra.mxu1 %v8048_v37 }
 0xb25   :  { %6375 = vmatprep.subr.bf16.mxu1 %v8056_v18 }
 0xb28   :  { %6376 = vmatpush2.bf16.msra.mxu1 %v8054_v59 }
 0xb6b   :  { %v5186_v29 = vpop.f32.mrf.mxu0  ;;  %v5308_v48 = vpop.f32.mrf.mxu1 }
 0xb6d   :  { %v5188_v10 = vpop.f32.mrf.mxu0  ;;  %v5310_v60 = vpop.f32.mrf.mxu1 }
 0xb6f   :  { %v5190_v28 = vpop.f32.mrf.mxu0  ;;  %v5312_v43 = vpop.f32.mrf.mxu1 }
 0xb70   :  { %v5347_v35 = vpack.c.bf16 %v5312_v43, %v5308_v48  ;;  %v5225_v50 = vpack.c.bf16 %v5190_v28, %v5186_v29  ;;  %v8023_v43 = vld [vmem:[%s9645_s5 + $0x304] ss:$8 sps:$4 sm:$0xff]  }
 0xb71   :  { %v5192_v61 = vpop.f32.mrf.mxu0  ;;  %v5314_v36 = vpop.f32.mrf.mxu1 }
 0xb72   :  { %v5226_v11 = vpack.c.bf16 %v5192_v61, %v5188_v10  ;;  %v5348_v34 = vpack.c.bf16 %v5314_v36, %v5310_v60  ;;  %v8015_v60 = vld [vmem:[%s9645_s5 + $0x310] ss:$8 sps:$4 sm:$0xff]   ;;  %v8021_v61 = vld [vmem:[%s9645_s5 + $0x300] ss:$8 sps:$4 sm:$0xff]  }
 0xb73   :  { %v5196_v51 = vpop.f32.mrf.mxu0  ;;  %v5318_v49 = vpop.f32.mrf.mxu1  ;;  %v8027_v36 = vld [vmem:[%s9645_s5 + $0x3f0] ss:$8 sps:$4 sm:$0xff]  }
 0xb74   :  { %5612 = vmatprep.mubr.bf16.mxu0 %v5226_v11  ;;  %6377 = vmatprep.mubr.bf16.mxu1 %v5348_v34  ;;  %v8035_v11 = vld [vmem:[%s9645_s5 + $0x3e4] ss:$8 sps:$4 sm:$0xff]   ;;  %v8039_v34 = vld [vmem:[%s9645_s5 + $0x3d0] ss:$8 sps:$4 sm:$0xff]  }
 0xb75   :  { %v5198_v47 = vpop.f32.mrf.mxu0  ;;  %5613 = vmatmul.mubr.bf16.vlgmr.msra.gmra.mxu0 %v5225_v50  ;;  %v5320_v54 = vpop.f32.mrf.mxu1  ;;  %6378 = vmatmul.mubr.bf16.vlgmr.msra.gmra.mxu1 %v5347_v35  ;;  %v8029_v35 = vld [vmem:[%s9645_s5 + $0x3f4] ss:$8 sps:$4 sm:$0xff]   ;;  %v8047_v50 = vld [vmem:[%s9645_s5 + $0x3c4] ss:$8 sps:$4 sm:$0xff]  }
 0xb76   :  { %6113 = vmatpush1.bf16.msra.mxu0 %v7979_v27  ;;  %v8041_v27 = vld [vmem:[%s9645_s5 + $0x3d4] ss:$8 sps:$4 sm:$0xff]  }
 0xb77   :  { %v5200_v30 = vpop.f32.mrf.mxu0  ;;  %6114 = vmatprep.subr.bf16.mxu0 %v7987_v53  ;;  %v5322_v19 = vpop.f32.mrf.mxu1  ;;  %v8053_v53 = vld [vmem:[%s9645_s5 + $0x3b4] ss:$8 sps:$4 sm:$0xff]  }
 0xb78   :  { %v5227_v62 = vpack.c.bf16 %v5200_v30, %v5196_v51  ;;  %v5349_v31 = vpack.c.bf16 %v5322_v19, %v5318_v49  ;;  %v8045_v51 = vld [vmem:[%s9645_s5 + $0x3c0] ss:$8 sps:$4 sm:$0xff]   ;;  %v8051_v49 = vld [vmem:[%s9645_s5 + $0x3b0] ss:$8 sps:$4 sm:$0xff]  }
 0xb79   :  { %v5202_v56 = vpop.f32.mrf.mxu0  ;;  %v5324_v44 = vpop.f32.mrf.mxu1  ;;  %v8060_v30 = vld [vmem:[%s9645_s5 + $0x390] ss:$8 sps:$4 sm:$0xff]   ;;  %v8063_v19 = vld [vmem:[%s9645_s5 + $0x380] ss:$8 sps:$4 sm:$0xff]  }
 0xb7a   :  { %v5228_v17 = vpack.c.bf16 %v5202_v56, %v5198_v47  ;;  %6115 = vmatpush1.bf16.msra.mxu0 %v7985_v55  ;;  %v5350_v57 = vpack.c.bf16 %v5324_v44, %v5320_v54  ;;  %v8059_v47 = vld [vmem:[%s9645_s5 + $0x3a4] ss:$8 sps:$4 sm:$0xff]   ;;  %v8057_v54 = vld [vmem:[%s9645_s5 + $0x3a0] ss:$8 sps:$4 sm:$0xff]   ;;  %v8062_v55 = vld [vmem:[%s9645_s5 + $0x394] ss:$8 sps:$4 sm:$0xff]  }
 0xb7b   :  { %v5206_v14 = vpop.f32.mrf.mxu0  ;;  %6116 = vmatprep.subr.bf16.mxu0 %v7993_v58  ;;  %v5328_v7 = vpop.f32.mrf.mxu1  ;;  %v8065_v58 = vld [vmem:[%s9645_s5 + $0x384] ss:$8 sps:$4 sm:$0xff]  }
 0xb7c   :  { %5622 = vmatprep.mubr.bf16.mxu0 %v5228_v17  ;;  %6387 = vmatprep.mubr.bf16.mxu1 %v5350_v57 }
 0xb7d   :  { %v5208_v21 = vpop.f32.mrf.mxu0  ;;  %5623 = vmatmul.mubr.bf16.gmra.mxu0 %v5227_v62  ;;  %v5330_v26 = vpop.f32.mrf.mxu1  ;;  %6388 = vmatmul.mubr.bf16.gmra.mxu1 %v5349_v31 }
 0xb7e   :  { %6117 = vmatpush1.bf16.msra.mxu0 %v7991_v15 }
 0xb7f   :  { %v5210_v25 = vpop.f32.mrf.mxu0  ;;  %6118 = vmatprep.subr.bf16.mxu0 %v7999_v63  ;;  %v5332_v42 = vpop.f32.mrf.mxu1 }
 0xb80   :  { %v5229_v0 = vpack.c.bf16 %v5210_v25, %v5206_v14  ;;  %v5351_v46 = vpack.c.bf16 %v5332_v42, %v5328_v7 }
 0xb81   :  { %v5212_v3 = vpop.f32.mrf.mxu0  ;;  %v5334_v4 = vpop.f32.mrf.mxu1 }
 0xb82   :  { %v5230_v45 = vpack.c.bf16 %v5212_v3, %v5208_v21  ;;  %6119 = vmatpush1.bf16.msra.mxu0 %v7997_v1  ;;  %v5352_v52 = vpack.c.bf16 %v5334_v4, %v5330_v26 }
 0xb83   :  { %v5216_v38 = vpop.f32.mrf.mxu0  ;;  %6120 = vmatprep.subr.bf16.mxu0 %v8005_v2  ;;  %v5338_v12 = vpop.f32.mrf.mxu1 }
 0xb84   :  { %5632 = vmatprep.mubr.bf16.mxu0 %v5230_v45  ;;  %6397 = vmatprep.mubr.bf16.mxu1 %v5352_v52 }
 0xb85   :  { %v5218_v13 = vpop.f32.mrf.mxu0  ;;  %5633 = vmatmul.mubr.bf16.gmra.mxu0 %v5229_v0  ;;  %v5340_v22 = vpop.f32.mrf.mxu1  ;;  %6398 = vmatmul.mubr.bf16.gmra.mxu1 %v5351_v46 }
 0xb86   :  { %6121 = vmatpush1.bf16.msra.mxu0 %v8003_v5 }
 0xb87   :  { %v5220_v20 = vpop.f32.mrf.mxu0  ;;  %6122 = vmatprep.subr.bf16.mxu0 %v8011_v8  ;;  %v5342_v37 = vpop.f32.mrf.mxu1 }
 0xb88   :  { %v5231_v18 = vpack.c.bf16 %v5220_v20, %v5216_v38  ;;  %v5353_v29 = vpack.c.bf16 %v5342_v37, %v5338_v12 }
 0xb89   :  { %v5222_v59 = vpop.f32.mrf.mxu0  ;;  %v5344_v48 = vpop.f32.mrf.mxu1 }
 0xb8a   :  { %v5232_v10 = vpack.c.bf16 %v5222_v59, %v5218_v13  ;;  %6123 = vmatpush1.bf16.msra.mxu0 %v8009_v16  ;;  %v5354_v28 = vpack.c.bf16 %v5344_v48, %v5340_v22 }
 0xb8b   :  { %6124 = vmatprep.subr.bf16.mxu0 %v8017_v32 }
 0xb8c   :  { %5642 = vmatprep.mubr.bf16.mxu0 %v5232_v10  ;;  %6407 = vmatprep.mubr.bf16.mxu1 %v5354_v28 }
 0xb8d   :  { %5643 = vmatmul.mubr.bf16.gmra.mxu0 %v5231_v18  ;;  %6408 = vmatmul.mubr.bf16.gmra.mxu1 %v5353_v29 }
 0xb8e   :  { %6125 = vmatpush1.bf16.msra.mxu0 %v8015_v60  ;;  %6144 = vmatprep.mubr.bf16.mxu0 %v9080_v33  ;;  %v8033_v33 = vld [vmem:[%s9645_s5 + $0x3e0] ss:$8 sps:$4 sm:$0xff]  }
 0xb8f   :  { %6126 = vmatprep.subr.bf16.mxu0 %v8023_v43 }
 0xb92   :  { %6127 = vmatpush1.bf16.msra.mxu0 %v8021_v61 }
 0xb93   :  { %6128 = vmatprep.subr.bf16.mxu0 %v8029_v35 }
 0xb96   :  { %6129 = vmatpush2.bf16.msra.mxu0 %v8027_v36 }
 0xb97   :  { %6130 = vmatprep.subr.bf16.mxu0 %v8035_v11 }
 0xb9a   :  { %6131 = vmatpush2.bf16.msra.mxu0 %v8033_v33 }
 0xb9b   :  { %6132 = vmatprep.subr.bf16.mxu0 %v8041_v27 }
 0xb9e   :  { %6133 = vmatpush2.bf16.msra.mxu0 %v8039_v34 }
 0xb9f   :  { %6134 = vmatprep.subr.bf16.mxu0 %v8047_v50 }
 0xba2   :  { %6135 = vmatpush2.bf16.msra.mxu0 %v8045_v51 }
 0xba3   :  { %6136 = vmatprep.subr.bf16.mxu0 %v8053_v53 }
 0xba6   :  { %6137 = vmatpush2.bf16.msra.mxu0 %v8051_v49 }
 0xba7   :  { %6138 = vmatprep.subr.bf16.mxu0 %v8059_v47 }
 0xbaa   :  { %6139 = vmatpush2.bf16.msra.mxu0 %v8057_v54 }
 0xbab   :  { %6140 = vmatprep.subr.bf16.mxu0 %v8062_v55  ;;  %v5847_v62 = vpop.f32.mrf.mxu1 }
 0xbad   :  { %v5849_v56 = vpop.f32.mrf.mxu1 }
 0xbae   :  { %6141 = vmatpush2.bf16.msra.mxu0 %v8060_v30 }
 0xbaf   :  { %6142 = vmatprep.subr.bf16.mxu0 %v8065_v58  ;;  %v5851_v31 = vpop.f32.mrf.mxu1 }
 0xbb1   :  { %v5853_v44 = vpop.f32.mrf.mxu1 }
 0xbb2   :  { %6143 = vmatpush2.bf16.msra.mxu0 %v8063_v19 }
 0xbb3   :  { %v5857_v17 = vpop.f32.mrf.mxu1 }
 0xbb5   :  { %6145 = vmatmul.mubr.bf16.vlgmr.msra.gmra.mxu0 %v9092_v39  ;;  %v5859_v15 = vpop.f32.mrf.mxu1 }
 0xbb6   :  { %6154 = vmatprep.mubr.bf16.mxu0 %v9072_v23 }
 0xbb7   :  { %v5861_v57 = vpop.f32.mrf.mxu1 }
 0xbb9   :  { %v5863_v39 = vpop.f32.mrf.mxu1 }
 0xbbb   :  { %v5867_v63 = vpop.f32.mrf.mxu1 }
 0xbbd   :  { %6155 = vmatmul.mubr.bf16.gmra.mxu0 %v9078_v40 }
 0xbbe   :  { %6164 = vmatprep.mubr.bf16.mxu0 %v9060_v9 }
 0xbc5   :  { %6165 = vmatmul.mubr.bf16.gmra.mxu0 %v9070_v24 }
 0xbc6   :  { %6174 = vmatprep.mubr.bf16.mxu0 %v9056_v6  ;;  %v5869_v6 = vpop.f32.mrf.mxu1 }
 0xbc8   :  { %v5871_v25 = vpop.f32.mrf.mxu1 }
 0xbca   :  { %v5873_v46 = vpop.f32.mrf.mxu1 }
 0xbcc   :  { %v5877_v12 = vpop.f32.mrf.mxu1 }
 0xbcd   :  { %6175 = vmatmul.mubr.bf16.gmra.mxu0 %v9058_v41 }
 0xbce   :  { %v5879_v18 = vpop.f32.mrf.mxu1 }
 0xbd0   :  { %v5881_v43 = vpop.f32.mrf.mxu1 }
 0xbd2   :  { %v5883_v34 = vpop.f32.mrf.mxu1 }
 0xc35   :  { %v5614_v14 = vpop.f32.mrf.mxu0  ;;  %v6379_v47 = vpop.f32.mrf.mxu1 }
 0xc36   :  { %v5848_v23 = vadd.f32 %v5847_v62, %v5614_v14 }
 0xc37   :  { %v5616_v40 = vpop.f32.mrf.mxu0  ;;  %v6381_v30 = vpop.f32.mrf.mxu1 }
 0xc38   :  { %8082 = vtanh.f32 %v5848_v23  ;;  %v5850_v9 = vadd.f32 %v5849_v56, %v5616_v40 }
 0xc39   :  { %v5618_v7 = vpop.f32.mrf.mxu0  ;;  %v6383_v62 = vpop.f32.mrf.mxu1 }
 0xc3a   :  { %8084 = vtanh.f32 %v5850_v9  ;;  %v5852_v24 = vadd.f32 %v5851_v31, %v5618_v7 }
 0xc3b   :  { %v5620_v21 = vpop.f32.mrf.mxu0 }
 0xc3c   :  { %8086 = vtanh.f32 %v5852_v24  ;;  %v5854_v41 = vadd.f32 %v5853_v44, %v5620_v21  ;;  %v6385_v44 = vpop.f32.mrf.mxu1 }
 0xc3d   :  { %v5624_v26 = vpop.f32.mrf.mxu0 }
 0xc3e   :  { %8088 = vtanh.f32 %v5854_v41  ;;  %v5858_v1 = vadd.f32 %v5857_v17, %v5624_v26  ;;  %v6389_v17 = vpop.f32.mrf.mxu1 }
 0xc3f   :  { %v5626_v2 = vpop.f32.mrf.mxu0 }
 0xc40   :  { %8090 = vtanh.f32 %v5858_v1  ;;  %v5860_v42 = vadd.f32 %v5859_v15, %v5626_v2  ;;  %v6391_v15 = vpop.f32.mrf.mxu1 }
 0xc41   :  { %v5628_v0 = vpop.f32.mrf.mxu0 }
 0xc42   :  { %8092 = vtanh.f32 %v5860_v42  ;;  %v5862_v3 = vadd.f32 %v5861_v57, %v5628_v0  ;;  %v6393_v57 = vpop.f32.mrf.mxu1 }
 0xc43   :  { %v5630_v4 = vpop.f32.mrf.mxu0 }
 0xc44   :  { %8094 = vtanh.f32 %v5862_v3  ;;  %v5864_v45 = vadd.f32 %v5863_v39, %v5630_v4  ;;  %v6395_v39 = vpop.f32.mrf.mxu1 }
 0xc45   :  { %v8083_v5 = vpop.eup %8082  ;;  %v5634_v52 = vpop.f32.mrf.mxu0 }
 0xc46   :  { %6434 = vst [vmem:[%s9653_s13] sm:$0xff] %v8083_v5  ;;  %8096 = vtanh.f32 %v5864_v45  ;;  %v5868_v38 = vadd.f32 %v5867_v63, %v5634_v52  ;;  %v6399_v40 = vpop.f32.mrf.mxu1 }
 0xc47   :  { %v8085_v8 = vpop.eup %8084  ;;  %v5636_v13 = vpop.f32.mrf.mxu0 }
 0xc48   :  { %6435 = vst.msk [vmem:[%s9653_s13 + $0x8] sm:$0xff] %vm5139_vm4, %v8085_v8  ;;  %8098 = vtanh.f32 %v5868_v38  ;;  %v5870_v22 = vadd.f32 %v5869_v6, %v5636_v13  ;;  %v6401_v21 = vpop.f32.mrf.mxu1 }
 0xc49   :  { %v8087_v16 = vpop.eup %8086  ;;  %v5638_v20 = vpop.f32.mrf.mxu0 }
 0xc4a   :  { %6436 = vst [vmem:[%s9653_s13 + $0x10] sm:$0xff] %v8087_v16  ;;  %8100 = vtanh.f32 %v5870_v22  ;;  %v5872_v32 = vadd.f32 %v5871_v25, %v5638_v20  ;;  %v6403_v25 = vpop.f32.mrf.mxu1 }
 0xc4b   :  { %v8089_v37 = vpop.eup %8088  ;;  %v5640_v59 = vpop.f32.mrf.mxu0 }
 0xc4c   :  { %6437 = vst.msk [vmem:[%s9653_s13 + $0x18] sm:$0xff] %vm5139_vm4, %v8089_v37  ;;  %8102 = vtanh.f32 %v5872_v32  ;;  %v5874_v29 = vadd.f32 %v5873_v46, %v5640_v59  ;;  %v6405_v46 = vpop.f32.mrf.mxu1 }
 0xc4d   :  { %v8091_v48 = vpop.eup %8090  ;;  %v5644_v10 = vpop.f32.mrf.mxu0 }
 0xc4e   :  { %6438 = vst [vmem:[%s9653_s13 + $0x20] sm:$0xff] %v8091_v48  ;;  %8104 = vtanh.f32 %v5874_v29  ;;  %v5878_v60 = vadd.f32 %v5877_v12, %v5644_v10  ;;  %v6409_v12 = vpop.f32.mrf.mxu1 }
 0xc4f   :  { %v8093_v28 = vpop.eup %8092  ;;  %v5646_v61 = vpop.f32.mrf.mxu0 }
 0xc50   :  { %6439 = vst.msk [vmem:[%s9653_s13 + $0x28] sm:$0xff] %vm5139_vm4, %v8093_v28  ;;  %8106 = vtanh.f32 %v5878_v60  ;;  %v5880_v35 = vadd.f32 %v5879_v18, %v5646_v61  ;;  %v6411_v18 = vpop.f32.mrf.mxu1 }
 0xc51   :  { %v8095_v36 = vpop.eup %8094  ;;  %v5648_v11 = vpop.f32.mrf.mxu0 }
 0xc52   :  { %6440 = vst [vmem:[%s9653_s13 + $0x30] sm:$0xff] %v8095_v36  ;;  %8108 = vtanh.f32 %v5880_v35  ;;  %v5882_v33 = vadd.f32 %v5881_v43, %v5648_v11  ;;  %v6413_v43 = vpop.f32.mrf.mxu1 }
 0xc53   :  { %v8097_v27 = vpop.eup %8096  ;;  %v5650_v50 = vpop.f32.mrf.mxu0 }
 0xc54   :  { %6441 = vst.msk [vmem:[%s9653_s13 + $0x38] sm:$0xff] %vm5139_vm4, %v8097_v27  ;;  %8110 = vtanh.f32 %v5882_v33  ;;  %v5884_v51 = vadd.f32 %v5883_v34, %v5650_v50  ;;  %v6415_v34 = vpop.f32.mrf.mxu1 }
 0xc55   :  { %v8099_v53 = vpop.eup %8098 }
 0xc56   :  { %6442 = vst [vmem:[%s9653_s13 + $0x40] sm:$0xff] %v8099_v53  ;;  %8112 = vtanh.f32 %v5884_v51 }
 0xc57   :  { %v8101_v49 = vpop.eup %8100 }
 0xc58   :  { %6443 = vst.msk [vmem:[%s9653_s13 + $0x48] sm:$0xff] %vm5139_vm4, %v8101_v49 }
 0xc59   :  { %v8103_v54 = vpop.eup %8102 }
 0xc5a   :  { %6444 = vst [vmem:[%s9653_s13 + $0x50] sm:$0xff] %v8103_v54 }
 0xc5b   :  { %v8105_v55 = vpop.eup %8104 }
 0xc5c   :  { %6445 = vst.msk [vmem:[%s9653_s13 + $0x58] sm:$0xff] %vm5139_vm4, %v8105_v55 }
 0xc5d   :  { %v8107_v58 = vpop.eup %8106 }
 0xc5e   :  { %6446 = vst [vmem:[%s9653_s13 + $0x60] sm:$0xff] %v8107_v58 }
 0xc5f   :  { %v8109_v19 = vpop.eup %8108 }
 0xc60   :  { %6447 = vst.msk [vmem:[%s9653_s13 + $0x68] sm:$0xff] %vm5139_vm4, %v8109_v19 }
 0xc61   :  { %v8111_v56 = vpop.eup %8110 }
 0xc62   :  { %6448 = vst [vmem:[%s9653_s13 + $0x70] sm:$0xff] %v8111_v56 }
 0xc63   :  { %v8113_v31 = vpop.eup %8112 }
 0xc64   :  { %6449 = vst.msk [vmem:[%s9653_s13 + $0x78] sm:$0xff] %vm5139_vm4, %v8113_v31 }
 0xc75   :  { %v6146_v14 = vpop.f32.mrf.mxu0 }
 0xc76   :  { %v6380_v23 = vadd.f32 %v6379_v47, %v6146_v14 }
 0xc77   :  { %v6148_v63 = vpop.f32.mrf.mxu0 }
 0xc78   :  { %8114 = vtanh.f32 %v6380_v23  ;;  %v6382_v9 = vadd.f32 %v6381_v30, %v6148_v63 }
 0xc79   :  { %v6150_v7 = vpop.f32.mrf.mxu0 }
 0xc7a   :  { %8116 = vtanh.f32 %v6382_v9  ;;  %v6384_v24 = vadd.f32 %v6383_v62, %v6150_v7 }
 0xc7b   :  { %v6152_v6 = vpop.f32.mrf.mxu0 }
 0xc7c   :  { %8118 = vtanh.f32 %v6384_v24  ;;  %v6386_v41 = vadd.f32 %v6385_v44, %v6152_v6 }
 0xc7d   :  { %v6156_v26 = vpop.f32.mrf.mxu0 }
 0xc7e   :  { %8120 = vtanh.f32 %v6386_v41  ;;  %v6390_v1 = vadd.f32 %v6389_v17, %v6156_v26 }
 0xc7f   :  { %v6158_v2 = vpop.f32.mrf.mxu0 }
 0xc80   :  { %8122 = vtanh.f32 %v6390_v1  ;;  %v6392_v42 = vadd.f32 %v6391_v15, %v6158_v2 }
 0xc81   :  { %v6160_v0 = vpop.f32.mrf.mxu0 }
 0xc82   :  { %8124 = vtanh.f32 %v6392_v42  ;;  %v6394_v3 = vadd.f32 %v6393_v57, %v6160_v0 }
 0xc83   :  { %v6162_v4 = vpop.f32.mrf.mxu0 }
 0xc84   :  { %8126 = vtanh.f32 %v6394_v3  ;;  %v6396_v45 = vadd.f32 %v6395_v39, %v6162_v4 }
 0xc85   :  { %v8115_v5 = vpop.eup %8114  ;;  %v6166_v52 = vpop.f32.mrf.mxu0 }
 0xc86   :  { %6466 = vst [vmem:[%s9653_s13 + $0x80] sm:$0xff] %v8115_v5  ;;  %8128 = vtanh.f32 %v6396_v45  ;;  %v6400_v38 = vadd.f32 %v6399_v40, %v6166_v52 }
 0xc87   :  { %v8117_v8 = vpop.eup %8116  ;;  %v6168_v13 = vpop.f32.mrf.mxu0 }
 0xc88   :  { %6467 = vst.msk [vmem:[%s9653_s13 + $0x88] sm:$0xff] %vm5139_vm4, %v8117_v8  ;;  %8130 = vtanh.f32 %v6400_v38  ;;  %v6402_v22 = vadd.f32 %v6401_v21, %v6168_v13 }
 0xc89   :  { %v8119_v16 = vpop.eup %8118  ;;  %v6170_v20 = vpop.f32.mrf.mxu0 }
 0xc8a   :  { %6468 = vst [vmem:[%s9653_s13 + $0x90] sm:$0xff] %v8119_v16  ;;  %8132 = vtanh.f32 %v6402_v22  ;;  %v6404_v32 = vadd.f32 %v6403_v25, %v6170_v20 }
 0xc8b   :  { %v8121_v37 = vpop.eup %8120  ;;  %v6172_v59 = vpop.f32.mrf.mxu0 }
 0xc8c   :  { %6469 = vst.msk [vmem:[%s9653_s13 + $0x98] sm:$0xff] %vm5139_vm4, %v8121_v37  ;;  %8134 = vtanh.f32 %v6404_v32  ;;  %v6406_v29 = vadd.f32 %v6405_v46, %v6172_v59 }
 0xc8d   :  { %v8123_v48 = vpop.eup %8122  ;;  %v6176_v10 = vpop.f32.mrf.mxu0 }
 0xc8e   :  { %6470 = vst [vmem:[%s9653_s13 + $0xa0] sm:$0xff] %v8123_v48  ;;  %8136 = vtanh.f32 %v6406_v29  ;;  %v6410_v60 = vadd.f32 %v6409_v12, %v6176_v10 }
 0xc8f   :  { %v8125_v28 = vpop.eup %8124  ;;  %v6178_v61 = vpop.f32.mrf.mxu0 }
 0xc90   :  { %6471 = vst.msk [vmem:[%s9653_s13 + $0xa8] sm:$0xff] %vm5139_vm4, %v8125_v28  ;;  %8138 = vtanh.f32 %v6410_v60  ;;  %v6412_v35 = vadd.f32 %v6411_v18, %v6178_v61 }
 0xc91   :  { %v8127_v36 = vpop.eup %8126  ;;  %v6180_v11 = vpop.f32.mrf.mxu0 }
 0xc92   :  { %6472 = vst [vmem:[%s9653_s13 + $0xb0] sm:$0xff] %v8127_v36  ;;  %8140 = vtanh.f32 %v6412_v35  ;;  %v6414_v33 = vadd.f32 %v6413_v43, %v6180_v11 }
 0xc93   :  { %v8129_v27 = vpop.eup %8128  ;;  %v6182_v50 = vpop.f32.mrf.mxu0 }
 0xc94   :  { %6473 = vst.msk [vmem:[%s9653_s13 + $0xb8] sm:$0xff] %vm5139_vm4, %v8129_v27  ;;  %8142 = vtanh.f32 %v6414_v33  ;;  %v6416_v51 = vadd.f32 %v6415_v34, %v6182_v50 }
 0xc95   :  { %v8131_v53 = vpop.eup %8130 }
 0xc96   :  { %6474 = vst [vmem:[%s9653_s13 + $0xc0] sm:$0xff] %v8131_v53  ;;  %8144 = vtanh.f32 %v6416_v51 }
 0xc97   :  { %v8133_v49 = vpop.eup %8132 }
 0xc98   :  { %6475 = vst.msk [vmem:[%s9653_s13 + $0xc8] sm:$0xff] %vm5139_vm4, %v8133_v49 }
 0xc99   :  { %v8135_v47 = vpop.eup %8134 }
 0xc9a   :  { %6476 = vst [vmem:[%s9653_s13 + $0xd0] sm:$0xff] %v8135_v47 }
 0xc9b   :  { %v8137_v54 = vpop.eup %8136 }
 0xc9c   :  { %6477 = vst.msk [vmem:[%s9653_s13 + $0xd8] sm:$0xff] %vm5139_vm4, %v8137_v54 }
 0xc9d   :  { %v8139_v55 = vpop.eup %8138 }
 0xc9e   :  { %6478 = vst [vmem:[%s9653_s13 + $0xe0] sm:$0xff] %v8139_v55 }
 0xc9f   :  { %v8141_v30 = vpop.eup %8140 }
 0xca0   :  { %6479 = vst.msk [vmem:[%s9653_s13 + $0xe8] sm:$0xff] %vm5139_vm4, %v8141_v30 }
 0xca1   :  { %v8143_v58 = vpop.eup %8142 }
 0xca2   :  { %6480 = vst [vmem:[%s9653_s13 + $0xf0] sm:$0xff] %v8143_v58 }
 0xca3   :  { %v8145_v19 = vpop.eup %8144 }
 0xca4   :  { %6481 = vst.msk [vmem:[%s9653_s13 + $0xf8] sm:$0xff] %vm5139_vm4, %v8145_v19 }
 0xca5   :  { %6486 = vsyncpa [#allocation7], 1 }
 0xca6   :  { %6487 = vsyncpa [#allocation9], 1 }

</bundles_post_ra>
